<compile_context>
chip_gen: v7x
topology: tpu7x:2x2x1
jax: 0.10.0
libtpu: 0.0.40
codegen_flags: <defaults>
</compile_context>

<pallas_src>
import functools
import math

import jax
import jax.numpy as jnp
from jax.experimental import pallas as pl
from jax.experimental.pallas import tpu as pltpu


COMPUTE_DTYPE = jnp.bfloat16          # MXU-friendly on v6e/v7x; halves HBM traffic everywhere
# Explicit scoped-VMEM budget: safe on all of v5e/v6e/v7x (v7x has only 64 MiB physical);
# with <=512 tiles and double buffering the working set stays far below this.
VMEM_LIMIT = 32 * 1024 * 1024


def _pick_tile(dim, candidates=(512, 256, 128)):
    """Largest candidate tile that evenly divides `dim`, else the full extent (always legal)."""
    for c in candidates:
        if dim % c == 0:
            return c
    return dim


# ----------------------------- Pallas kernels ---------------------------------

def _matmul_kernel(x_ref, w_ref, b_ref, o_ref, acc_ref, *, activation):
    # x: (tm, tk) bf16, w: (tk, tn) bf16, b: (1, tn) f32, acc: (tm, tn) f32
    @pl.when(pl.program_id(2) == 0)
    def _init():
        acc_ref[...] = jnp.zeros_like(acc_ref)

    acc_ref[...] += jnp.dot(x_ref[...], w_ref[...],
                            preferred_element_type=jnp.float32)

    @pl.when(pl.program_id(2) == pl.num_programs(2) - 1)
    def _finalize():
        y = acc_ref[...] + b_ref[...]
        if activation == "gelu":
            # exact (erf) GELU, matching torch.nn.functional.gelu default
            y = 0.5 * y * (1.0 + jax.lax.erf(y * 0.7071067811865476))
        o_ref[...] = y.astype(o_ref.dtype)


def _ln_finish(x_f32, g_ref, b_ref, o_ref, eps):
    mu = jnp.mean(x_f32, axis=-1, keepdims=True)
    var = jnp.mean(jnp.square(x_f32 - mu), axis=-1, keepdims=True)
    y = (x_f32 - mu) * jax.lax.rsqrt(var + eps)
    o_ref[...] = (y * g_ref[...] + b_ref[...]).astype(o_ref.dtype)


def _layernorm_kernel(x_ref, g_ref, b_ref, o_ref, *, eps):
    _ln_finish(x_ref[...].astype(jnp.float32), g_ref, b_ref, o_ref, eps)


def _add_layernorm_kernel(x_ref, r_ref, g_ref, b_ref, o_ref, *, eps):
    # fused residual add + LayerNorm; stats in f32
    x = x_ref[...].astype(jnp.float32) + r_ref[...].astype(jnp.float32)
    _ln_finish(x, g_ref, b_ref, o_ref, eps)


def _attn_kernel(qkv_ref, o_ref, *, heads, scale):
    # qkv_ref: (1, S, 3*D) for one batch element, feature dim = [q | k | v], head-major.
    # All heads handled in one grid step; output store is a single lane-dense (S, D) write.
    D = qkv_ref.shape[-1] // 3
    Dh = D // heads
    head_outs = []
    for h in range(heads):
        q = qkv_ref[0, :, h * Dh:(h + 1) * Dh]
        k = qkv_ref[0, :, D + h * Dh:D + (h + 1) * Dh]
        v = qkv_ref[0, :, 2 * D + h * Dh:2 * D + (h + 1) * Dh]
        # contract last dims directly -> no explicit k.T (no XLU transpose)
        s = jax.lax.dot_general(q, k, (((1,), (1,)), ((), ())),
                                preferred_element_type=jnp.float32) * scale
        s = s - jnp.max(s, axis=-1, keepdims=True)          # f32 softmax stats
        p = jnp.exp(s)
        p = p * pl.reciprocal(jnp.sum(p, axis=-1, keepdims=True), approx=True)
        head_outs.append(jnp.dot(p.astype(v.dtype), v,
                                 preferred_element_type=jnp.float32))
    o_ref[0] = jnp.concatenate(head_outs, axis=-1).astype(o_ref.dtype)


# ----------------------------- kernel wrappers ---------------------------------

def matmul_bias(x, w, b, *, activation=None, out_dtype=COMPUTE_DTYPE):
    """Tiled (M,K)x(K,N)+b matmul with optional fused exact-GELU epilogue."""
    M, K = x.shape
    K2, N = w.shape
    assert K == K2
    x = x.astype(COMPUTE_DTYPE)
    w = w.astype(COMPUTE_DTYPE)
    b2 = b.reshape(1, N).astype(jnp.float32)

    tm, tn, tk = _pick_tile(M), _pick_tile(N), _pick_tile(K)
    grid = (M // tm, N // tn, K // tk)

    flops = 2 * M * N * K
    transcendentals = M * N if activation == "gelu" else 0
    bytes_accessed = (M * K + K * N) * 2 + N * 4 + M * N * jnp.dtype(out_dtype).itemsize

    return pl.pallas_call(
        functools.partial(_matmul_kernel, activation=activation),
        grid=grid,
        in_specs=[
            pl.BlockSpec((tm, tk), lambda i, j, k: (i, k)),
            pl.BlockSpec((tk, tn), lambda i, j, k: (k, j)),
            pl.BlockSpec((1, tn), lambda i, j, k: (0, j)),
        ],
        out_specs=pl.BlockSpec((tm, tn), lambda i, j, k: (i, j)),
        out_shape=jax.ShapeDtypeStruct((M, N), out_dtype),
        scratch_shapes=[pltpu.VMEM((tm, tn), jnp.float32)],
        compiler_params=pltpu.CompilerParams(
            dimension_semantics=("parallel", "parallel", "arbitrary"),
            vmem_limit_bytes=VMEM_LIMIT),
        cost_estimate=pl.CostEstimate(flops=flops,
                                      transcendentals=transcendentals,
                                      bytes_accessed=bytes_accessed),
    )(x, w, b2)


def _ln_call(kernel, operands, g, b, M, K, out_dtype):
    tm = _pick_tile(M, (1024, 512, 256))
    grid = (M // tm,)
    in_specs = [pl.BlockSpec((tm, K), lambda i: (i, 0)) for _ in operands]
    in_specs += [pl.BlockSpec((1, K), lambda i: (0, 0))] * 2
    return pl.pallas_call(
        kernel,
        grid=grid,
        in_specs=in_specs,
        out_specs=pl.BlockSpec((tm, K), lambda i: (i, 0)),
        out_shape=jax.ShapeDtypeStruct((M, K), out_dtype),
        compiler_params=pltpu.CompilerParams(
            dimension_semantics=("parallel",),
            vmem_limit_bytes=VMEM_LIMIT),
    )(*operands, g.reshape(1, K).astype(jnp.float32),
      b.reshape(1, K).astype(jnp.float32))


def layernorm(x2d, g, b, eps=1e-5):
    M, K = x2d.shape
    return _ln_call(functools.partial(_layernorm_kernel, eps=eps),
                    (x2d.astype(COMPUTE_DTYPE),), g, b, M, K, COMPUTE_DTYPE)


def add_layernorm(x2d, r2d, g, b, eps=1e-5):
    M, K = x2d.shape
    return _ln_call(functools.partial(_add_layernorm_kernel, eps=eps),
                    (x2d.astype(COMPUTE_DTYPE), r2d.astype(COMPUTE_DTYPE)),
                    g, b, M, K, COMPUTE_DTYPE)


def attention(qkv, heads):
    # qkv: (B, S, 3*D), feature dim = [q | k | v] (head-major within each), as produced by
    # the fused QKV projection; no q/k/v transposes are needed outside the kernel.
    B, S, threeD = qkv.shape
    D = threeD // 3
    Dh = D // heads
    scale = 1.0 / math.sqrt(Dh)
    return pl.pallas_call(
        functools.partial(_attn_kernel, heads=heads, scale=scale),
        grid=(B,),
        in_specs=[pl.BlockSpec((1, S, threeD), lambda b: (b, 0, 0))],
        out_specs=pl.BlockSpec((1, S, D), lambda b: (b, 0, 0)),
        out_shape=jax.ShapeDtypeStruct((B, S, D), COMPUTE_DTYPE),
        compiler_params=pltpu.CompilerParams(
            dimension_semantics=("parallel",),
            vmem_limit_bytes=VMEM_LIMIT),
        cost_estimate=pl.CostEstimate(
            flops=4 * B * heads * S * S * Dh,
            transcendentals=B * heads * S * S,
            bytes_accessed=(B * S * threeD + B * S * D) * 2),
    )(qkv.astype(COMPUTE_DTYPE))


# -------------------------- transformer building blocks ------------------------

def transformer_layer(x, p, heads):
    # torch TransformerEncoderLayer, norm_first=False (post-norm), dropout=0, gelu
    B, S, D = x.shape
    xf = x.reshape(B * S, D)
    qkv = matmul_bias(xf, p["wqkv"], p["bqkv"])                 # (B*S, 3D)
    a = attention(qkv.reshape(B, S, 3 * D), heads)              # (B, S, D)
    o = matmul_bias(a.reshape(B * S, D), p["wo"], p["bo"])      # out-proj
    x1 = add_layernorm(xf, o, p["ln1_g"], p["ln1_b"])           # fused residual + LN
    h = matmul_bias(x1, p["w1"], p["b1"], activation="gelu")    # fused Linear + GELU
    h = matmul_bias(h, p["w2"], p["b2"])
    x2 = add_layernorm(x1, h, p["ln2_g"], p["ln2_b"])           # fused residual + LN
    return x2.reshape(B, S, D)


# ------------------------------ parameter init ---------------------------------

def init_layer(key, dim, ff_dim):
    ks = jax.random.split(key, 4)
    s = 0.02
    return dict(
        wqkv=jax.random.normal(ks[0], (dim, 3 * dim), jnp.float32) * s,
        bqkv=jnp.zeros((3 * dim,), jnp.float32),
        wo=jax.random.normal(ks[1], (dim, dim), jnp.float32) * s,
        bo=jnp.zeros((dim,), jnp.float32),
        ln1_g=jnp.ones((dim,), jnp.float32),
        ln1_b=jnp.zeros((dim,), jnp.float32),
        w1=jax.random.normal(ks[2], (dim, ff_dim), jnp.float32) * s,
        b1=jnp.zeros((ff_dim,), jnp.float32),
        w2=jax.random.normal(ks[3], (ff_dim, dim), jnp.float32) * s,
        b2=jnp.zeros((dim,), jnp.float32),
        ln2_g=jnp.ones((dim,), jnp.float32),
        ln2_b=jnp.zeros((dim,), jnp.float32),
    )


def init_params(key, *, channels, image_size, patch, latent, depth, ff_dim):
    flat = channels * patch * patch
    total = (image_size // patch) ** 2
    keys = jax.random.split(key, 8 + 2 * depth)
    enc = dict(
        ln_in_g=jnp.ones((flat,), jnp.float32),
        ln_in_b=jnp.zeros((flat,), jnp.float32),
        w_proj=jax.random.normal(keys[0], (flat, latent), jnp.float32) * 0.02,
        b_proj=jnp.zeros((latent,), jnp.float32),
        ln_out_g=jnp.ones((latent,), jnp.float32),
        ln_out_b=jnp.zeros((latent,), jnp.float32),
        pos=jax.random.normal(keys[1], (1, total, latent), jnp.float32),
        layers=[init_layer(keys[4 + i], latent, ff_dim) for i in range(depth)],
    )
    dec = dict(
        pos=jax.random.normal(keys[2], (1, total, latent), jnp.float32),
        w_out=jax.random.normal(keys[3], (latent, flat), jnp.float32) * 0.02,
        b_out=jnp.zeros((flat,), jnp.float32),
        layers=[init_layer(keys[4 + depth + i], latent, ff_dim) for i in range(depth)],
    )
    mask_token = jax.random.normal(keys[4 + 2 * depth], (latent,), jnp.float32)
    return dict(encoder=enc, decoder=dec, mask_token=mask_token)


# -------------------------------- forward --------------------------------------

def simple_vit_ae_forward(params, x, mask_indices, *, patch, latent, heads):
    B, C, H, W = x.shape
    ph = pw = patch
    hh, ww = H // ph, W // pw
    P = hh * ww
    F = ph * pw * C
    D = latent

    # rearrange 'n c (h ph) (w pw) -> n (h w) (ph pw c)'  (glue)
    patches = (x.reshape(B, C, hh, ph, ww, pw)
                 .transpose(0, 2, 4, 3, 5, 1)
                 .reshape(B, P, F))

    enc = params["encoder"]
    t = layernorm(patches.reshape(B * P, F), enc["ln_in_g"], enc["ln_in_b"])
    t = matmul_bias(t, enc["w_proj"], enc["b_proj"])
    t = layernorm(t, enc["ln_out_g"], enc["ln_out_b"]).reshape(B, P, D)
    t = t + enc["pos"].astype(COMPUTE_DTYPE)

    # gather visible patches:  flat[arange(B)[:,None], mask_indices]   (glue)
    sel = jnp.take_along_axis(t, mask_indices[:, :, None], axis=1)     # (B, n_sel, D)

    for layer in enc["layers"]:
        sel = transformer_layer(sel, layer, heads)

    # decoder tokens: mask_token everywhere, scatter encoded visible patches back (glue)
    dec = params["decoder"]
    tok = jnp.broadcast_to(params["mask_token"].astype(COMPUTE_DTYPE)[None, None, :],
                           (B, P, D))
    tok = tok.at[jnp.arange(B)[:, None], mask_indices].set(sel)

    y = tok + dec["pos"].astype(COMPUTE_DTYPE)
    for layer in dec["layers"]:
        y = transformer_layer(y, layer, heads)

    flat_out = matmul_bias(y.reshape(B * P, D), dec["w_out"], dec["b_out"],
                           out_dtype=jnp.float32).reshape(B, P, F)

    # rearrange 'n (h w) (ph pw c) -> n c (h ph) (w pw)'  (glue)
    img = (flat_out.reshape(B, hh, ww, ph, pw, C)
                   .transpose(0, 5, 1, 3, 2, 4)
                   .reshape(B, C, H, W))
    return img


# ---------------------------------- main ----------------------------------------

if __name__ == "__main__":
    # small config consistent with the module
    B, C, IMG, PATCH = 2, 4, 16, 4
    LATENT, DEPTH, HEADS, FF = 32, 2, 4, 64
    TOTAL_PATCHES = (IMG // PATCH) ** 2      # 16
    N_SEL = 8                                # number of visible (unmasked) patches

    key = jax.random.PRNGKey(0)
    kx, km, kp = jax.random.split(key, 3)

    x = jax.random.normal(kx, (B, C, IMG, IMG), jnp.float32)
    mask_indices = jnp.stack(
        [
            jax.random.permutation(jax.random.fold_in(km, b), TOTAL_PATCHES)[:N_SEL]
            for b in range(B)
        ]
    ).astype(jnp.int32)                      # (B, N_SEL), unique per row

    params = init_params(
        kp,
        channels=C,
        image_size=IMG,
        patch=PATCH,
        latent=LATENT,
        depth=DEPTH,
        ff_dim=FF,
    )

    fwd = jax.jit(functools.partial(
        simple_vit_ae_forward, patch=PATCH, latent=LATENT, heads=HEADS))

    out = fwd(params, x, mask_indices)
    jax.block_until_ready(out)
    assert out.shape == (B, C, IMG, IMG), out.shape
    print("KERNEL_OK")
</pallas_src>

<mosaic_0001>
module attributes {stable_mosaic.version = 11 : i64} {
  func.func @_layernorm_kernel(%arg0: i32, %arg1: memref<32x64xbf16, #tpu.memory_space<vmem>>, %arg2: memref<1x64xf32, #tpu.memory_space<vmem>>, %arg3: memref<1x64xf32, #tpu.memory_space<vmem>>, %arg4: memref<32x64xbf16, #tpu.memory_space<vmem>>) attributes {dimension_semantics = [#tpu.dimension_semantics<parallel>], iteration_bounds = array<i64: 1>, scalar_prefetch = 0 : i64, scratch_operands = 0 : i64, tpu.core_type = #tpu.core_type<tc>, window_params = [{transform_indices = @transform_0, window_bounds = array<i64: 32, 64>}, {pipeline_mode = #tpu.pipeline_mode<synchronous>, transform_indices = @transform_1, window_bounds = array<i64: 1, 64>}, {pipeline_mode = #tpu.pipeline_mode<synchronous>, transform_indices = @transform_2, window_bounds = array<i64: 1, 64>}, {transform_indices = @transform_3, window_bounds = array<i64: 32, 64>}]} {
    %c0 = arith.constant 0 : index
    %c0_0 = arith.constant 0 : index
    %0 = vector.load %arg1[%c0, %c0_0] : memref<32x64xbf16, #tpu.memory_space<vmem>>, vector<32x64xbf16>
    %1 = arith.extf %0 : vector<32x64xbf16> to vector<32x64xf32>
    %cst = arith.constant dense<0.000000e+00> : vector<32xf32>
    %2 = vector.multi_reduction <add>, %1, %cst [1] : vector<32x64xf32> to vector<32xf32>
    %3 = vector.shape_cast %2 : vector<32xf32> to vector<32x1xf32>
    %cst_1 = arith.constant 6.400000e+01 : f32
    %4 = vector.broadcast %cst_1 : f32 to vector<32x1xf32>
    %5 = arith.divf %3, %4 : vector<32x1xf32>
    %6 = vector.broadcast %5 : vector<32x1xf32> to vector<32x64xf32>
    %7 = arith.subf %1, %6 : vector<32x64xf32>
    %8 = arith.mulf %7, %7 : vector<32x64xf32>
    %cst_2 = arith.constant dense<0.000000e+00> : vector<32xf32>
    %9 = vector.multi_reduction <add>, %8, %cst_2 [1] : vector<32x64xf32> to vector<32xf32>
    %10 = vector.shape_cast %9 : vector<32xf32> to vector<32x1xf32>
    %cst_3 = arith.constant 6.400000e+01 : f32
    %11 = vector.broadcast %cst_3 : f32 to vector<32x1xf32>
    %12 = arith.divf %10, %11 : vector<32x1xf32>
    %13 = vector.broadcast %5 : vector<32x1xf32> to vector<32x64xf32>
    %14 = arith.subf %1, %13 : vector<32x64xf32>
    %cst_4 = arith.constant 9.99999974E-6 : f32
    %15 = vector.broadcast %cst_4 : f32 to vector<32x1xf32>
    %16 = arith.addf %12, %15 : vector<32x1xf32>
    %17 = math.rsqrt %16 : vector<32x1xf32>
    %18 = vector.broadcast %17 : vector<32x1xf32> to vector<32x64xf32>
    %19 = arith.mulf %14, %18 : vector<32x64xf32>
    %c0_5 = arith.constant 0 : index
    %c0_6 = arith.constant 0 : index
    %20 = vector.load %arg2[%c0_5, %c0_6] : memref<1x64xf32, #tpu.memory_space<vmem>>, vector<1x64xf32>
    %21 = vector.broadcast %20 : vector<1x64xf32> to vector<32x64xf32>
    %22 = arith.mulf %19, %21 : vector<32x64xf32>
    %c0_7 = arith.constant 0 : index
    %c0_8 = arith.constant 0 : index
    %23 = vector.load %arg3[%c0_7, %c0_8] : memref<1x64xf32, #tpu.memory_space<vmem>>, vector<1x64xf32>
    %24 = vector.broadcast %23 : vector<1x64xf32> to vector<32x64xf32>
    %25 = arith.addf %22, %24 : vector<32x64xf32>
    %26 = arith.truncf %25 : vector<32x64xf32> to vector<32x64xbf16>
    %c0_9 = arith.constant 0 : index
    %c0_10 = arith.constant 0 : index
    %27 = vector.load %arg4[%c0_9, %c0_10] : memref<32x64xbf16, #tpu.memory_space<vmem>>, vector<32x64xbf16>
    tpu.vector_store %arg4[%c0_9, %c0_10], %26 {strides = array<i32>} : memref<32x64xbf16, #tpu.memory_space<vmem>>, vector<32x64xbf16>,
    return
  }
  func.func @transform_0(%arg0: i32) -> (i32, i32) {
    %c0_i32 = arith.constant 0 : i32
    %c0_i32_0 = arith.constant 0 : i32
    return %arg0, %c0_i32 : i32, i32
  }
  func.func @transform_1(%arg0: i32) -> (i32, i32) {
    %c0_i32 = arith.constant 0 : i32
    %c0_i32_0 = arith.constant 0 : i32
    %c0_i32_1 = arith.constant 0 : i32
    return %c0_i32, %c0_i32_0 : i32, i32
  }
  func.func @transform_2(%arg0: i32) -> (i32, i32) {
    %c0_i32 = arith.constant 0 : i32
    %c0_i32_0 = arith.constant 0 : i32
    %c0_i32_1 = arith.constant 0 : i32
    return %c0_i32, %c0_i32_0 : i32, i32
  }
  func.func @transform_3(%arg0: i32) -> (i32, i32) {
    %c0_i32 = arith.constant 0 : i32
    %c0_i32_0 = arith.constant 0 : i32
    return %arg0, %c0_i32 : i32, i32
  }
}

module attributes {stable_mosaic.version = 11 : i64} {
  func.func @_matmul_kernel(%arg0: i32, %arg1: i32, %arg2: i32, %arg3: memref<32x64xbf16, #tpu.memory_space<vmem>>, %arg4: memref<64x32xbf16, #tpu.memory_space<vmem>>, %arg5: memref<1x32xf32, #tpu.memory_space<vmem>>, %arg6: memref<32x32xbf16, #tpu.memory_space<vmem>>, %arg7: memref<32x32xf32, #tpu.memory_space<vmem>>) attributes {dimension_semantics = [#tpu.dimension_semantics<parallel>, #tpu.dimension_semantics<parallel>, #tpu.dimension_semantics<arbitrary>], iteration_bounds = array<i64: 1, 1, 1>, scalar_prefetch = 0 : i64, scratch_operands = 1 : i64, tpu.core_type = #tpu.core_type<tc>, window_params = [{transform_indices = @transform_0, window_bounds = array<i64: 32, 64>}, {transform_indices = @transform_1, window_bounds = array<i64: 64, 32>}, {transform_indices = @transform_2, window_bounds = array<i64: 1, 32>}, {transform_indices = @transform_3, window_bounds = array<i64: 32, 32>}]} {
    %c0_i32 = arith.constant 0 : i32
    %0 = arith.cmpi eq, %arg2, %c0_i32 : i32
    %1 = arith.extui %0 : i1 to i32
    %c0_i32_0 = arith.constant 0 : i32
    %2 = arith.cmpi ne, %1, %c0_i32_0 : i32
    scf.if %2 {
      %cst_10 = arith.constant 0.000000e+00 : f32
      %12 = vector.broadcast %cst_10 : f32 to vector<32x32xf32>
      %c0_11 = arith.constant 0 : index
      %c0_12 = arith.constant 0 : index
      %13 = vector.load %arg7[%c0_11, %c0_12] : memref<32x32xf32, #tpu.memory_space<vmem>>, vector<32x32xf32>
      tpu.vector_store %arg7[%c0_11, %c0_12], %12 {strides = array<i32>} : memref<32x32xf32, #tpu.memory_space<vmem>>, vector<32x32xf32>,
    } else {
    }
    %c0 = arith.constant 0 : index
    %c0_1 = arith.constant 0 : index
    %3 = vector.load %arg7[%c0, %c0_1] : memref<32x32xf32, #tpu.memory_space<vmem>>, vector<32x32xf32>
    %c0_2 = arith.constant 0 : index
    %c0_3 = arith.constant 0 : index
    %4 = vector.load %arg3[%c0_2, %c0_3] : memref<32x64xbf16, #tpu.memory_space<vmem>>, vector<32x64xbf16>
    %c0_4 = arith.constant 0 : index
    %c0_5 = arith.constant 0 : index
    %5 = vector.load %arg4[%c0_4, %c0_5] : memref<64x32xbf16, #tpu.memory_space<vmem>>, vector<64x32xbf16>
    %cst = arith.constant dense<0.000000e+00> : vector<32x32xf32>
    %6 = tpu.matmul %4, %5, %cst {dimension_numbers = #tpu.dot_dimension_numbers<[1], [0], [0], [1], [0, 0, 1, 1], [], []>} : vector<32x64xbf16>, vector<64x32xbf16>, vector<32x32xf32> -> vector<32x32xf32>
    %7 = arith.addf %3, %6 : vector<32x32xf32>
    %c0_6 = arith.constant 0 : index
    %c0_7 = arith.constant 0 : index
    %8 = vector.load %arg7[%c0_6, %c0_7] : memref<32x32xf32, #tpu.memory_space<vmem>>, vector<32x32xf32>
    tpu.vector_store %arg7[%c0_6, %c0_7], %7 {strides = array<i32>} : memref<32x32xf32, #tpu.memory_space<vmem>>, vector<32x32xf32>,
    %c0_i32_8 = arith.constant 0 : i32
    %9 = arith.cmpi eq, %arg2, %c0_i32_8 : i32
    %10 = arith.extui %9 : i1 to i32
    %c0_i32_9 = arith.constant 0 : i32
    %11 = arith.cmpi ne, %10, %c0_i32_9 : i32
    scf.if %11 {
      %c0_10 = arith.constant 0 : index
      %c0_11 = arith.constant 0 : index
      %12 = vector.load %arg7[%c0_10, %c0_11] : memref<32x32xf32, #tpu.memory_space<vmem>>, vector<32x32xf32>
      %c0_12 = arith.constant 0 : index
      %c0_13 = arith.constant 0 : index
      %13 = vector.load %arg5[%c0_12, %c0_13] : memref<1x32xf32, #tpu.memory_space<vmem>>, vector<1x32xf32>
      %14 = vector.broadcast %13 : vector<1x32xf32> to vector<32x32xf32>
      %15 = arith.addf %12, %14 : vector<32x32xf32>
      %16 = arith.truncf %15 : vector<32x32xf32> to vector<32x32xbf16>
      %c0_14 = arith.constant 0 : index
      %c0_15 = arith.constant 0 : index
      %17 = vector.load %arg6[%c0_14, %c0_15] : memref<32x32xbf16, #tpu.memory_space<vmem>>, vector<32x32xbf16>
      tpu.vector_store %arg6[%c0_14, %c0_15], %16 {strides = array<i32>} : memref<32x32xbf16, #tpu.memory_space<vmem>>, vector<32x32xbf16>,
    } else {
    }
    return
  }
  func.func @transform_0(%arg0: i32, %arg1: i32, %arg2: i32) -> (i32, i32) {
    %c0_i32 = arith.constant 0 : i32
    return %arg0, %arg2 : i32, i32
  }
  func.func @transform_1(%arg0: i32, %arg1: i32, %arg2: i32) -> (i32, i32) {
    %c0_i32 = arith.constant 0 : i32
    return %arg2, %arg1 : i32, i32
  }
  func.func @transform_2(%arg0: i32, %arg1: i32, %arg2: i32) -> (i32, i32) {
    %c0_i32 = arith.constant 0 : i32
    %c0_i32_0 = arith.constant 0 : i32
    return %c0_i32, %arg1 : i32, i32
  }
  func.func @transform_3(%arg0: i32, %arg1: i32, %arg2: i32) -> (i32, i32) {
    %c0_i32 = arith.constant 0 : i32
    return %arg0, %arg1 : i32, i32
  }
}

module attributes {stable_mosaic.version = 11 : i64} {
  func.func @_layernorm_kernel(%arg0: i32, %arg1: memref<32x32xbf16, #tpu.memory_space<vmem>>, %arg2: memref<1x32xf32, #tpu.memory_space<vmem>>, %arg3: memref<1x32xf32, #tpu.memory_space<vmem>>, %arg4: memref<32x32xbf16, #tpu.memory_space<vmem>>) attributes {dimension_semantics = [#tpu.dimension_semantics<parallel>], iteration_bounds = array<i64: 1>, scalar_prefetch = 0 : i64, scratch_operands = 0 : i64, tpu.core_type = #tpu.core_type<tc>, window_params = [{transform_indices = @transform_0, window_bounds = array<i64: 32, 32>}, {pipeline_mode = #tpu.pipeline_mode<synchronous>, transform_indices = @transform_1, window_bounds = array<i64: 1, 32>}, {pipeline_mode = #tpu.pipeline_mode<synchronous>, transform_indices = @transform_2, window_bounds = array<i64: 1, 32>}, {transform_indices = @transform_3, window_bounds = array<i64: 32, 32>}]} {
    %c0 = arith.constant 0 : index
    %c0_0 = arith.constant 0 : index
    %0 = vector.load %arg1[%c0, %c0_0] : memref<32x32xbf16, #tpu.memory_space<vmem>>, vector<32x32xbf16>
    %1 = arith.extf %0 : vector<32x32xbf16> to vector<32x32xf32>
    %cst = arith.constant dense<0.000000e+00> : vector<32xf32>
    %2 = vector.multi_reduction <add>, %1, %cst [1] : vector<32x32xf32> to vector<32xf32>
    %3 = vector.shape_cast %2 : vector<32xf32> to vector<32x1xf32>
    %cst_1 = arith.constant 3.200000e+01 : f32
    %4 = vector.broadcast %cst_1 : f32 to vector<32x1xf32>
    %5 = arith.divf %3, %4 : vector<32x1xf32>
    %6 = vector.broadcast %5 : vector<32x1xf32> to vector<32x32xf32>
    %7 = arith.subf %1, %6 : vector<32x32xf32>
    %8 = arith.mulf %7, %7 : vector<32x32xf32>
    %cst_2 = arith.constant dense<0.000000e+00> : vector<32xf32>
    %9 = vector.multi_reduction <add>, %8, %cst_2 [1] : vector<32x32xf32> to vector<32xf32>
    %10 = vector.shape_cast %9 : vector<32xf32> to vector<32x1xf32>
    %cst_3 = arith.constant 3.200000e+01 : f32
    %11 = vector.broadcast %cst_3 : f32 to vector<32x1xf32>
    %12 = arith.divf %10, %11 : vector<32x1xf32>
    %13 = vector.broadcast %5 : vector<32x1xf32> to vector<32x32xf32>
    %14 = arith.subf %1, %13 : vector<32x32xf32>
    %cst_4 = arith.constant 9.99999974E-6 : f32
    %15 = vector.broadcast %cst_4 : f32 to vector<32x1xf32>
    %16 = arith.addf %12, %15 : vector<32x1xf32>
    %17 = math.rsqrt %16 : vector<32x1xf32>
    %18 = vector.broadcast %17 : vector<32x1xf32> to vector<32x32xf32>
    %19 = arith.mulf %14, %18 : vector<32x32xf32>
    %c0_5 = arith.constant 0 : index
    %c0_6 = arith.constant 0 : index
    %20 = vector.load %arg2[%c0_5, %c0_6] : memref<1x32xf32, #tpu.memory_space<vmem>>, vector<1x32xf32>
    %21 = vector.broadcast %20 : vector<1x32xf32> to vector<32x32xf32>
    %22 = arith.mulf %19, %21 : vector<32x32xf32>
    %c0_7 = arith.constant 0 : index
    %c0_8 = arith.constant 0 : index
    %23 = vector.load %arg3[%c0_7, %c0_8] : memref<1x32xf32, #tpu.memory_space<vmem>>, vector<1x32xf32>
    %24 = vector.broadcast %23 : vector<1x32xf32> to vector<32x32xf32>
    %25 = arith.addf %22, %24 : vector<32x32xf32>
    %26 = arith.truncf %25 : vector<32x32xf32> to vector<32x32xbf16>
    %c0_9 = arith.constant 0 : index
    %c0_10 = arith.constant 0 : index
    %27 = vector.load %arg4[%c0_9, %c0_10] : memref<32x32xbf16, #tpu.memory_space<vmem>>, vector<32x32xbf16>
    tpu.vector_store %arg4[%c0_9, %c0_10], %26 {strides = array<i32>} : memref<32x32xbf16, #tpu.memory_space<vmem>>, vector<32x32xbf16>,
    return
  }
  func.func @transform_0(%arg0: i32) -> (i32, i32) {
    %c0_i32 = arith.constant 0 : i32
    %c0_i32_0 = arith.constant 0 : i32
    return %arg0, %c0_i32 : i32, i32
  }
  func.func @transform_1(%arg0: i32) -> (i32, i32) {
    %c0_i32 = arith.constant 0 : i32
    %c0_i32_0 = arith.constant 0 : i32
    %c0_i32_1 = arith.constant 0 : i32
    return %c0_i32, %c0_i32_0 : i32, i32
  }
  func.func @transform_2(%arg0: i32) -> (i32, i32) {
    %c0_i32 = arith.constant 0 : i32
    %c0_i32_0 = arith.constant 0 : i32
    %c0_i32_1 = arith.constant 0 : i32
    return %c0_i32, %c0_i32_0 : i32, i32
  }
  func.func @transform_3(%arg0: i32) -> (i32, i32) {
    %c0_i32 = arith.constant 0 : i32
    %c0_i32_0 = arith.constant 0 : i32
    return %arg0, %c0_i32 : i32, i32
  }
}

module attributes {stable_mosaic.version = 11 : i64} {
  func.func @_matmul_kernel(%arg0: i32, %arg1: i32, %arg2: i32, %arg3: memref<16x32xbf16, #tpu.memory_space<vmem>>, %arg4: memref<32x96xbf16, #tpu.memory_space<vmem>>, %arg5: memref<1x96xf32, #tpu.memory_space<vmem>>, %arg6: memref<16x96xbf16, #tpu.memory_space<vmem>>, %arg7: memref<16x96xf32, #tpu.memory_space<vmem>>) attributes {dimension_semantics = [#tpu.dimension_semantics<parallel>, #tpu.dimension_semantics<parallel>, #tpu.dimension_semantics<arbitrary>], iteration_bounds = array<i64: 1, 1, 1>, scalar_prefetch = 0 : i64, scratch_operands = 1 : i64, tpu.core_type = #tpu.core_type<tc>, window_params = [{transform_indices = @transform_0, window_bounds = array<i64: 16, 32>}, {transform_indices = @transform_1, window_bounds = array<i64: 32, 96>}, {transform_indices = @transform_2, window_bounds = array<i64: 1, 96>}, {transform_indices = @transform_3, window_bounds = array<i64: 16, 96>}]} {
    %c0_i32 = arith.constant 0 : i32
    %0 = arith.cmpi eq, %arg2, %c0_i32 : i32
    %1 = arith.extui %0 : i1 to i32
    %c0_i32_0 = arith.constant 0 : i32
    %2 = arith.cmpi ne, %1, %c0_i32_0 : i32
    scf.if %2 {
      %cst_10 = arith.constant 0.000000e+00 : f32
      %12 = vector.broadcast %cst_10 : f32 to vector<16x96xf32>
      %c0_11 = arith.constant 0 : index
      %c0_12 = arith.constant 0 : index
      %13 = vector.load %arg7[%c0_11, %c0_12] : memref<16x96xf32, #tpu.memory_space<vmem>>, vector<16x96xf32>
      tpu.vector_store %arg7[%c0_11, %c0_12], %12 {strides = array<i32>} : memref<16x96xf32, #tpu.memory_space<vmem>>, vector<16x96xf32>,
    } else {
    }
    %c0 = arith.constant 0 : index
    %c0_1 = arith.constant 0 : index
    %3 = vector.load %arg7[%c0, %c0_1] : memref<16x96xf32, #tpu.memory_space<vmem>>, vector<16x96xf32>
    %c0_2 = arith.constant 0 : index
    %c0_3 = arith.constant 0 : index
    %4 = vector.load %arg3[%c0_2, %c0_3] : memref<16x32xbf16, #tpu.memory_space<vmem>>, vector<16x32xbf16>
    %c0_4 = arith.constant 0 : index
    %c0_5 = arith.constant 0 : index
    %5 = vector.load %arg4[%c0_4, %c0_5] : memref<32x96xbf16, #tpu.memory_space<vmem>>, vector<32x96xbf16>
    %cst = arith.constant dense<0.000000e+00> : vector<16x96xf32>
    %6 = tpu.matmul %4, %5, %cst {dimension_numbers = #tpu.dot_dimension_numbers<[1], [0], [0], [1], [0, 0, 1, 1], [], []>} : vector<16x32xbf16>, vector<32x96xbf16>, vector<16x96xf32> -> vector<16x96xf32>
    %7 = arith.addf %3, %6 : vector<16x96xf32>
    %c0_6 = arith.constant 0 : index
    %c0_7 = arith.constant 0 : index
    %8 = vector.load %arg7[%c0_6, %c0_7] : memref<16x96xf32, #tpu.memory_space<vmem>>, vector<16x96xf32>
    tpu.vector_store %arg7[%c0_6, %c0_7], %7 {strides = array<i32>} : memref<16x96xf32, #tpu.memory_space<vmem>>, vector<16x96xf32>,
    %c0_i32_8 = arith.constant 0 : i32
    %9 = arith.cmpi eq, %arg2, %c0_i32_8 : i32
    %10 = arith.extui %9 : i1 to i32
    %c0_i32_9 = arith.constant 0 : i32
    %11 = arith.cmpi ne, %10, %c0_i32_9 : i32
    scf.if %11 {
      %c0_10 = arith.constant 0 : index
      %c0_11 = arith.constant 0 : index
      %12 = vector.load %arg7[%c0_10, %c0_11] : memref<16x96xf32, #tpu.memory_space<vmem>>, vector<16x96xf32>
      %c0_12 = arith.constant 0 : index
      %c0_13 = arith.constant 0 : index
      %13 = vector.load %arg5[%c0_12, %c0_13] : memref<1x96xf32, #tpu.memory_space<vmem>>, vector<1x96xf32>
      %14 = vector.broadcast %13 : vector<1x96xf32> to vector<16x96xf32>
      %15 = arith.addf %12, %14 : vector<16x96xf32>
      %16 = arith.truncf %15 : vector<16x96xf32> to vector<16x96xbf16>
      %c0_14 = arith.constant 0 : index
      %c0_15 = arith.constant 0 : index
      %17 = vector.load %arg6[%c0_14, %c0_15] : memref<16x96xbf16, #tpu.memory_space<vmem>>, vector<16x96xbf16>
      tpu.vector_store %arg6[%c0_14, %c0_15], %16 {strides = array<i32>} : memref<16x96xbf16, #tpu.memory_space<vmem>>, vector<16x96xbf16>,
    } else {
    }
    return
  }
  func.func @transform_0(%arg0: i32, %arg1: i32, %arg2: i32) -> (i32, i32) {
    %c0_i32 = arith.constant 0 : i32
    return %arg0, %arg2 : i32, i32
  }
  func.func @transform_1(%arg0: i32, %arg1: i32, %arg2: i32) -> (i32, i32) {
    %c0_i32 = arith.constant 0 : i32
    return %arg2, %arg1 : i32, i32
  }
  func.func @transform_2(%arg0: i32, %arg1: i32, %arg2: i32) -> (i32, i32) {
    %c0_i32 = arith.constant 0 : i32
    %c0_i32_0 = arith.constant 0 : i32
    return %c0_i32, %arg1 : i32, i32
  }
  func.func @transform_3(%arg0: i32, %arg1: i32, %arg2: i32) -> (i32, i32) {
    %c0_i32 = arith.constant 0 : i32
    return %arg0, %arg1 : i32, i32
  }
}

module attributes {stable_mosaic.version = 11 : i64} {
  func.func @_attn_kernel(%arg0: i32, %arg1: memref<1x8x96xbf16, #tpu.memory_space<vmem>>, %arg2: memref<1x8x32xbf16, #tpu.memory_space<vmem>>) attributes {dimension_semantics = [#tpu.dimension_semantics<parallel>], iteration_bounds = array<i64: 2>, scalar_prefetch = 0 : i64, scratch_operands = 0 : i64, tpu.core_type = #tpu.core_type<tc>, window_params = [{transform_indices = @transform_0, window_bounds = array<i64: 1, 8, 96>}, {transform_indices = @transform_1, window_bounds = array<i64: 1, 8, 32>}]} {
    %c0 = arith.constant 0 : index
    %c0_0 = arith.constant 0 : index
    %c0_1 = arith.constant 0 : index
    %0 = vector.load %arg1[%c0, %c0_0, %c0_1] : memref<1x8x96xbf16, #tpu.memory_space<vmem>>, vector<1x8x8xbf16>
    %1 = vector.shape_cast %0 : vector<1x8x8xbf16> to vector<8x8xbf16>
    %c0_2 = arith.constant 0 : index
    %c0_3 = arith.constant 0 : index
    %c32 = arith.constant 32 : index
    %2 = vector.load %arg1[%c0_2, %c0_3, %c32] : memref<1x8x96xbf16, #tpu.memory_space<vmem>>, vector<1x8x8xbf16>
    %3 = vector.shape_cast %2 : vector<1x8x8xbf16> to vector<8x8xbf16>
    %c0_4 = arith.constant 0 : index
    %c0_5 = arith.constant 0 : index
    %c64 = arith.constant 64 : index
    %4 = vector.load %arg1[%c0_4, %c0_5, %c64] : memref<1x8x96xbf16, #tpu.memory_space<vmem>>, vector<1x8x8xbf16>
    %5 = vector.shape_cast %4 : vector<1x8x8xbf16> to vector<8x8xbf16>
    %cst = arith.constant dense<0.000000e+00> : vector<8x8xf32>
    %6 = tpu.matmul %1, %3, %cst {dimension_numbers = #tpu.dot_dimension_numbers<[1], [1], [0], [0], [0, 0, 1, 0], [], []>} : vector<8x8xbf16>, vector<8x8xbf16>, vector<8x8xf32> -> vector<8x8xf32>
    %cst_6 = arith.constant 0.353553385 : f32
    %7 = vector.broadcast %cst_6 : f32 to vector<8x8xf32>
    %8 = arith.mulf %6, %7 : vector<8x8xf32>
    %cst_7 = arith.constant dense<0xFF800000> : vector<8xf32>
    %9 = vector.multi_reduction <maximumf>, %8, %cst_7 [1] : vector<8x8xf32> to vector<8xf32>
    %10 = vector.shape_cast %9 : vector<8xf32> to vector<8x1xf32>
    %11 = vector.broadcast %10 : vector<8x1xf32> to vector<8x8xf32>
    %12 = arith.subf %8, %11 : vector<8x8xf32>
    %13 = math.exp %12 : vector<8x8xf32>
    %cst_8 = arith.constant dense<0.000000e+00> : vector<8xf32>
    %14 = vector.multi_reduction <add>, %13, %cst_8 [1] : vector<8x8xf32> to vector<8xf32>
    %15 = vector.shape_cast %14 : vector<8xf32> to vector<8x1xf32>
    %16 = tpu.reciprocal %15 {approx = true} : vector<8x1xf32> -> vector<8x1xf32>
    %17 = vector.broadcast %16 : vector<8x1xf32> to vector<8x8xf32>
    %18 = arith.mulf %13, %17 : vector<8x8xf32>
    %19 = arith.truncf %18 : vector<8x8xf32> to vector<8x8xbf16>
    %cst_9 = arith.constant dense<0.000000e+00> : vector<8x8xf32>
    %20 = tpu.matmul %19, %5, %cst_9 {dimension_numbers = #tpu.dot_dimension_numbers<[1], [0], [0], [1], [0, 0, 1, 1], [], []>} : vector<8x8xbf16>, vector<8x8xbf16>, vector<8x8xf32> -> vector<8x8xf32>
    %c0_10 = arith.constant 0 : index
    %c0_11 = arith.constant 0 : index
    %c8 = arith.constant 8 : index
    %21 = vector.load %arg1[%c0_10, %c0_11, %c8] : memref<1x8x96xbf16, #tpu.memory_space<vmem>>, vector<1x8x8xbf16>
    %22 = vector.shape_cast %21 : vector<1x8x8xbf16> to vector<8x8xbf16>
    %c0_12 = arith.constant 0 : index
    %c0_13 = arith.constant 0 : index
    %c40 = arith.constant 40 : index
    %23 = vector.load %arg1[%c0_12, %c0_13, %c40] : memref<1x8x96xbf16, #tpu.memory_space<vmem>>, vector<1x8x8xbf16>
    %24 = vector.shape_cast %23 : vector<1x8x8xbf16> to vector<8x8xbf16>
    %c0_14 = arith.constant 0 : index
    %c0_15 = arith.constant 0 : index
    %c72 = arith.constant 72 : index
    %25 = vector.load %arg1[%c0_14, %c0_15, %c72] : memref<1x8x96xbf16, #tpu.memory_space<vmem>>, vector<1x8x8xbf16>
    %26 = vector.shape_cast %25 : vector<1x8x8xbf16> to vector<8x8xbf16>
    %cst_16 = arith.constant dense<0.000000e+00> : vector<8x8xf32>
    %27 = tpu.matmul %22, %24, %cst_16 {dimension_numbers = #tpu.dot_dimension_numbers<[1], [1], [0], [0], [0, 0, 1, 0], [], []>} : vector<8x8xbf16>, vector<8x8xbf16>, vector<8x8xf32> -> vector<8x8xf32>
    %cst_17 = arith.constant 0.353553385 : f32
    %28 = vector.broadcast %cst_17 : f32 to vector<8x8xf32>
    %29 = arith.mulf %27, %28 : vector<8x8xf32>
    %cst_18 = arith.constant dense<0xFF800000> : vector<8xf32>
    %30 = vector.multi_reduction <maximumf>, %29, %cst_18 [1] : vector<8x8xf32> to vector<8xf32>
    %31 = vector.shape_cast %30 : vector<8xf32> to vector<8x1xf32>
    %32 = vector.broadcast %31 : vector<8x1xf32> to vector<8x8xf32>
    %33 = arith.subf %29, %32 : vector<8x8xf32>
    %34 = math.exp %33 : vector<8x8xf32>
    %cst_19 = arith.constant dense<0.000000e+00> : vector<8xf32>
    %35 = vector.multi_reduction <add>, %34, %cst_19 [1] : vector<8x8xf32> to vector<8xf32>
    %36 = vector.shape_cast %35 : vector<8xf32> to vector<8x1xf32>
    %37 = tpu.reciprocal %36 {approx = true} : vector<8x1xf32> -> vector<8x1xf32>
    %38 = vector.broadcast %37 : vector<8x1xf32> to vector<8x8xf32>
    %39 = arith.mulf %34, %38 : vector<8x8xf32>
    %40 = arith.truncf %39 : vector<8x8xf32> to vector<8x8xbf16>
    %cst_20 = arith.constant dense<0.000000e+00> : vector<8x8xf32>
    %41 = tpu.matmul %40, %26, %cst_20 {dimension_numbers = #tpu.dot_dimension_numbers<[1], [0], [0], [1], [0, 0, 1, 1], [], []>} : vector<8x8xbf16>, vector<8x8xbf16>, vector<8x8xf32> -> vector<8x8xf32>
    %c0_21 = arith.constant 0 : index
    %c0_22 = arith.constant 0 : index
    %c16 = arith.constant 16 : index
    %42 = vector.load %arg1[%c0_21, %c0_22, %c16] : memref<1x8x96xbf16, #tpu.memory_space<vmem>>, vector<1x8x8xbf16>
    %43 = vector.shape_cast %42 : vector<1x8x8xbf16> to vector<8x8xbf16>
    %c0_23 = arith.constant 0 : index
    %c0_24 = arith.constant 0 : index
    %c48 = arith.constant 48 : index
    %44 = vector.load %arg1[%c0_23, %c0_24, %c48] : memref<1x8x96xbf16, #tpu.memory_space<vmem>>, vector<1x8x8xbf16>
    %45 = vector.shape_cast %44 : vector<1x8x8xbf16> to vector<8x8xbf16>
    %c0_25 = arith.constant 0 : index
    %c0_26 = arith.constant 0 : index
    %c80 = arith.constant 80 : index
    %46 = vector.load %arg1[%c0_25, %c0_26, %c80] : memref<1x8x96xbf16, #tpu.memory_space<vmem>>, vector<1x8x8xbf16>
    %47 = vector.shape_cast %46 : vector<1x8x8xbf16> to vector<8x8xbf16>
    %cst_27 = arith.constant dense<0.000000e+00> : vector<8x8xf32>
    %48 = tpu.matmul %43, %45, %cst_27 {dimension_numbers = #tpu.dot_dimension_numbers<[1], [1], [0], [0], [0, 0, 1, 0], [], []>} : vector<8x8xbf16>, vector<8x8xbf16>, vector<8x8xf32> -> vector<8x8xf32>
    %cst_28 = arith.constant 0.353553385 : f32
    %49 = vector.broadcast %cst_28 : f32 to vector<8x8xf32>
    %50 = arith.mulf %48, %49 : vector<8x8xf32>
    %cst_29 = arith.constant dense<0xFF800000> : vector<8xf32>
    %51 = vector.multi_reduction <maximumf>, %50, %cst_29 [1] : vector<8x8xf32> to vector<8xf32>
    %52 = vector.shape_cast %51 : vector<8xf32> to vector<8x1xf32>
    %53 = vector.broadcast %52 : vector<8x1xf32> to vector<8x8xf32>
    %54 = arith.subf %50, %53 : vector<8x8xf32>
    %55 = math.exp %54 : vector<8x8xf32>
    %cst_30 = arith.constant dense<0.000000e+00> : vector<8xf32>
    %56 = vector.multi_reduction <add>, %55, %cst_30 [1] : vector<8x8xf32> to vector<8xf32>
    %57 = vector.shape_cast %56 : vector<8xf32> to vector<8x1xf32>
    %58 = tpu.reciprocal %57 {approx = true} : vector<8x1xf32> -> vector<8x1xf32>
    %59 = vector.broadcast %58 : vector<8x1xf32> to vector<8x8xf32>
    %60 = arith.mulf %55, %59 : vector<8x8xf32>
    %61 = arith.truncf %60 : vector<8x8xf32> to vector<8x8xbf16>
    %cst_31 = arith.constant dense<0.000000e+00> : vector<8x8xf32>
    %62 = tpu.matmul %61, %47, %cst_31 {dimension_numbers = #tpu.dot_dimension_numbers<[1], [0], [0], [1], [0, 0, 1, 1], [], []>} : vector<8x8xbf16>, vector<8x8xbf16>, vector<8x8xf32> -> vector<8x8xf32>
    %c0_32 = arith.constant 0 : index
    %c0_33 = arith.constant 0 : index
    %c24 = arith.constant 24 : index
    %63 = vector.load %arg1[%c0_32, %c0_33, %c24] : memref<1x8x96xbf16, #tpu.memory_space<vmem>>, vector<1x8x8xbf16>
    %64 = vector.shape_cast %63 : vector<1x8x8xbf16> to vector<8x8xbf16>
    %c0_34 = arith.constant 0 : index
    %c0_35 = arith.constant 0 : index
    %c56 = arith.constant 56 : index
    %65 = vector.load %arg1[%c0_34, %c0_35, %c56] : memref<1x8x96xbf16, #tpu.memory_space<vmem>>, vector<1x8x8xbf16>
    %66 = vector.shape_cast %65 : vector<1x8x8xbf16> to vector<8x8xbf16>
    %c0_36 = arith.constant 0 : index
    %c0_37 = arith.constant 0 : index
    %c88 = arith.constant 88 : index
    %67 = vector.load %arg1[%c0_36, %c0_37, %c88] : memref<1x8x96xbf16, #tpu.memory_space<vmem>>, vector<1x8x8xbf16>
    %68 = vector.shape_cast %67 : vector<1x8x8xbf16> to vector<8x8xbf16>
    %cst_38 = arith.constant dense<0.000000e+00> : vector<8x8xf32>
    %69 = tpu.matmul %64, %66, %cst_38 {dimension_numbers = #tpu.dot_dimension_numbers<[1], [1], [0], [0], [0, 0, 1, 0], [], []>} : vector<8x8xbf16>, vector<8x8xbf16>, vector<8x8xf32> -> vector<8x8xf32>
    %cst_39 = arith.constant 0.353553385 : f32
    %70 = vector.broadcast %cst_39 : f32 to vector<8x8xf32>
    %71 = arith.mulf %69, %70 : vector<8x8xf32>
    %cst_40 = arith.constant dense<0xFF800000> : vector<8xf32>
    %72 = vector.multi_reduction <maximumf>, %71, %cst_40 [1] : vector<8x8xf32> to vector<8xf32>
    %73 = vector.shape_cast %72 : vector<8xf32> to vector<8x1xf32>
    %74 = vector.broadcast %73 : vector<8x1xf32> to vector<8x8xf32>
    %75 = arith.subf %71, %74 : vector<8x8xf32>
    %76 = math.exp %75 : vector<8x8xf32>
    %cst_41 = arith.constant dense<0.000000e+00> : vector<8xf32>
    %77 = vector.multi_reduction <add>, %76, %cst_41 [1] : vector<8x8xf32> to vector<8xf32>
    %78 = vector.shape_cast %77 : vector<8xf32> to vector<8x1xf32>
    %79 = tpu.reciprocal %78 {approx = true} : vector<8x1xf32> -> vector<8x1xf32>
    %80 = vector.broadcast %79 : vector<8x1xf32> to vector<8x8xf32>
    %81 = arith.mulf %76, %80 : vector<8x8xf32>
    %82 = arith.truncf %81 : vector<8x8xf32> to vector<8x8xbf16>
    %cst_42 = arith.constant dense<0.000000e+00> : vector<8x8xf32>
    %83 = tpu.matmul %82, %68, %cst_42 {dimension_numbers = #tpu.dot_dimension_numbers<[1], [0], [0], [1], [0, 0, 1, 1], [], []>} : vector<8x8xbf16>, vector<8x8xbf16>, vector<8x8xf32> -> vector<8x8xf32>
    %84 = tpu.concatenate %20, %41, %62, %83 in 1 : vector<8x8xf32>, vector<8x8xf32>, vector<8x8xf32>, vector<8x8xf32> -> vector<8x32xf32>
    %85 = arith.truncf %84 : vector<8x32xf32> to vector<8x32xbf16>
    %c0_43 = arith.constant 0 : index
    %c0_44 = arith.constant 0 : index
    %c0_45 = arith.constant 0 : index
    %86 = vector.load %arg2[%c0_43, %c0_44, %c0_45] : memref<1x8x32xbf16, #tpu.memory_space<vmem>>, vector<1x8x32xbf16>
    %87 = vector.shape_cast %86 : vector<1x8x32xbf16> to vector<8x32xbf16>
    %88 = vector.shape_cast %85 : vector<8x32xbf16> to vector<1x8x32xbf16>
    tpu.vector_store %arg2[%c0_43, %c0_44, %c0_45], %88 {strides = array<i32>} : memref<1x8x32xbf16, #tpu.memory_space<vmem>>, vector<1x8x32xbf16>,
    return
  }
  func.func @transform_0(%arg0: i32) -> (i32, i32, i32) {
    %c0_i32 = arith.constant 0 : i32
    %c0_i32_0 = arith.constant 0 : i32
    %c0_i32_1 = arith.constant 0 : i32
    return %arg0, %c0_i32, %c0_i32_0 : i32, i32, i32
  }
  func.func @transform_1(%arg0: i32) -> (i32, i32, i32) {
    %c0_i32 = arith.constant 0 : i32
    %c0_i32_0 = arith.constant 0 : i32
    %c0_i32_1 = arith.constant 0 : i32
    return %arg0, %c0_i32, %c0_i32_0 : i32, i32, i32
  }
}

module attributes {stable_mosaic.version = 11 : i64} {
  func.func @_matmul_kernel(%arg0: i32, %arg1: i32, %arg2: i32, %arg3: memref<16x32xbf16, #tpu.memory_space<vmem>>, %arg4: memref<32x32xbf16, #tpu.memory_space<vmem>>, %arg5: memref<1x32xf32, #tpu.memory_space<vmem>>, %arg6: memref<16x32xbf16, #tpu.memory_space<vmem>>, %arg7: memref<16x32xf32, #tpu.memory_space<vmem>>) attributes {dimension_semantics = [#tpu.dimension_semantics<parallel>, #tpu.dimension_semantics<parallel>, #tpu.dimension_semantics<arbitrary>], iteration_bounds = array<i64: 1, 1, 1>, scalar_prefetch = 0 : i64, scratch_operands = 1 : i64, tpu.core_type = #tpu.core_type<tc>, window_params = [{transform_indices = @transform_0, window_bounds = array<i64: 16, 32>}, {transform_indices = @transform_1, window_bounds = array<i64: 32, 32>}, {transform_indices = @transform_2, window_bounds = array<i64: 1, 32>}, {transform_indices = @transform_3, window_bounds = array<i64: 16, 32>}]} {
    %c0_i32 = arith.constant 0 : i32
    %0 = arith.cmpi eq, %arg2, %c0_i32 : i32
    %1 = arith.extui %0 : i1 to i32
    %c0_i32_0 = arith.constant 0 : i32
    %2 = arith.cmpi ne, %1, %c0_i32_0 : i32
    scf.if %2 {
      %cst_10 = arith.constant 0.000000e+00 : f32
      %12 = vector.broadcast %cst_10 : f32 to vector<16x32xf32>
      %c0_11 = arith.constant 0 : index
      %c0_12 = arith.constant 0 : index
      %13 = vector.load %arg7[%c0_11, %c0_12] : memref<16x32xf32, #tpu.memory_space<vmem>>, vector<16x32xf32>
      tpu.vector_store %arg7[%c0_11, %c0_12], %12 {strides = array<i32>} : memref<16x32xf32, #tpu.memory_space<vmem>>, vector<16x32xf32>,
    } else {
    }
    %c0 = arith.constant 0 : index
    %c0_1 = arith.constant 0 : index
    %3 = vector.load %arg7[%c0, %c0_1] : memref<16x32xf32, #tpu.memory_space<vmem>>, vector<16x32xf32>
    %c0_2 = arith.constant 0 : index
    %c0_3 = arith.constant 0 : index
    %4 = vector.load %arg3[%c0_2, %c0_3] : memref<16x32xbf16, #tpu.memory_space<vmem>>, vector<16x32xbf16>
    %c0_4 = arith.constant 0 : index
    %c0_5 = arith.constant 0 : index
    %5 = vector.load %arg4[%c0_4, %c0_5] : memref<32x32xbf16, #tpu.memory_space<vmem>>, vector<32x32xbf16>
    %cst = arith.constant dense<0.000000e+00> : vector<16x32xf32>
    %6 = tpu.matmul %4, %5, %cst {dimension_numbers = #tpu.dot_dimension_numbers<[1], [0], [0], [1], [0, 0, 1, 1], [], []>} : vector<16x32xbf16>, vector<32x32xbf16>, vector<16x32xf32> -> vector<16x32xf32>
    %7 = arith.addf %3, %6 : vector<16x32xf32>
    %c0_6 = arith.constant 0 : index
    %c0_7 = arith.constant 0 : index
    %8 = vector.load %arg7[%c0_6, %c0_7] : memref<16x32xf32, #tpu.memory_space<vmem>>, vector<16x32xf32>
    tpu.vector_store %arg7[%c0_6, %c0_7], %7 {strides = array<i32>} : memref<16x32xf32, #tpu.memory_space<vmem>>, vector<16x32xf32>,
    %c0_i32_8 = arith.constant 0 : i32
    %9 = arith.cmpi eq, %arg2, %c0_i32_8 : i32
    %10 = arith.extui %9 : i1 to i32
    %c0_i32_9 = arith.constant 0 : i32
    %11 = arith.cmpi ne, %10, %c0_i32_9 : i32
    scf.if %11 {
      %c0_10 = arith.constant 0 : index
      %c0_11 = arith.constant 0 : index
      %12 = vector.load %arg7[%c0_10, %c0_11] : memref<16x32xf32, #tpu.memory_space<vmem>>, vector<16x32xf32>
      %c0_12 = arith.constant 0 : index
      %c0_13 = arith.constant 0 : index
      %13 = vector.load %arg5[%c0_12, %c0_13] : memref<1x32xf32, #tpu.memory_space<vmem>>, vector<1x32xf32>
      %14 = vector.broadcast %13 : vector<1x32xf32> to vector<16x32xf32>
      %15 = arith.addf %12, %14 : vector<16x32xf32>
      %16 = arith.truncf %15 : vector<16x32xf32> to vector<16x32xbf16>
      %c0_14 = arith.constant 0 : index
      %c0_15 = arith.constant 0 : index
      %17 = vector.load %arg6[%c0_14, %c0_15] : memref<16x32xbf16, #tpu.memory_space<vmem>>, vector<16x32xbf16>
      tpu.vector_store %arg6[%c0_14, %c0_15], %16 {strides = array<i32>} : memref<16x32xbf16, #tpu.memory_space<vmem>>, vector<16x32xbf16>,
    } else {
    }
    return
  }
  func.func @transform_0(%arg0: i32, %arg1: i32, %arg2: i32) -> (i32, i32) {
    %c0_i32 = arith.constant 0 : i32
    return %arg0, %arg2 : i32, i32
  }
  func.func @transform_1(%arg0: i32, %arg1: i32, %arg2: i32) -> (i32, i32) {
    %c0_i32 = arith.constant 0 : i32
    return %arg2, %arg1 : i32, i32
  }
  func.func @transform_2(%arg0: i32, %arg1: i32, %arg2: i32) -> (i32, i32) {
    %c0_i32 = arith.constant 0 : i32
    %c0_i32_0 = arith.constant 0 : i32
    return %c0_i32, %arg1 : i32, i32
  }
  func.func @transform_3(%arg0: i32, %arg1: i32, %arg2: i32) -> (i32, i32) {
    %c0_i32 = arith.constant 0 : i32
    return %arg0, %arg1 : i32, i32
  }
}

module attributes {stable_mosaic.version = 11 : i64} {
  func.func @_add_layernorm_kernel(%arg0: i32, %arg1: memref<16x32xbf16, #tpu.memory_space<vmem>>, %arg2: memref<16x32xbf16, #tpu.memory_space<vmem>>, %arg3: memref<1x32xf32, #tpu.memory_space<vmem>>, %arg4: memref<1x32xf32, #tpu.memory_space<vmem>>, %arg5: memref<16x32xbf16, #tpu.memory_space<vmem>>) attributes {dimension_semantics = [#tpu.dimension_semantics<parallel>], iteration_bounds = array<i64: 1>, scalar_prefetch = 0 : i64, scratch_operands = 0 : i64, tpu.core_type = #tpu.core_type<tc>, window_params = [{transform_indices = @transform_0, window_bounds = array<i64: 16, 32>}, {transform_indices = @transform_1, window_bounds = array<i64: 16, 32>}, {pipeline_mode = #tpu.pipeline_mode<synchronous>, transform_indices = @transform_2, window_bounds = array<i64: 1, 32>}, {pipeline_mode = #tpu.pipeline_mode<synchronous>, transform_indices = @transform_3, window_bounds = array<i64: 1, 32>}, {transform_indices = @transform_4, window_bounds = array<i64: 16, 32>}]} {
    %c0 = arith.constant 0 : index
    %c0_0 = arith.constant 0 : index
    %0 = vector.load %arg1[%c0, %c0_0] : memref<16x32xbf16, #tpu.memory_space<vmem>>, vector<16x32xbf16>
    %1 = arith.extf %0 : vector<16x32xbf16> to vector<16x32xf32>
    %c0_1 = arith.constant 0 : index
    %c0_2 = arith.constant 0 : index
    %2 = vector.load %arg2[%c0_1, %c0_2] : memref<16x32xbf16, #tpu.memory_space<vmem>>, vector<16x32xbf16>
    %3 = arith.extf %2 : vector<16x32xbf16> to vector<16x32xf32>
    %4 = arith.addf %1, %3 : vector<16x32xf32>
    %cst = arith.constant dense<0.000000e+00> : vector<16xf32>
    %5 = vector.multi_reduction <add>, %4, %cst [1] : vector<16x32xf32> to vector<16xf32>
    %6 = vector.shape_cast %5 : vector<16xf32> to vector<16x1xf32>
    %cst_3 = arith.constant 3.200000e+01 : f32
    %7 = vector.broadcast %cst_3 : f32 to vector<16x1xf32>
    %8 = arith.divf %6, %7 : vector<16x1xf32>
    %9 = vector.broadcast %8 : vector<16x1xf32> to vector<16x32xf32>
    %10 = arith.subf %4, %9 : vector<16x32xf32>
    %11 = arith.mulf %10, %10 : vector<16x32xf32>
    %cst_4 = arith.constant dense<0.000000e+00> : vector<16xf32>
    %12 = vector.multi_reduction <add>, %11, %cst_4 [1] : vector<16x32xf32> to vector<16xf32>
    %13 = vector.shape_cast %12 : vector<16xf32> to vector<16x1xf32>
    %cst_5 = arith.constant 3.200000e+01 : f32
    %14 = vector.broadcast %cst_5 : f32 to vector<16x1xf32>
    %15 = arith.divf %13, %14 : vector<16x1xf32>
    %16 = vector.broadcast %8 : vector<16x1xf32> to vector<16x32xf32>
    %17 = arith.subf %4, %16 : vector<16x32xf32>
    %cst_6 = arith.constant 9.99999974E-6 : f32
    %18 = vector.broadcast %cst_6 : f32 to vector<16x1xf32>
    %19 = arith.addf %15, %18 : vector<16x1xf32>
    %20 = math.rsqrt %19 : vector<16x1xf32>
    %21 = vector.broadcast %20 : vector<16x1xf32> to vector<16x32xf32>
    %22 = arith.mulf %17, %21 : vector<16x32xf32>
    %c0_7 = arith.constant 0 : index
    %c0_8 = arith.constant 0 : index
    %23 = vector.load %arg3[%c0_7, %c0_8] : memref<1x32xf32, #tpu.memory_space<vmem>>, vector<1x32xf32>
    %24 = vector.broadcast %23 : vector<1x32xf32> to vector<16x32xf32>
    %25 = arith.mulf %22, %24 : vector<16x32xf32>
    %c0_9 = arith.constant 0 : index
    %c0_10 = arith.constant 0 : index
    %26 = vector.load %arg4[%c0_9, %c0_10] : memref<1x32xf32, #tpu.memory_space<vmem>>, vector<1x32xf32>
    %27 = vector.broadcast %26 : vector<1x32xf32> to vector<16x32xf32>
    %28 = arith.addf %25, %27 : vector<16x32xf32>
    %29 = arith.truncf %28 : vector<16x32xf32> to vector<16x32xbf16>
    %c0_11 = arith.constant 0 : index
    %c0_12 = arith.constant 0 : index
    %30 = vector.load %arg5[%c0_11, %c0_12] : memref<16x32xbf16, #tpu.memory_space<vmem>>, vector<16x32xbf16>
    tpu.vector_store %arg5[%c0_11, %c0_12], %29 {strides = array<i32>} : memref<16x32xbf16, #tpu.memory_space<vmem>>, vector<16x32xbf16>,
    return
  }
  func.func @transform_0(%arg0: i32) -> (i32, i32) {
    %c0_i32 = arith.constant 0 : i32
    %c0_i32_0 = arith.constant 0 : i32
    return %arg0, %c0_i32 : i32, i32
  }
  func.func @transform_1(%arg0: i32) -> (i32, i32) {
    %c0_i32 = arith.constant 0 : i32
    %c0_i32_0 = arith.constant 0 : i32
    return %arg0, %c0_i32 : i32, i32
  }
  func.func @transform_2(%arg0: i32) -> (i32, i32) {
    %c0_i32 = arith.constant 0 : i32
    %c0_i32_0 = arith.constant 0 : i32
    %c0_i32_1 = arith.constant 0 : i32
    return %c0_i32, %c0_i32_0 : i32, i32
  }
  func.func @transform_3(%arg0: i32) -> (i32, i32) {
    %c0_i32 = arith.constant 0 : i32
    %c0_i32_0 = arith.constant 0 : i32
    %c0_i32_1 = arith.constant 0 : i32
    return %c0_i32, %c0_i32_0 : i32, i32
  }
  func.func @transform_4(%arg0: i32) -> (i32, i32) {
    %c0_i32 = arith.constant 0 : i32
    %c0_i32_0 = arith.constant 0 : i32
    return %arg0, %c0_i32 : i32, i32
  }
}

module attributes {stable_mosaic.version = 11 : i64} {
  func.func @_matmul_kernel(%arg0: i32, %arg1: i32, %arg2: i32, %arg3: memref<16x64xbf16, #tpu.memory_space<vmem>>, %arg4: memref<64x32xbf16, #tpu.memory_space<vmem>>, %arg5: memref<1x32xf32, #tpu.memory_space<vmem>>, %arg6: memref<16x32xbf16, #tpu.memory_space<vmem>>, %arg7: memref<16x32xf32, #tpu.memory_space<vmem>>) attributes {dimension_semantics = [#tpu.dimension_semantics<parallel>, #tpu.dimension_semantics<parallel>, #tpu.dimension_semantics<arbitrary>], iteration_bounds = array<i64: 1, 1, 1>, scalar_prefetch = 0 : i64, scratch_operands = 1 : i64, tpu.core_type = #tpu.core_type<tc>, window_params = [{transform_indices = @transform_0, window_bounds = array<i64: 16, 64>}, {transform_indices = @transform_1, window_bounds = array<i64: 64, 32>}, {transform_indices = @transform_2, window_bounds = array<i64: 1, 32>}, {transform_indices = @transform_3, window_bounds = array<i64: 16, 32>}]} {
    %c0_i32 = arith.constant 0 : i32
    %0 = arith.cmpi eq, %arg2, %c0_i32 : i32
    %1 = arith.extui %0 : i1 to i32
    %c0_i32_0 = arith.constant 0 : i32
    %2 = arith.cmpi ne, %1, %c0_i32_0 : i32
    scf.if %2 {
      %cst_10 = arith.constant 0.000000e+00 : f32
      %12 = vector.broadcast %cst_10 : f32 to vector<16x32xf32>
      %c0_11 = arith.constant 0 : index
      %c0_12 = arith.constant 0 : index
      %13 = vector.load %arg7[%c0_11, %c0_12] : memref<16x32xf32, #tpu.memory_space<vmem>>, vector<16x32xf32>
      tpu.vector_store %arg7[%c0_11, %c0_12], %12 {strides = array<i32>} : memref<16x32xf32, #tpu.memory_space<vmem>>, vector<16x32xf32>,
    } else {
    }
    %c0 = arith.constant 0 : index
    %c0_1 = arith.constant 0 : index
    %3 = vector.load %arg7[%c0, %c0_1] : memref<16x32xf32, #tpu.memory_space<vmem>>, vector<16x32xf32>
    %c0_2 = arith.constant 0 : index
    %c0_3 = arith.constant 0 : index
    %4 = vector.load %arg3[%c0_2, %c0_3] : memref<16x64xbf16, #tpu.memory_space<vmem>>, vector<16x64xbf16>
    %c0_4 = arith.constant 0 : index
    %c0_5 = arith.constant 0 : index
    %5 = vector.load %arg4[%c0_4, %c0_5] : memref<64x32xbf16, #tpu.memory_space<vmem>>, vector<64x32xbf16>
    %cst = arith.constant dense<0.000000e+00> : vector<16x32xf32>
    %6 = tpu.matmul %4, %5, %cst {dimension_numbers = #tpu.dot_dimension_numbers<[1], [0], [0], [1], [0, 0, 1, 1], [], []>} : vector<16x64xbf16>, vector<64x32xbf16>, vector<16x32xf32> -> vector<16x32xf32>
    %7 = arith.addf %3, %6 : vector<16x32xf32>
    %c0_6 = arith.constant 0 : index
    %c0_7 = arith.constant 0 : index
    %8 = vector.load %arg7[%c0_6, %c0_7] : memref<16x32xf32, #tpu.memory_space<vmem>>, vector<16x32xf32>
    tpu.vector_store %arg7[%c0_6, %c0_7], %7 {strides = array<i32>} : memref<16x32xf32, #tpu.memory_space<vmem>>, vector<16x32xf32>,
    %c0_i32_8 = arith.constant 0 : i32
    %9 = arith.cmpi eq, %arg2, %c0_i32_8 : i32
    %10 = arith.extui %9 : i1 to i32
    %c0_i32_9 = arith.constant 0 : i32
    %11 = arith.cmpi ne, %10, %c0_i32_9 : i32
    scf.if %11 {
      %c0_10 = arith.constant 0 : index
      %c0_11 = arith.constant 0 : index
      %12 = vector.load %arg7[%c0_10, %c0_11] : memref<16x32xf32, #tpu.memory_space<vmem>>, vector<16x32xf32>
      %c0_12 = arith.constant 0 : index
      %c0_13 = arith.constant 0 : index
      %13 = vector.load %arg5[%c0_12, %c0_13] : memref<1x32xf32, #tpu.memory_space<vmem>>, vector<1x32xf32>
      %14 = vector.broadcast %13 : vector<1x32xf32> to vector<16x32xf32>
      %15 = arith.addf %12, %14 : vector<16x32xf32>
      %16 = arith.truncf %15 : vector<16x32xf32> to vector<16x32xbf16>
      %c0_14 = arith.constant 0 : index
      %c0_15 = arith.constant 0 : index
      %17 = vector.load %arg6[%c0_14, %c0_15] : memref<16x32xbf16, #tpu.memory_space<vmem>>, vector<16x32xbf16>
      tpu.vector_store %arg6[%c0_14, %c0_15], %16 {strides = array<i32>} : memref<16x32xbf16, #tpu.memory_space<vmem>>, vector<16x32xbf16>,
    } else {
    }
    return
  }
  func.func @transform_0(%arg0: i32, %arg1: i32, %arg2: i32) -> (i32, i32) {
    %c0_i32 = arith.constant 0 : i32
    return %arg0, %arg2 : i32, i32
  }
  func.func @transform_1(%arg0: i32, %arg1: i32, %arg2: i32) -> (i32, i32) {
    %c0_i32 = arith.constant 0 : i32
    return %arg2, %arg1 : i32, i32
  }
  func.func @transform_2(%arg0: i32, %arg1: i32, %arg2: i32) -> (i32, i32) {
    %c0_i32 = arith.constant 0 : i32
    %c0_i32_0 = arith.constant 0 : i32
    return %c0_i32, %arg1 : i32, i32
  }
  func.func @transform_3(%arg0: i32, %arg1: i32, %arg2: i32) -> (i32, i32) {
    %c0_i32 = arith.constant 0 : i32
    return %arg0, %arg1 : i32, i32
  }
}

module attributes {stable_mosaic.version = 11 : i64} {
  func.func @_matmul_kernel(%arg0: i32, %arg1: i32, %arg2: i32, %arg3: memref<16x32xbf16, #tpu.memory_space<vmem>>, %arg4: memref<32x64xbf16, #tpu.memory_space<vmem>>, %arg5: memref<1x64xf32, #tpu.memory_space<vmem>>, %arg6: memref<16x64xbf16, #tpu.memory_space<vmem>>, %arg7: memref<16x64xf32, #tpu.memory_space<vmem>>) attributes {dimension_semantics = [#tpu.dimension_semantics<parallel>, #tpu.dimension_semantics<parallel>, #tpu.dimension_semantics<arbitrary>], iteration_bounds = array<i64: 1, 1, 1>, scalar_prefetch = 0 : i64, scratch_operands = 1 : i64, tpu.core_type = #tpu.core_type<tc>, window_params = [{transform_indices = @transform_0, window_bounds = array<i64: 16, 32>}, {transform_indices = @transform_1, window_bounds = array<i64: 32, 64>}, {transform_indices = @transform_2, window_bounds = array<i64: 1, 64>}, {transform_indices = @transform_3, window_bounds = array<i64: 16, 64>}]} {
    %c0_i32 = arith.constant 0 : i32
    %0 = arith.cmpi eq, %arg2, %c0_i32 : i32
    %1 = arith.extui %0 : i1 to i32
    %c0_i32_0 = arith.constant 0 : i32
    %2 = arith.cmpi ne, %1, %c0_i32_0 : i32
    scf.if %2 {
      %cst_10 = arith.constant 0.000000e+00 : f32
      %12 = vector.broadcast %cst_10 : f32 to vector<16x64xf32>
      %c0_11 = arith.constant 0 : index
      %c0_12 = arith.constant 0 : index
      %13 = vector.load %arg7[%c0_11, %c0_12] : memref<16x64xf32, #tpu.memory_space<vmem>>, vector<16x64xf32>
      tpu.vector_store %arg7[%c0_11, %c0_12], %12 {strides = array<i32>} : memref<16x64xf32, #tpu.memory_space<vmem>>, vector<16x64xf32>,
    } else {
    }
    %c0 = arith.constant 0 : index
    %c0_1 = arith.constant 0 : index
    %3 = vector.load %arg7[%c0, %c0_1] : memref<16x64xf32, #tpu.memory_space<vmem>>, vector<16x64xf32>
    %c0_2 = arith.constant 0 : index
    %c0_3 = arith.constant 0 : index
    %4 = vector.load %arg3[%c0_2, %c0_3] : memref<16x32xbf16, #tpu.memory_space<vmem>>, vector<16x32xbf16>
    %c0_4 = arith.constant 0 : index
    %c0_5 = arith.constant 0 : index
    %5 = vector.load %arg4[%c0_4, %c0_5] : memref<32x64xbf16, #tpu.memory_space<vmem>>, vector<32x64xbf16>
    %cst = arith.constant dense<0.000000e+00> : vector<16x64xf32>
    %6 = tpu.matmul %4, %5, %cst {dimension_numbers = #tpu.dot_dimension_numbers<[1], [0], [0], [1], [0, 0, 1, 1], [], []>} : vector<16x32xbf16>, vector<32x64xbf16>, vector<16x64xf32> -> vector<16x64xf32>
    %7 = arith.addf %3, %6 : vector<16x64xf32>
    %c0_6 = arith.constant 0 : index
    %c0_7 = arith.constant 0 : index
    %8 = vector.load %arg7[%c0_6, %c0_7] : memref<16x64xf32, #tpu.memory_space<vmem>>, vector<16x64xf32>
    tpu.vector_store %arg7[%c0_6, %c0_7], %7 {strides = array<i32>} : memref<16x64xf32, #tpu.memory_space<vmem>>, vector<16x64xf32>,
    %c0_i32_8 = arith.constant 0 : i32
    %9 = arith.cmpi eq, %arg2, %c0_i32_8 : i32
    %10 = arith.extui %9 : i1 to i32
    %c0_i32_9 = arith.constant 0 : i32
    %11 = arith.cmpi ne, %10, %c0_i32_9 : i32
    scf.if %11 {
      %c0_10 = arith.constant 0 : index
      %c0_11 = arith.constant 0 : index
      %12 = vector.load %arg7[%c0_10, %c0_11] : memref<16x64xf32, #tpu.memory_space<vmem>>, vector<16x64xf32>
      %c0_12 = arith.constant 0 : index
      %c0_13 = arith.constant 0 : index
      %13 = vector.load %arg5[%c0_12, %c0_13] : memref<1x64xf32, #tpu.memory_space<vmem>>, vector<1x64xf32>
      %14 = vector.broadcast %13 : vector<1x64xf32> to vector<16x64xf32>
      %15 = arith.addf %12, %14 : vector<16x64xf32>
      %cst_14 = arith.constant 5.000000e-01 : f32
      %16 = vector.broadcast %cst_14 : f32 to vector<16x64xf32>
      %17 = arith.mulf %16, %15 : vector<16x64xf32>
      %cst_15 = arith.constant 0.707106769 : f32
      %18 = vector.broadcast %cst_15 : f32 to vector<16x64xf32>
      %19 = arith.mulf %15, %18 : vector<16x64xf32>
      %20 = math.erf %19 : vector<16x64xf32>
      %cst_16 = arith.constant 1.000000e+00 : f32
      %21 = vector.broadcast %cst_16 : f32 to vector<16x64xf32>
      %22 = arith.addf %21, %20 : vector<16x64xf32>
      %23 = arith.mulf %17, %22 : vector<16x64xf32>
      %24 = arith.truncf %23 : vector<16x64xf32> to vector<16x64xbf16>
      %c0_17 = arith.constant 0 : index
      %c0_18 = arith.constant 0 : index
      %25 = vector.load %arg6[%c0_17, %c0_18] : memref<16x64xbf16, #tpu.memory_space<vmem>>, vector<16x64xbf16>
      tpu.vector_store %arg6[%c0_17, %c0_18], %24 {strides = array<i32>} : memref<16x64xbf16, #tpu.memory_space<vmem>>, vector<16x64xbf16>,
    } else {
    }
    return
  }
  func.func @transform_0(%arg0: i32, %arg1: i32, %arg2: i32) -> (i32, i32) {
    %c0_i32 = arith.constant 0 : i32
    return %arg0, %arg2 : i32, i32
  }
  func.func @transform_1(%arg0: i32, %arg1: i32, %arg2: i32) -> (i32, i32) {
    %c0_i32 = arith.constant 0 : i32
    return %arg2, %arg1 : i32, i32
  }
  func.func @transform_2(%arg0: i32, %arg1: i32, %arg2: i32) -> (i32, i32) {
    %c0_i32 = arith.constant 0 : i32
    %c0_i32_0 = arith.constant 0 : i32
    return %c0_i32, %arg1 : i32, i32
  }
  func.func @transform_3(%arg0: i32, %arg1: i32, %arg2: i32) -> (i32, i32) {
    %c0_i32 = arith.constant 0 : i32
    return %arg0, %arg1 : i32, i32
  }
}

module attributes {stable_mosaic.version = 11 : i64} {
  func.func @_matmul_kernel(%arg0: i32, %arg1: i32, %arg2: i32, %arg3: memref<32x32xbf16, #tpu.memory_space<vmem>>, %arg4: memref<32x96xbf16, #tpu.memory_space<vmem>>, %arg5: memref<1x96xf32, #tpu.memory_space<vmem>>, %arg6: memref<32x96xbf16, #tpu.memory_space<vmem>>, %arg7: memref<32x96xf32, #tpu.memory_space<vmem>>) attributes {dimension_semantics = [#tpu.dimension_semantics<parallel>, #tpu.dimension_semantics<parallel>, #tpu.dimension_semantics<arbitrary>], iteration_bounds = array<i64: 1, 1, 1>, scalar_prefetch = 0 : i64, scratch_operands = 1 : i64, tpu.core_type = #tpu.core_type<tc>, window_params = [{transform_indices = @transform_0, window_bounds = array<i64: 32, 32>}, {transform_indices = @transform_1, window_bounds = array<i64: 32, 96>}, {transform_indices = @transform_2, window_bounds = array<i64: 1, 96>}, {transform_indices = @transform_3, window_bounds = array<i64: 32, 96>}]} {
    %c0_i32 = arith.constant 0 : i32
    %0 = arith.cmpi eq, %arg2, %c0_i32 : i32
    %1 = arith.extui %0 : i1 to i32
    %c0_i32_0 = arith.constant 0 : i32
    %2 = arith.cmpi ne, %1, %c0_i32_0 : i32
    scf.if %2 {
      %cst_10 = arith.constant 0.000000e+00 : f32
      %12 = vector.broadcast %cst_10 : f32 to vector<32x96xf32>
      %c0_11 = arith.constant 0 : index
      %c0_12 = arith.constant 0 : index
      %13 = vector.load %arg7[%c0_11, %c0_12] : memref<32x96xf32, #tpu.memory_space<vmem>>, vector<32x96xf32>
      tpu.vector_store %arg7[%c0_11, %c0_12], %12 {strides = array<i32>} : memref<32x96xf32, #tpu.memory_space<vmem>>, vector<32x96xf32>,
    } else {
    }
    %c0 = arith.constant 0 : index
    %c0_1 = arith.constant 0 : index
    %3 = vector.load %arg7[%c0, %c0_1] : memref<32x96xf32, #tpu.memory_space<vmem>>, vector<32x96xf32>
    %c0_2 = arith.constant 0 : index
    %c0_3 = arith.constant 0 : index
    %4 = vector.load %arg3[%c0_2, %c0_3] : memref<32x32xbf16, #tpu.memory_space<vmem>>, vector<32x32xbf16>
    %c0_4 = arith.constant 0 : index
    %c0_5 = arith.constant 0 : index
    %5 = vector.load %arg4[%c0_4, %c0_5] : memref<32x96xbf16, #tpu.memory_space<vmem>>, vector<32x96xbf16>
    %cst = arith.constant dense<0.000000e+00> : vector<32x96xf32>
    %6 = tpu.matmul %4, %5, %cst {dimension_numbers = #tpu.dot_dimension_numbers<[1], [0], [0], [1], [0, 0, 1, 1], [], []>} : vector<32x32xbf16>, vector<32x96xbf16>, vector<32x96xf32> -> vector<32x96xf32>
    %7 = arith.addf %3, %6 : vector<32x96xf32>
    %c0_6 = arith.constant 0 : index
    %c0_7 = arith.constant 0 : index
    %8 = vector.load %arg7[%c0_6, %c0_7] : memref<32x96xf32, #tpu.memory_space<vmem>>, vector<32x96xf32>
    tpu.vector_store %arg7[%c0_6, %c0_7], %7 {strides = array<i32>} : memref<32x96xf32, #tpu.memory_space<vmem>>, vector<32x96xf32>,
    %c0_i32_8 = arith.constant 0 : i32
    %9 = arith.cmpi eq, %arg2, %c0_i32_8 : i32
    %10 = arith.extui %9 : i1 to i32
    %c0_i32_9 = arith.constant 0 : i32
    %11 = arith.cmpi ne, %10, %c0_i32_9 : i32
    scf.if %11 {
      %c0_10 = arith.constant 0 : index
      %c0_11 = arith.constant 0 : index
      %12 = vector.load %arg7[%c0_10, %c0_11] : memref<32x96xf32, #tpu.memory_space<vmem>>, vector<32x96xf32>
      %c0_12 = arith.constant 0 : index
      %c0_13 = arith.constant 0 : index
      %13 = vector.load %arg5[%c0_12, %c0_13] : memref<1x96xf32, #tpu.memory_space<vmem>>, vector<1x96xf32>
      %14 = vector.broadcast %13 : vector<1x96xf32> to vector<32x96xf32>
      %15 = arith.addf %12, %14 : vector<32x96xf32>
      %16 = arith.truncf %15 : vector<32x96xf32> to vector<32x96xbf16>
      %c0_14 = arith.constant 0 : index
      %c0_15 = arith.constant 0 : index
      %17 = vector.load %arg6[%c0_14, %c0_15] : memref<32x96xbf16, #tpu.memory_space<vmem>>, vector<32x96xbf16>
      tpu.vector_store %arg6[%c0_14, %c0_15], %16 {strides = array<i32>} : memref<32x96xbf16, #tpu.memory_space<vmem>>, vector<32x96xbf16>,
    } else {
    }
    return
  }
  func.func @transform_0(%arg0: i32, %arg1: i32, %arg2: i32) -> (i32, i32) {
    %c0_i32 = arith.constant 0 : i32
    return %arg0, %arg2 : i32, i32
  }
  func.func @transform_1(%arg0: i32, %arg1: i32, %arg2: i32) -> (i32, i32) {
    %c0_i32 = arith.constant 0 : i32
    return %arg2, %arg1 : i32, i32
  }
  func.func @transform_2(%arg0: i32, %arg1: i32, %arg2: i32) -> (i32, i32) {
    %c0_i32 = arith.constant 0 : i32
    %c0_i32_0 = arith.constant 0 : i32
    return %c0_i32, %arg1 : i32, i32
  }
  func.func @transform_3(%arg0: i32, %arg1: i32, %arg2: i32) -> (i32, i32) {
    %c0_i32 = arith.constant 0 : i32
    return %arg0, %arg1 : i32, i32
  }
}

module attributes {stable_mosaic.version = 11 : i64} {
  func.func @_matmul_kernel(%arg0: i32, %arg1: i32, %arg2: i32, %arg3: memref<32x32xbf16, #tpu.memory_space<vmem>>, %arg4: memref<32x32xbf16, #tpu.memory_space<vmem>>, %arg5: memref<1x32xf32, #tpu.memory_space<vmem>>, %arg6: memref<32x32xbf16, #tpu.memory_space<vmem>>, %arg7: memref<32x32xf32, #tpu.memory_space<vmem>>) attributes {dimension_semantics = [#tpu.dimension_semantics<parallel>, #tpu.dimension_semantics<parallel>, #tpu.dimension_semantics<arbitrary>], iteration_bounds = array<i64: 1, 1, 1>, scalar_prefetch = 0 : i64, scratch_operands = 1 : i64, tpu.core_type = #tpu.core_type<tc>, window_params = [{transform_indices = @transform_0, window_bounds = array<i64: 32, 32>}, {transform_indices = @transform_1, window_bounds = array<i64: 32, 32>}, {transform_indices = @transform_2, window_bounds = array<i64: 1, 32>}, {transform_indices = @transform_3, window_bounds = array<i64: 32, 32>}]} {
    %c0_i32 = arith.constant 0 : i32
    %0 = arith.cmpi eq, %arg2, %c0_i32 : i32
    %1 = arith.extui %0 : i1 to i32
    %c0_i32_0 = arith.constant 0 : i32
    %2 = arith.cmpi ne, %1, %c0_i32_0 : i32
    scf.if %2 {
      %cst_10 = arith.constant 0.000000e+00 : f32
      %12 = vector.broadcast %cst_10 : f32 to vector<32x32xf32>
      %c0_11 = arith.constant 0 : index
      %c0_12 = arith.constant 0 : index
      %13 = vector.load %arg7[%c0_11, %c0_12] : memref<32x32xf32, #tpu.memory_space<vmem>>, vector<32x32xf32>
      tpu.vector_store %arg7[%c0_11, %c0_12], %12 {strides = array<i32>} : memref<32x32xf32, #tpu.memory_space<vmem>>, vector<32x32xf32>,
    } else {
    }
    %c0 = arith.constant 0 : index
    %c0_1 = arith.constant 0 : index
    %3 = vector.load %arg7[%c0, %c0_1] : memref<32x32xf32, #tpu.memory_space<vmem>>, vector<32x32xf32>
    %c0_2 = arith.constant 0 : index
    %c0_3 = arith.constant 0 : index
    %4 = vector.load %arg3[%c0_2, %c0_3] : memref<32x32xbf16, #tpu.memory_space<vmem>>, vector<32x32xbf16>
    %c0_4 = arith.constant 0 : index
    %c0_5 = arith.constant 0 : index
    %5 = vector.load %arg4[%c0_4, %c0_5] : memref<32x32xbf16, #tpu.memory_space<vmem>>, vector<32x32xbf16>
    %cst = arith.constant dense<0.000000e+00> : vector<32x32xf32>
    %6 = tpu.matmul %4, %5, %cst {dimension_numbers = #tpu.dot_dimension_numbers<[1], [0], [0], [1], [0, 0, 1, 1], [], []>} : vector<32x32xbf16>, vector<32x32xbf16>, vector<32x32xf32> -> vector<32x32xf32>
    %7 = arith.addf %3, %6 : vector<32x32xf32>
    %c0_6 = arith.constant 0 : index
    %c0_7 = arith.constant 0 : index
    %8 = vector.load %arg7[%c0_6, %c0_7] : memref<32x32xf32, #tpu.memory_space<vmem>>, vector<32x32xf32>
    tpu.vector_store %arg7[%c0_6, %c0_7], %7 {strides = array<i32>} : memref<32x32xf32, #tpu.memory_space<vmem>>, vector<32x32xf32>,
    %c0_i32_8 = arith.constant 0 : i32
    %9 = arith.cmpi eq, %arg2, %c0_i32_8 : i32
    %10 = arith.extui %9 : i1 to i32
    %c0_i32_9 = arith.constant 0 : i32
    %11 = arith.cmpi ne, %10, %c0_i32_9 : i32
    scf.if %11 {
      %c0_10 = arith.constant 0 : index
      %c0_11 = arith.constant 0 : index
      %12 = vector.load %arg7[%c0_10, %c0_11] : memref<32x32xf32, #tpu.memory_space<vmem>>, vector<32x32xf32>
      %c0_12 = arith.constant 0 : index
      %c0_13 = arith.constant 0 : index
      %13 = vector.load %arg5[%c0_12, %c0_13] : memref<1x32xf32, #tpu.memory_space<vmem>>, vector<1x32xf32>
      %14 = vector.broadcast %13 : vector<1x32xf32> to vector<32x32xf32>
      %15 = arith.addf %12, %14 : vector<32x32xf32>
      %16 = arith.truncf %15 : vector<32x32xf32> to vector<32x32xbf16>
      %c0_14 = arith.constant 0 : index
      %c0_15 = arith.constant 0 : index
      %17 = vector.load %arg6[%c0_14, %c0_15] : memref<32x32xbf16, #tpu.memory_space<vmem>>, vector<32x32xbf16>
      tpu.vector_store %arg6[%c0_14, %c0_15], %16 {strides = array<i32>} : memref<32x32xbf16, #tpu.memory_space<vmem>>, vector<32x32xbf16>,
    } else {
    }
    return
  }
  func.func @transform_0(%arg0: i32, %arg1: i32, %arg2: i32) -> (i32, i32) {
    %c0_i32 = arith.constant 0 : i32
    return %arg0, %arg2 : i32, i32
  }
  func.func @transform_1(%arg0: i32, %arg1: i32, %arg2: i32) -> (i32, i32) {
    %c0_i32 = arith.constant 0 : i32
    return %arg2, %arg1 : i32, i32
  }
  func.func @transform_2(%arg0: i32, %arg1: i32, %arg2: i32) -> (i32, i32) {
    %c0_i32 = arith.constant 0 : i32
    %c0_i32_0 = arith.constant 0 : i32
    return %c0_i32, %arg1 : i32, i32
  }
  func.func @transform_3(%arg0: i32, %arg1: i32, %arg2: i32) -> (i32, i32) {
    %c0_i32 = arith.constant 0 : i32
    return %arg0, %arg1 : i32, i32
  }
}

module attributes {stable_mosaic.version = 11 : i64} {
  func.func @_attn_kernel(%arg0: i32, %arg1: memref<1x16x96xbf16, #tpu.memory_space<vmem>>, %arg2: memref<1x16x32xbf16, #tpu.memory_space<vmem>>) attributes {dimension_semantics = [#tpu.dimension_semantics<parallel>], iteration_bounds = array<i64: 2>, scalar_prefetch = 0 : i64, scratch_operands = 0 : i64, tpu.core_type = #tpu.core_type<tc>, window_params = [{transform_indices = @transform_0, window_bounds = array<i64: 1, 16, 96>}, {transform_indices = @transform_1, window_bounds = array<i64: 1, 16, 32>}]} {
    %c0 = arith.constant 0 : index
    %c0_0 = arith.constant 0 : index
    %c0_1 = arith.constant 0 : index
    %0 = vector.load %arg1[%c0, %c0_0, %c0_1] : memref<1x16x96xbf16, #tpu.memory_space<vmem>>, vector<1x16x8xbf16>
    %1 = vector.shape_cast %0 : vector<1x16x8xbf16> to vector<16x8xbf16>
    %c0_2 = arith.constant 0 : index
    %c0_3 = arith.constant 0 : index
    %c32 = arith.constant 32 : index
    %2 = vector.load %arg1[%c0_2, %c0_3, %c32] : memref<1x16x96xbf16, #tpu.memory_space<vmem>>, vector<1x16x8xbf16>
    %3 = vector.shape_cast %2 : vector<1x16x8xbf16> to vector<16x8xbf16>
    %c0_4 = arith.constant 0 : index
    %c0_5 = arith.constant 0 : index
    %c64 = arith.constant 64 : index
    %4 = vector.load %arg1[%c0_4, %c0_5, %c64] : memref<1x16x96xbf16, #tpu.memory_space<vmem>>, vector<1x16x8xbf16>
    %5 = vector.shape_cast %4 : vector<1x16x8xbf16> to vector<16x8xbf16>
    %cst = arith.constant dense<0.000000e+00> : vector<16x16xf32>
    %6 = tpu.matmul %1, %3, %cst {dimension_numbers = #tpu.dot_dimension_numbers<[1], [1], [0], [0], [0, 0, 1, 0], [], []>} : vector<16x8xbf16>, vector<16x8xbf16>, vector<16x16xf32> -> vector<16x16xf32>
    %cst_6 = arith.constant 0.353553385 : f32
    %7 = vector.broadcast %cst_6 : f32 to vector<16x16xf32>
    %8 = arith.mulf %6, %7 : vector<16x16xf32>
    %cst_7 = arith.constant dense<0xFF800000> : vector<16xf32>
    %9 = vector.multi_reduction <maximumf>, %8, %cst_7 [1] : vector<16x16xf32> to vector<16xf32>
    %10 = vector.shape_cast %9 : vector<16xf32> to vector<16x1xf32>
    %11 = vector.broadcast %10 : vector<16x1xf32> to vector<16x16xf32>
    %12 = arith.subf %8, %11 : vector<16x16xf32>
    %13 = math.exp %12 : vector<16x16xf32>
    %cst_8 = arith.constant dense<0.000000e+00> : vector<16xf32>
    %14 = vector.multi_reduction <add>, %13, %cst_8 [1] : vector<16x16xf32> to vector<16xf32>
    %15 = vector.shape_cast %14 : vector<16xf32> to vector<16x1xf32>
    %16 = tpu.reciprocal %15 {approx = true} : vector<16x1xf32> -> vector<16x1xf32>
    %17 = vector.broadcast %16 : vector<16x1xf32> to vector<16x16xf32>
    %18 = arith.mulf %13, %17 : vector<16x16xf32>
    %19 = arith.truncf %18 : vector<16x16xf32> to vector<16x16xbf16>
    %cst_9 = arith.constant dense<0.000000e+00> : vector<16x8xf32>
    %20 = tpu.matmul %19, %5, %cst_9 {dimension_numbers = #tpu.dot_dimension_numbers<[1], [0], [0], [1], [0, 0, 1, 1], [], []>} : vector<16x16xbf16>, vector<16x8xbf16>, vector<16x8xf32> -> vector<16x8xf32>
    %c0_10 = arith.constant 0 : index
    %c0_11 = arith.constant 0 : index
    %c8 = arith.constant 8 : index
    %21 = vector.load %arg1[%c0_10, %c0_11, %c8] : memref<1x16x96xbf16, #tpu.memory_space<vmem>>, vector<1x16x8xbf16>
    %22 = vector.shape_cast %21 : vector<1x16x8xbf16> to vector<16x8xbf16>
    %c0_12 = arith.constant 0 : index
    %c0_13 = arith.constant 0 : index
    %c40 = arith.constant 40 : index
    %23 = vector.load %arg1[%c0_12, %c0_13, %c40] : memref<1x16x96xbf16, #tpu.memory_space<vmem>>, vector<1x16x8xbf16>
    %24 = vector.shape_cast %23 : vector<1x16x8xbf16> to vector<16x8xbf16>
    %c0_14 = arith.constant 0 : index
    %c0_15 = arith.constant 0 : index
    %c72 = arith.constant 72 : index
    %25 = vector.load %arg1[%c0_14, %c0_15, %c72] : memref<1x16x96xbf16, #tpu.memory_space<vmem>>, vector<1x16x8xbf16>
    %26 = vector.shape_cast %25 : vector<1x16x8xbf16> to vector<16x8xbf16>
    %cst_16 = arith.constant dense<0.000000e+00> : vector<16x16xf32>
    %27 = tpu.matmul %22, %24, %cst_16 {dimension_numbers = #tpu.dot_dimension_numbers<[1], [1], [0], [0], [0, 0, 1, 0], [], []>} : vector<16x8xbf16>, vector<16x8xbf16>, vector<16x16xf32> -> vector<16x16xf32>
    %cst_17 = arith.constant 0.353553385 : f32
    %28 = vector.broadcast %cst_17 : f32 to vector<16x16xf32>
    %29 = arith.mulf %27, %28 : vector<16x16xf32>
    %cst_18 = arith.constant dense<0xFF800000> : vector<16xf32>
    %30 = vector.multi_reduction <maximumf>, %29, %cst_18 [1] : vector<16x16xf32> to vector<16xf32>
    %31 = vector.shape_cast %30 : vector<16xf32> to vector<16x1xf32>
    %32 = vector.broadcast %31 : vector<16x1xf32> to vector<16x16xf32>
    %33 = arith.subf %29, %32 : vector<16x16xf32>
    %34 = math.exp %33 : vector<16x16xf32>
    %cst_19 = arith.constant dense<0.000000e+00> : vector<16xf32>
    %35 = vector.multi_reduction <add>, %34, %cst_19 [1] : vector<16x16xf32> to vector<16xf32>
    %36 = vector.shape_cast %35 : vector<16xf32> to vector<16x1xf32>
    %37 = tpu.reciprocal %36 {approx = true} : vector<16x1xf32> -> vector<16x1xf32>
    %38 = vector.broadcast %37 : vector<16x1xf32> to vector<16x16xf32>
    %39 = arith.mulf %34, %38 : vector<16x16xf32>
    %40 = arith.truncf %39 : vector<16x16xf32> to vector<16x16xbf16>
    %cst_20 = arith.constant dense<0.000000e+00> : vector<16x8xf32>
    %41 = tpu.matmul %40, %26, %cst_20 {dimension_numbers = #tpu.dot_dimension_numbers<[1], [0], [0], [1], [0, 0, 1, 1], [], []>} : vector<16x16xbf16>, vector<16x8xbf16>, vector<16x8xf32> -> vector<16x8xf32>
    %c0_21 = arith.constant 0 : index
    %c0_22 = arith.constant 0 : index
    %c16 = arith.constant 16 : index
    %42 = vector.load %arg1[%c0_21, %c0_22, %c16] : memref<1x16x96xbf16, #tpu.memory_space<vmem>>, vector<1x16x8xbf16>
    %43 = vector.shape_cast %42 : vector<1x16x8xbf16> to vector<16x8xbf16>
    %c0_23 = arith.constant 0 : index
    %c0_24 = arith.constant 0 : index
    %c48 = arith.constant 48 : index
    %44 = vector.load %arg1[%c0_23, %c0_24, %c48] : memref<1x16x96xbf16, #tpu.memory_space<vmem>>, vector<1x16x8xbf16>
    %45 = vector.shape_cast %44 : vector<1x16x8xbf16> to vector<16x8xbf16>
    %c0_25 = arith.constant 0 : index
    %c0_26 = arith.constant 0 : index
    %c80 = arith.constant 80 : index
    %46 = vector.load %arg1[%c0_25, %c0_26, %c80] : memref<1x16x96xbf16, #tpu.memory_space<vmem>>, vector<1x16x8xbf16>
    %47 = vector.shape_cast %46 : vector<1x16x8xbf16> to vector<16x8xbf16>
    %cst_27 = arith.constant dense<0.000000e+00> : vector<16x16xf32>
    %48 = tpu.matmul %43, %45, %cst_27 {dimension_numbers = #tpu.dot_dimension_numbers<[1], [1], [0], [0], [0, 0, 1, 0], [], []>} : vector<16x8xbf16>, vector<16x8xbf16>, vector<16x16xf32> -> vector<16x16xf32>
    %cst_28 = arith.constant 0.353553385 : f32
    %49 = vector.broadcast %cst_28 : f32 to vector<16x16xf32>
    %50 = arith.mulf %48, %49 : vector<16x16xf32>
    %cst_29 = arith.constant dense<0xFF800000> : vector<16xf32>
    %51 = vector.multi_reduction <maximumf>, %50, %cst_29 [1] : vector<16x16xf32> to vector<16xf32>
    %52 = vector.shape_cast %51 : vector<16xf32> to vector<16x1xf32>
    %53 = vector.broadcast %52 : vector<16x1xf32> to vector<16x16xf32>
    %54 = arith.subf %50, %53 : vector<16x16xf32>
    %55 = math.exp %54 : vector<16x16xf32>
    %cst_30 = arith.constant dense<0.000000e+00> : vector<16xf32>
    %56 = vector.multi_reduction <add>, %55, %cst_30 [1] : vector<16x16xf32> to vector<16xf32>
    %57 = vector.shape_cast %56 : vector<16xf32> to vector<16x1xf32>
    %58 = tpu.reciprocal %57 {approx = true} : vector<16x1xf32> -> vector<16x1xf32>
    %59 = vector.broadcast %58 : vector<16x1xf32> to vector<16x16xf32>
    %60 = arith.mulf %55, %59 : vector<16x16xf32>
    %61 = arith.truncf %60 : vector<16x16xf32> to vector<16x16xbf16>
    %cst_31 = arith.constant dense<0.000000e+00> : vector<16x8xf32>
    %62 = tpu.matmul %61, %47, %cst_31 {dimension_numbers = #tpu.dot_dimension_numbers<[1], [0], [0], [1], [0, 0, 1, 1], [], []>} : vector<16x16xbf16>, vector<16x8xbf16>, vector<16x8xf32> -> vector<16x8xf32>
    %c0_32 = arith.constant 0 : index
    %c0_33 = arith.constant 0 : index
    %c24 = arith.constant 24 : index
    %63 = vector.load %arg1[%c0_32, %c0_33, %c24] : memref<1x16x96xbf16, #tpu.memory_space<vmem>>, vector<1x16x8xbf16>
    %64 = vector.shape_cast %63 : vector<1x16x8xbf16> to vector<16x8xbf16>
    %c0_34 = arith.constant 0 : index
    %c0_35 = arith.constant 0 : index
    %c56 = arith.constant 56 : index
    %65 = vector.load %arg1[%c0_34, %c0_35, %c56] : memref<1x16x96xbf16, #tpu.memory_space<vmem>>, vector<1x16x8xbf16>
    %66 = vector.shape_cast %65 : vector<1x16x8xbf16> to vector<16x8xbf16>
    %c0_36 = arith.constant 0 : index
    %c0_37 = arith.constant 0 : index
    %c88 = arith.constant 88 : index
    %67 = vector.load %arg1[%c0_36, %c0_37, %c88] : memref<1x16x96xbf16, #tpu.memory_space<vmem>>, vector<1x16x8xbf16>
    %68 = vector.shape_cast %67 : vector<1x16x8xbf16> to vector<16x8xbf16>
    %cst_38 = arith.constant dense<0.000000e+00> : vector<16x16xf32>
    %69 = tpu.matmul %64, %66, %cst_38 {dimension_numbers = #tpu.dot_dimension_numbers<[1], [1], [0], [0], [0, 0, 1, 0], [], []>} : vector<16x8xbf16>, vector<16x8xbf16>, vector<16x16xf32> -> vector<16x16xf32>
    %cst_39 = arith.constant 0.353553385 : f32
    %70 = vector.broadcast %cst_39 : f32 to vector<16x16xf32>
    %71 = arith.mulf %69, %70 : vector<16x16xf32>
    %cst_40 = arith.constant dense<0xFF800000> : vector<16xf32>
    %72 = vector.multi_reduction <maximumf>, %71, %cst_40 [1] : vector<16x16xf32> to vector<16xf32>
    %73 = vector.shape_cast %72 : vector<16xf32> to vector<16x1xf32>
    %74 = vector.broadcast %73 : vector<16x1xf32> to vector<16x16xf32>
    %75 = arith.subf %71, %74 : vector<16x16xf32>
    %76 = math.exp %75 : vector<16x16xf32>
    %cst_41 = arith.constant dense<0.000000e+00> : vector<16xf32>
    %77 = vector.multi_reduction <add>, %76, %cst_41 [1] : vector<16x16xf32> to vector<16xf32>
    %78 = vector.shape_cast %77 : vector<16xf32> to vector<16x1xf32>
    %79 = tpu.reciprocal %78 {approx = true} : vector<16x1xf32> -> vector<16x1xf32>
    %80 = vector.broadcast %79 : vector<16x1xf32> to vector<16x16xf32>
    %81 = arith.mulf %76, %80 : vector<16x16xf32>
    %82 = arith.truncf %81 : vector<16x16xf32> to vector<16x16xbf16>
    %cst_42 = arith.constant dense<0.000000e+00> : vector<16x8xf32>
    %83 = tpu.matmul %82, %68, %cst_42 {dimension_numbers = #tpu.dot_dimension_numbers<[1], [0], [0], [1], [0, 0, 1, 1], [], []>} : vector<16x16xbf16>, vector<16x8xbf16>, vector<16x8xf32> -> vector<16x8xf32>
    %84 = tpu.concatenate %20, %41, %62, %83 in 1 : vector<16x8xf32>, vector<16x8xf32>, vector<16x8xf32>, vector<16x8xf32> -> vector<16x32xf32>
    %85 = arith.truncf %84 : vector<16x32xf32> to vector<16x32xbf16>
    %c0_43 = arith.constant 0 : index
    %c0_44 = arith.constant 0 : index
    %c0_45 = arith.constant 0 : index
    %86 = vector.load %arg2[%c0_43, %c0_44, %c0_45] : memref<1x16x32xbf16, #tpu.memory_space<vmem>>, vector<1x16x32xbf16>
    %87 = vector.shape_cast %86 : vector<1x16x32xbf16> to vector<16x32xbf16>
    %88 = vector.shape_cast %85 : vector<16x32xbf16> to vector<1x16x32xbf16>
    tpu.vector_store %arg2[%c0_43, %c0_44, %c0_45], %88 {strides = array<i32>} : memref<1x16x32xbf16, #tpu.memory_space<vmem>>, vector<1x16x32xbf16>,
    return
  }
  func.func @transform_0(%arg0: i32) -> (i32, i32, i32) {
    %c0_i32 = arith.constant 0 : i32
    %c0_i32_0 = arith.constant 0 : i32
    %c0_i32_1 = arith.constant 0 : i32
    return %arg0, %c0_i32, %c0_i32_0 : i32, i32, i32
  }
  func.func @transform_1(%arg0: i32) -> (i32, i32, i32) {
    %c0_i32 = arith.constant 0 : i32
    %c0_i32_0 = arith.constant 0 : i32
    %c0_i32_1 = arith.constant 0 : i32
    return %arg0, %c0_i32, %c0_i32_0 : i32, i32, i32
  }
}

module attributes {stable_mosaic.version = 11 : i64} {
  func.func @_add_layernorm_kernel(%arg0: i32, %arg1: memref<32x32xbf16, #tpu.memory_space<vmem>>, %arg2: memref<32x32xbf16, #tpu.memory_space<vmem>>, %arg3: memref<1x32xf32, #tpu.memory_space<vmem>>, %arg4: memref<1x32xf32, #tpu.memory_space<vmem>>, %arg5: memref<32x32xbf16, #tpu.memory_space<vmem>>) attributes {dimension_semantics = [#tpu.dimension_semantics<parallel>], iteration_bounds = array<i64: 1>, scalar_prefetch = 0 : i64, scratch_operands = 0 : i64, tpu.core_type = #tpu.core_type<tc>, window_params = [{transform_indices = @transform_0, window_bounds = array<i64: 32, 32>}, {transform_indices = @transform_1, window_bounds = array<i64: 32, 32>}, {pipeline_mode = #tpu.pipeline_mode<synchronous>, transform_indices = @transform_2, window_bounds = array<i64: 1, 32>}, {pipeline_mode = #tpu.pipeline_mode<synchronous>, transform_indices = @transform_3, window_bounds = array<i64: 1, 32>}, {transform_indices = @transform_4, window_bounds = array<i64: 32, 32>}]} {
    %c0 = arith.constant 0 : index
    %c0_0 = arith.constant 0 : index
    %0 = vector.load %arg1[%c0, %c0_0] : memref<32x32xbf16, #tpu.memory_space<vmem>>, vector<32x32xbf16>
    %1 = arith.extf %0 : vector<32x32xbf16> to vector<32x32xf32>
    %c0_1 = arith.constant 0 : index
    %c0_2 = arith.constant 0 : index
    %2 = vector.load %arg2[%c0_1, %c0_2] : memref<32x32xbf16, #tpu.memory_space<vmem>>, vector<32x32xbf16>
    %3 = arith.extf %2 : vector<32x32xbf16> to vector<32x32xf32>
    %4 = arith.addf %1, %3 : vector<32x32xf32>
    %cst = arith.constant dense<0.000000e+00> : vector<32xf32>
    %5 = vector.multi_reduction <add>, %4, %cst [1] : vector<32x32xf32> to vector<32xf32>
    %6 = vector.shape_cast %5 : vector<32xf32> to vector<32x1xf32>
    %cst_3 = arith.constant 3.200000e+01 : f32
    %7 = vector.broadcast %cst_3 : f32 to vector<32x1xf32>
    %8 = arith.divf %6, %7 : vector<32x1xf32>
    %9 = vector.broadcast %8 : vector<32x1xf32> to vector<32x32xf32>
    %10 = arith.subf %4, %9 : vector<32x32xf32>
    %11 = arith.mulf %10, %10 : vector<32x32xf32>
    %cst_4 = arith.constant dense<0.000000e+00> : vector<32xf32>
    %12 = vector.multi_reduction <add>, %11, %cst_4 [1] : vector<32x32xf32> to vector<32xf32>
    %13 = vector.shape_cast %12 : vector<32xf32> to vector<32x1xf32>
    %cst_5 = arith.constant 3.200000e+01 : f32
    %14 = vector.broadcast %cst_5 : f32 to vector<32x1xf32>
    %15 = arith.divf %13, %14 : vector<32x1xf32>
    %16 = vector.broadcast %8 : vector<32x1xf32> to vector<32x32xf32>
    %17 = arith.subf %4, %16 : vector<32x32xf32>
    %cst_6 = arith.constant 9.99999974E-6 : f32
    %18 = vector.broadcast %cst_6 : f32 to vector<32x1xf32>
    %19 = arith.addf %15, %18 : vector<32x1xf32>
    %20 = math.rsqrt %19 : vector<32x1xf32>
    %21 = vector.broadcast %20 : vector<32x1xf32> to vector<32x32xf32>
    %22 = arith.mulf %17, %21 : vector<32x32xf32>
    %c0_7 = arith.constant 0 : index
    %c0_8 = arith.constant 0 : index
    %23 = vector.load %arg3[%c0_7, %c0_8] : memref<1x32xf32, #tpu.memory_space<vmem>>, vector<1x32xf32>
    %24 = vector.broadcast %23 : vector<1x32xf32> to vector<32x32xf32>
    %25 = arith.mulf %22, %24 : vector<32x32xf32>
    %c0_9 = arith.constant 0 : index
    %c0_10 = arith.constant 0 : index
    %26 = vector.load %arg4[%c0_9, %c0_10] : memref<1x32xf32, #tpu.memory_space<vmem>>, vector<1x32xf32>
    %27 = vector.broadcast %26 : vector<1x32xf32> to vector<32x32xf32>
    %28 = arith.addf %25, %27 : vector<32x32xf32>
    %29 = arith.truncf %28 : vector<32x32xf32> to vector<32x32xbf16>
    %c0_11 = arith.constant 0 : index
    %c0_12 = arith.constant 0 : index
    %30 = vector.load %arg5[%c0_11, %c0_12] : memref<32x32xbf16, #tpu.memory_space<vmem>>, vector<32x32xbf16>
    tpu.vector_store %arg5[%c0_11, %c0_12], %29 {strides = array<i32>} : memref<32x32xbf16, #tpu.memory_space<vmem>>, vector<32x32xbf16>,
    return
  }
  func.func @transform_0(%arg0: i32) -> (i32, i32) {
    %c0_i32 = arith.constant 0 : i32
    %c0_i32_0 = arith.constant 0 : i32
    return %arg0, %c0_i32 : i32, i32
  }
  func.func @transform_1(%arg0: i32) -> (i32, i32) {
    %c0_i32 = arith.constant 0 : i32
    %c0_i32_0 = arith.constant 0 : i32
    return %arg0, %c0_i32 : i32, i32
  }
  func.func @transform_2(%arg0: i32) -> (i32, i32) {
    %c0_i32 = arith.constant 0 : i32
    %c0_i32_0 = arith.constant 0 : i32
    %c0_i32_1 = arith.constant 0 : i32
    return %c0_i32, %c0_i32_0 : i32, i32
  }
  func.func @transform_3(%arg0: i32) -> (i32, i32) {
    %c0_i32 = arith.constant 0 : i32
    %c0_i32_0 = arith.constant 0 : i32
    %c0_i32_1 = arith.constant 0 : i32
    return %c0_i32, %c0_i32_0 : i32, i32
  }
  func.func @transform_4(%arg0: i32) -> (i32, i32) {
    %c0_i32 = arith.constant 0 : i32
    %c0_i32_0 = arith.constant 0 : i32
    return %arg0, %c0_i32 : i32, i32
  }
}

module attributes {stable_mosaic.version = 11 : i64} {
  func.func @_matmul_kernel(%arg0: i32, %arg1: i32, %arg2: i32, %arg3: memref<32x32xbf16, #tpu.memory_space<vmem>>, %arg4: memref<32x64xbf16, #tpu.memory_space<vmem>>, %arg5: memref<1x64xf32, #tpu.memory_space<vmem>>, %arg6: memref<32x64xbf16, #tpu.memory_space<vmem>>, %arg7: memref<32x64xf32, #tpu.memory_space<vmem>>) attributes {dimension_semantics = [#tpu.dimension_semantics<parallel>, #tpu.dimension_semantics<parallel>, #tpu.dimension_semantics<arbitrary>], iteration_bounds = array<i64: 1, 1, 1>, scalar_prefetch = 0 : i64, scratch_operands = 1 : i64, tpu.core_type = #tpu.core_type<tc>, window_params = [{transform_indices = @transform_0, window_bounds = array<i64: 32, 32>}, {transform_indices = @transform_1, window_bounds = array<i64: 32, 64>}, {transform_indices = @transform_2, window_bounds = array<i64: 1, 64>}, {transform_indices = @transform_3, window_bounds = array<i64: 32, 64>}]} {
    %c0_i32 = arith.constant 0 : i32
    %0 = arith.cmpi eq, %arg2, %c0_i32 : i32
    %1 = arith.extui %0 : i1 to i32
    %c0_i32_0 = arith.constant 0 : i32
    %2 = arith.cmpi ne, %1, %c0_i32_0 : i32
    scf.if %2 {
      %cst_10 = arith.constant 0.000000e+00 : f32
      %12 = vector.broadcast %cst_10 : f32 to vector<32x64xf32>
      %c0_11 = arith.constant 0 : index
      %c0_12 = arith.constant 0 : index
      %13 = vector.load %arg7[%c0_11, %c0_12] : memref<32x64xf32, #tpu.memory_space<vmem>>, vector<32x64xf32>
      tpu.vector_store %arg7[%c0_11, %c0_12], %12 {strides = array<i32>} : memref<32x64xf32, #tpu.memory_space<vmem>>, vector<32x64xf32>,
    } else {
    }
    %c0 = arith.constant 0 : index
    %c0_1 = arith.constant 0 : index
    %3 = vector.load %arg7[%c0, %c0_1] : memref<32x64xf32, #tpu.memory_space<vmem>>, vector<32x64xf32>
    %c0_2 = arith.constant 0 : index
    %c0_3 = arith.constant 0 : index
    %4 = vector.load %arg3[%c0_2, %c0_3] : memref<32x32xbf16, #tpu.memory_space<vmem>>, vector<32x32xbf16>
    %c0_4 = arith.constant 0 : index
    %c0_5 = arith.constant 0 : index
    %5 = vector.load %arg4[%c0_4, %c0_5] : memref<32x64xbf16, #tpu.memory_space<vmem>>, vector<32x64xbf16>
    %cst = arith.constant dense<0.000000e+00> : vector<32x64xf32>
    %6 = tpu.matmul %4, %5, %cst {dimension_numbers = #tpu.dot_dimension_numbers<[1], [0], [0], [1], [0, 0, 1, 1], [], []>} : vector<32x32xbf16>, vector<32x64xbf16>, vector<32x64xf32> -> vector<32x64xf32>
    %7 = arith.addf %3, %6 : vector<32x64xf32>
    %c0_6 = arith.constant 0 : index
    %c0_7 = arith.constant 0 : index
    %8 = vector.load %arg7[%c0_6, %c0_7] : memref<32x64xf32, #tpu.memory_space<vmem>>, vector<32x64xf32>
    tpu.vector_store %arg7[%c0_6, %c0_7], %7 {strides = array<i32>} : memref<32x64xf32, #tpu.memory_space<vmem>>, vector<32x64xf32>,
    %c0_i32_8 = arith.constant 0 : i32
    %9 = arith.cmpi eq, %arg2, %c0_i32_8 : i32
    %10 = arith.extui %9 : i1 to i32
    %c0_i32_9 = arith.constant 0 : i32
    %11 = arith.cmpi ne, %10, %c0_i32_9 : i32
    scf.if %11 {
      %c0_10 = arith.constant 0 : index
      %c0_11 = arith.constant 0 : index
      %12 = vector.load %arg7[%c0_10, %c0_11] : memref<32x64xf32, #tpu.memory_space<vmem>>, vector<32x64xf32>
      %c0_12 = arith.constant 0 : index
      %c0_13 = arith.constant 0 : index
      %13 = vector.load %arg5[%c0_12, %c0_13] : memref<1x64xf32, #tpu.memory_space<vmem>>, vector<1x64xf32>
      %14 = vector.broadcast %13 : vector<1x64xf32> to vector<32x64xf32>
      %15 = arith.addf %12, %14 : vector<32x64xf32>
      %cst_14 = arith.constant 5.000000e-01 : f32
      %16 = vector.broadcast %cst_14 : f32 to vector<32x64xf32>
      %17 = arith.mulf %16, %15 : vector<32x64xf32>
      %cst_15 = arith.constant 0.707106769 : f32
      %18 = vector.broadcast %cst_15 : f32 to vector<32x64xf32>
      %19 = arith.mulf %15, %18 : vector<32x64xf32>
      %20 = math.erf %19 : vector<32x64xf32>
      %cst_16 = arith.constant 1.000000e+00 : f32
      %21 = vector.broadcast %cst_16 : f32 to vector<32x64xf32>
      %22 = arith.addf %21, %20 : vector<32x64xf32>
      %23 = arith.mulf %17, %22 : vector<32x64xf32>
      %24 = arith.truncf %23 : vector<32x64xf32> to vector<32x64xbf16>
      %c0_17 = arith.constant 0 : index
      %c0_18 = arith.constant 0 : index
      %25 = vector.load %arg6[%c0_17, %c0_18] : memref<32x64xbf16, #tpu.memory_space<vmem>>, vector<32x64xbf16>
      tpu.vector_store %arg6[%c0_17, %c0_18], %24 {strides = array<i32>} : memref<32x64xbf16, #tpu.memory_space<vmem>>, vector<32x64xbf16>,
    } else {
    }
    return
  }
  func.func @transform_0(%arg0: i32, %arg1: i32, %arg2: i32) -> (i32, i32) {
    %c0_i32 = arith.constant 0 : i32
    return %arg0, %arg2 : i32, i32
  }
  func.func @transform_1(%arg0: i32, %arg1: i32, %arg2: i32) -> (i32, i32) {
    %c0_i32 = arith.constant 0 : i32
    return %arg2, %arg1 : i32, i32
  }
  func.func @transform_2(%arg0: i32, %arg1: i32, %arg2: i32) -> (i32, i32) {
    %c0_i32 = arith.constant 0 : i32
    %c0_i32_0 = arith.constant 0 : i32
    return %c0_i32, %arg1 : i32, i32
  }
  func.func @transform_3(%arg0: i32, %arg1: i32, %arg2: i32) -> (i32, i32) {
    %c0_i32 = arith.constant 0 : i32
    return %arg0, %arg1 : i32, i32
  }
}

module attributes {stable_mosaic.version = 11 : i64} {
  func.func @_matmul_kernel(%arg0: i32, %arg1: i32, %arg2: i32, %arg3: memref<32x32xbf16, #tpu.memory_space<vmem>>, %arg4: memref<32x64xbf16, #tpu.memory_space<vmem>>, %arg5: memref<1x64xf32, #tpu.memory_space<vmem>>, %arg6: memref<32x64xf32, #tpu.memory_space<vmem>>, %arg7: memref<32x64xf32, #tpu.memory_space<vmem>>) attributes {dimension_semantics = [#tpu.dimension_semantics<parallel>, #tpu.dimension_semantics<parallel>, #tpu.dimension_semantics<arbitrary>], iteration_bounds = array<i64: 1, 1, 1>, scalar_prefetch = 0 : i64, scratch_operands = 1 : i64, tpu.core_type = #tpu.core_type<tc>, window_params = [{transform_indices = @transform_0, window_bounds = array<i64: 32, 32>}, {transform_indices = @transform_1, window_bounds = array<i64: 32, 64>}, {transform_indices = @transform_2, window_bounds = array<i64: 1, 64>}, {transform_indices = @transform_3, window_bounds = array<i64: 32, 64>}]} {
    %c0_i32 = arith.constant 0 : i32
    %0 = arith.cmpi eq, %arg2, %c0_i32 : i32
    %1 = arith.extui %0 : i1 to i32
    %c0_i32_0 = arith.constant 0 : i32
    %2 = arith.cmpi ne, %1, %c0_i32_0 : i32
    scf.if %2 {
      %cst_10 = arith.constant 0.000000e+00 : f32
      %12 = vector.broadcast %cst_10 : f32 to vector<32x64xf32>
      %c0_11 = arith.constant 0 : index
      %c0_12 = arith.constant 0 : index
      %13 = vector.load %arg7[%c0_11, %c0_12] : memref<32x64xf32, #tpu.memory_space<vmem>>, vector<32x64xf32>
      tpu.vector_store %arg7[%c0_11, %c0_12], %12 {strides = array<i32>} : memref<32x64xf32, #tpu.memory_space<vmem>>, vector<32x64xf32>,
    } else {
    }
    %c0 = arith.constant 0 : index
    %c0_1 = arith.constant 0 : index
    %3 = vector.load %arg7[%c0, %c0_1] : memref<32x64xf32, #tpu.memory_space<vmem>>, vector<32x64xf32>
    %c0_2 = arith.constant 0 : index
    %c0_3 = arith.constant 0 : index
    %4 = vector.load %arg3[%c0_2, %c0_3] : memref<32x32xbf16, #tpu.memory_space<vmem>>, vector<32x32xbf16>
    %c0_4 = arith.constant 0 : index
    %c0_5 = arith.constant 0 : index
    %5 = vector.load %arg4[%c0_4, %c0_5] : memref<32x64xbf16, #tpu.memory_space<vmem>>, vector<32x64xbf16>
    %cst = arith.constant dense<0.000000e+00> : vector<32x64xf32>
    %6 = tpu.matmul %4, %5, %cst {dimension_numbers = #tpu.dot_dimension_numbers<[1], [0], [0], [1], [0, 0, 1, 1], [], []>} : vector<32x32xbf16>, vector<32x64xbf16>, vector<32x64xf32> -> vector<32x64xf32>
    %7 = arith.addf %3, %6 : vector<32x64xf32>
    %c0_6 = arith.constant 0 : index
    %c0_7 = arith.constant 0 : index
    %8 = vector.load %arg7[%c0_6, %c0_7] : memref<32x64xf32, #tpu.memory_space<vmem>>, vector<32x64xf32>
    tpu.vector_store %arg7[%c0_6, %c0_7], %7 {strides = array<i32>} : memref<32x64xf32, #tpu.memory_space<vmem>>, vector<32x64xf32>,
    %c0_i32_8 = arith.constant 0 : i32
    %9 = arith.cmpi eq, %arg2, %c0_i32_8 : i32
    %10 = arith.extui %9 : i1 to i32
    %c0_i32_9 = arith.constant 0 : i32
    %11 = arith.cmpi ne, %10, %c0_i32_9 : i32
    scf.if %11 {
      %c0_10 = arith.constant 0 : index
      %c0_11 = arith.constant 0 : index
      %12 = vector.load %arg7[%c0_10, %c0_11] : memref<32x64xf32, #tpu.memory_space<vmem>>, vector<32x64xf32>
      %c0_12 = arith.constant 0 : index
      %c0_13 = arith.constant 0 : index
      %13 = vector.load %arg5[%c0_12, %c0_13] : memref<1x64xf32, #tpu.memory_space<vmem>>, vector<1x64xf32>
      %14 = vector.broadcast %13 : vector<1x64xf32> to vector<32x64xf32>
      %15 = arith.addf %12, %14 : vector<32x64xf32>
      %c0_14 = arith.constant 0 : index
      %c0_15 = arith.constant 0 : index
      %16 = vector.load %arg6[%c0_14, %c0_15] : memref<32x64xf32, #tpu.memory_space<vmem>>, vector<32x64xf32>
      tpu.vector_store %arg6[%c0_14, %c0_15], %15 {strides = array<i32>} : memref<32x64xf32, #tpu.memory_space<vmem>>, vector<32x64xf32>,
    } else {
    }
    return
  }
  func.func @transform_0(%arg0: i32, %arg1: i32, %arg2: i32) -> (i32, i32) {
    %c0_i32 = arith.constant 0 : i32
    return %arg0, %arg2 : i32, i32
  }
  func.func @transform_1(%arg0: i32, %arg1: i32, %arg2: i32) -> (i32, i32) {
    %c0_i32 = arith.constant 0 : i32
    return %arg2, %arg1 : i32, i32
  }
  func.func @transform_2(%arg0: i32, %arg1: i32, %arg2: i32) -> (i32, i32) {
    %c0_i32 = arith.constant 0 : i32
    %c0_i32_0 = arith.constant 0 : i32
    return %c0_i32, %arg1 : i32, i32
  }
  func.func @transform_3(%arg0: i32, %arg1: i32, %arg2: i32) -> (i32, i32) {
    %c0_i32 = arith.constant 0 : i32
    return %arg0, %arg1 : i32, i32
  }
}

</mosaic_0001>

<bundles_post_ra>
// kernel: simple_vit_ae_forward.33
= control target key start
LH: loop header
LB: loop body
LE: loop exit
PB: predicated region body
PF: predicated region fallthrough
CT: control target
= control target key end

     0   :  { %vm19_vm0 = vcmask 261120   ;;  %v224_v1 = vmov 0.0   ;;  %vm74_vm1 = vcmask 523264   ;;  %vm173_vm2 = vcmask 257024   ;;  %s286_s1 = inlined_call_operand.vmem [shape: bf16[64,32], index: 1, kind: input, shape index: {}]   ;;  %s287_s0 = inlined_call_operand.vmem [shape: bf16[32,64], index: 0, kind: input, shape index: {}]   ;;  %s288_s2 = inlined_call_operand.vmem [shape: f32[1,32], index: 2, kind: input, shape index: {}]   ;;  %s289_s3 = inlined_call_operand.vmem [shape: bf16[32,32], index: 3, kind: output, shape index: {}]  }
   0x1   :  { %v218_v0 = vld [vmem:[%s286_s1] sm:$0xff]   ;;  %22 = vst.msk [vmem:[#allocation2 + $0x10] sm:$0xff] %vm19_vm0, %v224_v1  ;;  %20 = vst.msk [vmem:[#allocation2] sm:$0xff] %vm19_vm0, %v224_v1  ;;  %v219_v2 = vld [vmem:[%s286_s1 + $0x8] sm:$0xff]  }
   0x2   :  { %21 = vst.msk [vmem:[#allocation2 + $0x8] sm:$0xff] %vm19_vm0, %v224_v1  ;;  %23 = vst.msk [vmem:[#allocation2 + $0x18] sm:$0xff] %vm19_vm0, %v224_v1  ;;  %205 = vmatprep.subr.bf16.mxu0 %v218_v0  ;;  %v220_v3 = vld [vmem:[%s286_s1 + $0x10] sm:$0xff]   ;;  %v222_v4 = vld [vmem:[%s287_s0] sm:$0xff]  }
   0x3   :  { %206 = vmatpush3.bf16.msra.mxu0 %v218_v0  ;;  %213 = vmatprep.mubr.msk.bf16.mxu0 %vm74_vm1, %v222_v4  ;;  %v221_v5 = vld [vmem:[%s286_s1 + $0x18] sm:$0xff]   ;;  %v223_v6 = vld [vmem:[%s287_s0 + $0x8] sm:$0xff]   ;;  %v190_v19 = vld [vmem:[%s288_s2] ss:$0 sm:$0xff] }
   0x4   :  { %207 = vmatprep.subr.bf16.mxu0 %v219_v2 }
   0x7   :  { %208 = vmatpush3.bf16.msra.mxu0 %v219_v2 }
   0x8   :  { %209 = vmatprep.subr.bf16.mxu0 %v220_v3  ;;  %v26_v7 = vld [vmem:[#allocation2 + $0x10] sm:$0xff]  ;;  %v24_v8 = vld [vmem:[#allocation2] sm:$0xff] }
   0x9   :  { %v27_v10 = vld [vmem:[#allocation2 + $0x18] sm:$0xff]  ;;  %v25_v13 = vld [vmem:[#allocation2 + $0x8] sm:$0xff] }
   0xb   :  { %210 = vmatpush3.bf16.msra.mxu0 %v220_v3 }
   0xc   :  { %211 = vmatprep.subr.bf16.mxu0 %v221_v5 }
   0xf   :  { %212 = vmatpush3.bf16.msra.mxu0 %v221_v5 }
  0x12   :  { %214 = vmatmul.mubr.msk.bf16.vlgmr.msra.gmra.mrb[0].mxu0 %vm74_vm1, %v223_v6 }
  0xe5   :  { %v215_v9 = vpop.f32.mrb[0].mxu0 }
  0xe6   :  { %v132_v11 = vadd.f32 %v215_v9, %v26_v7  ;;  %v115_v12 = vpop.f32.mrb[1].mxu0 }
  0xe7   :  { %v130_v14 = vadd.f32 %v115_v12, %v24_v8  ;;  %v216_v15 = vpop.f32.mrb[2].mxu0 }
  0xe8   :  { %137 = vst.msk [vmem:[#allocation2 + $0x10] sm:$0xff] %vm19_vm0, %v132_v11  ;;  %v133_v16 = vadd.f32 %v216_v15, %v27_v10  ;;  %v118_v17 = vpop.f32.mrb[3].mxu0 }
  0xe9   :  { %135 = vst.msk [vmem:[#allocation2] sm:$0xff] %vm19_vm0, %v130_v14  ;;  %v131_v18 = vadd.f32 %v118_v17, %v25_v13 }
  0xea   :  { %138 = vst.msk [vmem:[#allocation2 + $0x18] sm:$0xff] %vm19_vm0, %v133_v16 }
  0xeb   :  { %136 = vst.msk [vmem:[#allocation2 + $0x8] sm:$0xff] %vm19_vm0, %v131_v18 }
  0xef   :  { %v144_v20 = vld [vmem:[#allocation2 + $0x10] sm:$0xff] }
  0xf0   :  { %v155_v21 = vadd.f32 %v190_v19, %v144_v20  ;;  %v142_v22 = vld [vmem:[#allocation2] sm:$0xff] }
  0xf1   :  { %v153_v23 = vadd.f32 %v190_v19, %v142_v22  ;;  %v145_v24 = vld [vmem:[#allocation2 + $0x18] sm:$0xff] }
  0xf2   :  { %v197_v25 = vpack.c.bf16 %v155_v21, %v155_v21  ;;  %v156_v26 = vadd.f32 %v190_v19, %v145_v24  ;;  %v143_v27 = vld [vmem:[#allocation2 + $0x8] sm:$0xff] }
  0xf3   :  { %v195_v28 = vpack.c.bf16 %v153_v23, %v153_v23  ;;  %v154_v29 = vadd.f32 %v190_v19, %v143_v27 }
  0xf4   :  { %176 = vst.msk [vmem:[%s289_s3 + $0x8] sm:$0xf] %vm173_vm2, %v197_v25  ;;  %v198_v30 = vpack.c.bf16 %v156_v26, %v156_v26 }
  0xf5   :  { %174 = vst.msk [vmem:[%s289_s3] sm:$0xf] %vm173_vm2, %v195_v28  ;;  %v196_v31 = vpack.c.bf16 %v154_v29, %v154_v29 }
  0xf6   :  { %177 = vst.msk [vmem:[%s289_s3 + $0xc] sm:$0xf] %vm173_vm2, %v198_v30 }
  0xf7   :  { %175 = vst.msk [vmem:[%s289_s3 + $0x4] sm:$0xf] %vm173_vm2, %v196_v31 }

// kernel: simple_vit_ae_forward.32
= control target key start
LH: loop header
LB: loop body
LE: loop exit
PB: predicated region body
PF: predicated region fallthrough
CT: control target
= control target key end

     0   :  { %vm22_vm0 = vcmask 523264   ;;  %vm114_vm1 = vcmask 519168   ;;  %s206_s0 = inlined_call_operand.vmem [shape: bf16[32,64], index: 0, kind: input, shape index: {}]   ;;  %s207_s1 = inlined_call_operand.vmem [shape: f32[1,64], index: 1, kind: input, shape index: {}]   ;;  %s208_s2 = inlined_call_operand.vmem [shape: f32[1,64], index: 2, kind: input, shape index: {}]   ;;  %s209_s3 = inlined_call_operand.vmem [shape: bf16[32,64], index: 3, kind: output, shape index: {}]  }
   0x1   :  { %v134_v0 = vld [vmem:[%s206_s0] sm:$0xff]   ;;  %v141_v1 = vld [vmem:[%s206_s0 + $0x8] sm:$0xff]  }
   0x2   :  { %v135_v2 = vunpack.c.l.bf16 %v134_v0  ;;  %v139_v3 = vunpack.c.l.bf16 %v141_v1  ;;  %v136_v4 = vunpack.c.h.bf16 %v134_v0  ;;  %v140_v5 = vunpack.c.h.bf16 %v141_v1  ;;  %v123_v43 = vld [vmem:[%s207_s1] ss:$0 sm:$0xff] }
   0x3   :  { %v124_v45 = vld [vmem:[%s208_s2] ss:$0 sm:$0xff] }
   0x4   :  { %v23_v6 = vsel %vm22_vm0, %v135_v2, 0.0  ;;  %v29_v7 = vsel %vm22_vm0, %v139_v3, 0.0  ;;  %v26_v8 = vsel %vm22_vm0, %v136_v4, 0.0  ;;  %v32_v9 = vsel %vm22_vm0, %v140_v5, 0.0 }
   0x5   :  { %24 = vadd.xlane.f32.xlu0 %v23_v6  ;;  %30 = vadd.xlane.f32.xlu1 %v29_v7 }
   0x9   :  { %27 = vadd.xlane.f32.xlu0 %v26_v8  ;;  %33 = vadd.xlane.f32.xlu1 %v32_v9 }
  0x92   :  { %v25_v10 = vpop.xlane.xlu0 %24  ;;  %v31_v11 = vpop.xlane.xlu1 %30 }
  0x93   :  { %v36_v12 = vmul.f32 0.015625, %v25_v10  ;;  %v38_v13 = vmul.f32 0.015625, %v31_v11 }
  0x95   :  { %v40_v14 = vsub.f32 %v135_v2, %v36_v12  ;;  %v42_v15 = vsub.f32 %v139_v3, %v38_v13 }
  0x96   :  { %v28_v16 = vpop.xlane.xlu0 %27  ;;  %v34_v17 = vpop.xlane.xlu1 %33 }
  0x97   :  { %v37_v18 = vmul.f32 0.015625, %v28_v16  ;;  %v39_v19 = vmul.f32 0.015625, %v34_v17  ;;  %v44_v20 = vmul.f32 %v40_v14, %v40_v14  ;;  %v46_v21 = vmul.f32 %v42_v15, %v42_v15 }
  0x99   :  { %v41_v22 = vsub.f32 %v136_v4, %v37_v18  ;;  %v43_v23 = vsub.f32 %v140_v5, %v39_v19  ;;  %v48_v24 = vsel %vm22_vm0, %v44_v20, 0.0  ;;  %v54_v25 = vsel %vm22_vm0, %v46_v21, 0.0 }
  0x9a   :  { %49 = vadd.xlane.f32.xlu0 %v48_v24 }
  0x9b   :  { %v45_v26 = vmul.f32 %v41_v22, %v41_v22  ;;  %v47_v27 = vmul.f32 %v43_v23, %v43_v23 }
  0x9d   :  { %v51_v28 = vsel %vm22_vm0, %v45_v26, 0.0  ;;  %v57_v29 = vsel %vm22_vm0, %v47_v27, 0.0 }
  0x9e   :  { %55 = vadd.xlane.f32.xlu0 %v54_v25  ;;  %52 = vadd.xlane.f32.xlu1 %v51_v28 }
  0xa2   :  { %58 = vadd.xlane.f32.xlu1 %v57_v29 }
 0x127   :  { %v50_v30 = vpop.xlane.xlu0 %49 }
 0x128   :  { %v60_v31 = vmul.f32 0.015625, %v50_v30 }
 0x12a   :  { %v64_v32 = vadd.f32 1e-05, %v60_v31 }
 0x12b   :  { %v53_v33 = vpop.xlane.xlu1 %52  ;;  %v56_v34 = vpop.xlane.xlu0 %55 }
 0x12c   :  { %142 = vrsqrt.f32 %v64_v32  ;;  %v61_v35 = vmul.f32 0.015625, %v53_v33  ;;  %v62_v36 = vmul.f32 0.015625, %v56_v34 }
 0x12e   :  { %v65_v37 = vadd.f32 1e-05, %v61_v35  ;;  %v66_v38 = vadd.f32 1e-05, %v62_v36 }
 0x12f   :  { %v59_v39 = vpop.xlane.xlu1 %58 }
 0x130   :  { %144 = vrsqrt.f32 %v65_v37  ;;  %v63_v40 = vmul.f32 0.015625, %v59_v39 }
 0x131   :  { %146 = vrsqrt.f32 %v66_v38 }
 0x132   :  { %v67_v41 = vadd.f32 1e-05, %v63_v40 }
 0x134   :  { %148 = vrsqrt.f32 %v67_v41 }
 0x136   :  { %v143_v42 = vpop.eup %142 }
 0x137   :  { %v72_v44 = vmul.f32 %v143_v42, %v40_v14 }
 0x139   :  { %v83_v46 = vmul.f32 %v123_v43, %v72_v44 }
 0x13a   :  { %v145_v47 = vpop.eup %144 }
 0x13b   :  { %v147_v48 = vpop.eup %146  ;;  %v94_v49 = vadd.f32 %v124_v45, %v83_v46  ;;  %v73_v50 = vmul.f32 %v145_v47, %v41_v22 }
 0x13c   :  { %v74_v51 = vmul.f32 %v147_v48, %v42_v15 }
 0x13d   :  { %v129_v52 = vpack.c.bf16 %v94_v49, %v94_v49  ;;  %v84_v53 = vmul.f32 %v123_v43, %v73_v50 }
 0x13e   :  { %v149_v54 = vpop.eup %148  ;;  %v85_v55 = vmul.f32 %v123_v43, %v74_v51 }
 0x13f   :  { %115 = vst.msk [vmem:[%s209_s3] sm:$0xf] %vm114_vm1, %v129_v52  ;;  %v95_v56 = vadd.f32 %v124_v45, %v84_v53  ;;  %v75_v57 = vmul.f32 %v149_v54, %v43_v23 }
 0x140   :  { %v96_v58 = vadd.f32 %v124_v45, %v85_v55 }
 0x141   :  { %v130_v59 = vpack.c.bf16 %v95_v56, %v95_v56  ;;  %v86_v60 = vmul.f32 %v123_v43, %v75_v57 }
 0x142   :  { %v131_v61 = vpack.c.bf16 %v96_v58, %v96_v58 }
 0x143   :  { %116 = vst.msk [vmem:[%s209_s3 + $0x4] sm:$0xf] %vm114_vm1, %v130_v59  ;;  %v97_v62 = vadd.f32 %v124_v45, %v86_v60 }
 0x144   :  { %117 = vst.msk [vmem:[%s209_s3 + $0x8] sm:$0xf] %vm114_vm1, %v131_v61 }
 0x145   :  { %v132_v63 = vpack.c.bf16 %v97_v62, %v97_v62 }
 0x147   :  { %118 = vst.msk [vmem:[%s209_s3 + $0xc] sm:$0xf] %vm114_vm1, %v132_v63 }

// kernel: simple_vit_ae_forward.34
= control target key start
LH: loop header
LB: loop body
LE: loop exit
PB: predicated region body
PF: predicated region fallthrough
CT: control target
= control target key end

     0   :  { %vm22_vm0 = vcmask 261120   ;;  %vm114_vm1 = vcmask 257024   ;;  %s206_s0 = inlined_call_operand.vmem [shape: bf16[32,32], index: 0, kind: input, shape index: {}]   ;;  %s207_s1 = inlined_call_operand.vmem [shape: f32[1,32], index: 1, kind: input, shape index: {}]   ;;  %s208_s2 = inlined_call_operand.vmem [shape: f32[1,32], index: 2, kind: input, shape index: {}]   ;;  %s209_s3 = inlined_call_operand.vmem [shape: bf16[32,32], index: 3, kind: output, shape index: {}]  }
   0x1   :  { %v134_v0 = vld [vmem:[%s206_s0] sm:$0xff]   ;;  %v141_v1 = vld [vmem:[%s206_s0 + $0x8] sm:$0xff]  }
   0x2   :  { %v135_v2 = vunpack.c.l.bf16 %v134_v0  ;;  %v139_v3 = vunpack.c.l.bf16 %v141_v1  ;;  %v136_v4 = vunpack.c.h.bf16 %v134_v0  ;;  %v140_v5 = vunpack.c.h.bf16 %v141_v1  ;;  %v123_v43 = vld [vmem:[%s207_s1] ss:$0 sm:$0xff] }
   0x3   :  { %v124_v45 = vld [vmem:[%s208_s2] ss:$0 sm:$0xff] }
   0x4   :  { %v23_v6 = vsel %vm22_vm0, %v135_v2, 0.0  ;;  %v29_v7 = vsel %vm22_vm0, %v139_v3, 0.0  ;;  %v26_v8 = vsel %vm22_vm0, %v136_v4, 0.0  ;;  %v32_v9 = vsel %vm22_vm0, %v140_v5, 0.0 }
   0x5   :  { %24 = vadd.xlane.f32.xlu0 %v23_v6  ;;  %30 = vadd.xlane.f32.xlu1 %v29_v7 }
   0x9   :  { %27 = vadd.xlane.f32.xlu0 %v26_v8  ;;  %33 = vadd.xlane.f32.xlu1 %v32_v9 }
  0x92   :  { %v25_v10 = vpop.xlane.xlu0 %24  ;;  %v31_v11 = vpop.xlane.xlu1 %30 }
  0x93   :  { %v36_v12 = vmul.f32 0.03125, %v25_v10  ;;  %v38_v13 = vmul.f32 0.03125, %v31_v11 }
  0x95   :  { %v40_v14 = vsub.f32 %v135_v2, %v36_v12  ;;  %v42_v15 = vsub.f32 %v139_v3, %v38_v13 }
  0x96   :  { %v28_v16 = vpop.xlane.xlu0 %27  ;;  %v34_v17 = vpop.xlane.xlu1 %33 }
  0x97   :  { %v37_v18 = vmul.f32 0.03125, %v28_v16  ;;  %v39_v19 = vmul.f32 0.03125, %v34_v17  ;;  %v44_v20 = vmul.f32 %v40_v14, %v40_v14  ;;  %v46_v21 = vmul.f32 %v42_v15, %v42_v15 }
  0x99   :  { %v41_v22 = vsub.f32 %v136_v4, %v37_v18  ;;  %v43_v23 = vsub.f32 %v140_v5, %v39_v19  ;;  %v48_v24 = vsel %vm22_vm0, %v44_v20, 0.0  ;;  %v54_v25 = vsel %vm22_vm0, %v46_v21, 0.0 }
  0x9a   :  { %49 = vadd.xlane.f32.xlu0 %v48_v24 }
  0x9b   :  { %v45_v26 = vmul.f32 %v41_v22, %v41_v22  ;;  %v47_v27 = vmul.f32 %v43_v23, %v43_v23 }
  0x9d   :  { %v51_v28 = vsel %vm22_vm0, %v45_v26, 0.0  ;;  %v57_v29 = vsel %vm22_vm0, %v47_v27, 0.0 }
  0x9e   :  { %55 = vadd.xlane.f32.xlu0 %v54_v25  ;;  %52 = vadd.xlane.f32.xlu1 %v51_v28 }
  0xa2   :  { %58 = vadd.xlane.f32.xlu1 %v57_v29 }
 0x127   :  { %v50_v30 = vpop.xlane.xlu0 %49 }
 0x128   :  { %v60_v31 = vmul.f32 0.03125, %v50_v30 }
 0x12a   :  { %v64_v32 = vadd.f32 1e-05, %v60_v31 }
 0x12b   :  { %v53_v33 = vpop.xlane.xlu1 %52  ;;  %v56_v34 = vpop.xlane.xlu0 %55 }
 0x12c   :  { %142 = vrsqrt.f32 %v64_v32  ;;  %v61_v35 = vmul.f32 0.03125, %v53_v33  ;;  %v62_v36 = vmul.f32 0.03125, %v56_v34 }
 0x12e   :  { %v65_v37 = vadd.f32 1e-05, %v61_v35  ;;  %v66_v38 = vadd.f32 1e-05, %v62_v36 }
 0x12f   :  { %v59_v39 = vpop.xlane.xlu1 %58 }
 0x130   :  { %144 = vrsqrt.f32 %v65_v37  ;;  %v63_v40 = vmul.f32 0.03125, %v59_v39 }
 0x131   :  { %146 = vrsqrt.f32 %v66_v38 }
 0x132   :  { %v67_v41 = vadd.f32 1e-05, %v63_v40 }
 0x134   :  { %148 = vrsqrt.f32 %v67_v41 }
 0x136   :  { %v143_v42 = vpop.eup %142 }
 0x137   :  { %v72_v44 = vmul.f32 %v143_v42, %v40_v14 }
 0x139   :  { %v83_v46 = vmul.f32 %v123_v43, %v72_v44 }
 0x13a   :  { %v145_v47 = vpop.eup %144 }
 0x13b   :  { %v147_v48 = vpop.eup %146  ;;  %v94_v49 = vadd.f32 %v124_v45, %v83_v46  ;;  %v73_v50 = vmul.f32 %v145_v47, %v41_v22 }
 0x13c   :  { %v74_v51 = vmul.f32 %v147_v48, %v42_v15 }
 0x13d   :  { %v129_v52 = vpack.c.bf16 %v94_v49, %v94_v49  ;;  %v84_v53 = vmul.f32 %v123_v43, %v73_v50 }
 0x13e   :  { %v149_v54 = vpop.eup %148  ;;  %v85_v55 = vmul.f32 %v123_v43, %v74_v51 }
 0x13f   :  { %115 = vst.msk [vmem:[%s209_s3] sm:$0xf] %vm114_vm1, %v129_v52  ;;  %v95_v56 = vadd.f32 %v124_v45, %v84_v53  ;;  %v75_v57 = vmul.f32 %v149_v54, %v43_v23 }
 0x140   :  { %v96_v58 = vadd.f32 %v124_v45, %v85_v55 }
 0x141   :  { %v130_v59 = vpack.c.bf16 %v95_v56, %v95_v56  ;;  %v86_v60 = vmul.f32 %v123_v43, %v75_v57 }
 0x142   :  { %v131_v61 = vpack.c.bf16 %v96_v58, %v96_v58 }
 0x143   :  { %116 = vst.msk [vmem:[%s209_s3 + $0x4] sm:$0xf] %vm114_vm1, %v130_v59  ;;  %v97_v62 = vadd.f32 %v124_v45, %v86_v60 }
 0x144   :  { %117 = vst.msk [vmem:[%s209_s3 + $0x8] sm:$0xf] %vm114_vm1, %v131_v61 }
 0x145   :  { %v132_v63 = vpack.c.bf16 %v97_v62, %v97_v62 }
 0x147   :  { %118 = vst.msk [vmem:[%s209_s3 + $0xc] sm:$0xf] %vm114_vm1, %v132_v63 }

// kernel: simple_vit_ae_forward.35
= control target key start
LH: loop header
LB: loop body
LE: loop exit
PB: predicated region body
PF: predicated region fallthrough
CT: control target
= control target key end

     0   :  { %vm19_vm0 = vcmask 785408   ;;  %v151_v0 = vmov 0.0   ;;  %vm152_vm1 = vmmov 0   ;;  %vm47_vm2 = vcmask 261120   ;;  %s195_s1 = inlined_call_operand.vmem [shape: bf16[32,96], index: 1, kind: input, shape index: {}]   ;;  %s196_s0 = inlined_call_operand.vmem [shape: bf16[16,32], index: 0, kind: input, shape index: {}]   ;;  %s197_s2 = inlined_call_operand.vmem [shape: f32[1,96], index: 2, kind: input, shape index: {}]   ;;  %s198_s3 = inlined_call_operand.vmem [shape: bf16[16,96], index: 3, kind: output, shape index: {}]  }
   0x1   :  { %138 = vmatprep.subr.bf16.mxu0 %v151_v0  ;;  %v148_v1 = vld [vmem:[%s195_s1] sm:$0xff]   ;;  %142 = vmatprep.mubr.msk.bf16.mxu0 %vm152_vm1, %v151_v0  ;;  %20 = vst.msk [vmem:[#allocation2] sm:$0xff] %vm19_vm0, %v151_v0  ;;  %21 = vst.msk [vmem:[#allocation2 + $0x8] sm:$0xff] %vm19_vm0, %v151_v0  ;;  %v149_v2 = vld [vmem:[%s195_s1 + $0x8] sm:$0xff]   ;;  %vm119_vm3 = vcmask 781312  }
   0x2   :  { %139 = vmatpush3.bf16.msra.mxu0 %v148_v1  ;;  %v150_v3 = vld [vmem:[%s196_s0] sm:$0xff]  }
   0x3   :  { %140 = vmatprep.subr.bf16.mxu0 %v151_v0  ;;  %v130_v12 = vld [vmem:[%s197_s2] ss:$0 sm:$0xff] }
   0x6   :  { %141 = vmatpush3.bf16.msra.mxu0 %v149_v2 }
   0x8   :  { %v22_v4 = vld [vmem:[#allocation2] sm:$0xff]  ;;  %v23_v6 = vld [vmem:[#allocation2 + $0x8] sm:$0xff] }
   0x9   :  { %143 = vmatmul.mubr.msk.bf16.vlgmr.msra.gmra.mrb[0].mxu0 %vm47_vm2, %v150_v3 }
  0xdc   :  { %v85_v5 = vpop.f32.mrb[0].mxu0 }
  0xdd   :  { %v92_v7 = vadd.f32 %v85_v5, %v22_v4  ;;  %v144_v8 = vpop.f32.mrb[1].mxu0 }
  0xde   :  { %v88_v9 = vpop.f32.mrb[2].mxu0 }
  0xdf   :  { %95 = vst.msk [vmem:[#allocation2] sm:$0xff] %vm19_vm0, %v92_v7  ;;  %v93_v10 = vadd.f32 %v88_v9, %v23_v6  ;;  %v145_v11 = vpop.f32.mrb[3].mxu0 }
  0xe1   :  { %96 = vst.msk [vmem:[#allocation2 + $0x8] sm:$0xff] %vm19_vm0, %v93_v10 }
  0xe6   :  { %v100_v13 = vld [vmem:[#allocation2] sm:$0xff] }
  0xe7   :  { %v109_v14 = vadd.f32 %v130_v12, %v100_v13 }
  0xe8   :  { %v101_v15 = vld [vmem:[#allocation2 + $0x8] sm:$0xff] }
  0xe9   :  { %v133_v16 = vpack.c.bf16 %v109_v14, %v109_v14  ;;  %v110_v17 = vadd.f32 %v130_v12, %v101_v15 }
  0xeb   :  { %120 = vst.msk [vmem:[%s198_s3] sm:$0xf] %vm119_vm3, %v133_v16  ;;  %v134_v18 = vpack.c.bf16 %v110_v17, %v110_v17 }
  0xed   :  { %121 = vst.msk [vmem:[%s198_s3 + $0x4] sm:$0xf] %vm119_vm3, %v134_v18 }

// kernel: simple_vit_ae_forward.36
= control target key start
LH: loop header
LB: loop body
LE: loop exit
PB: predicated region body
PF: predicated region fallthrough
CT: control target
= control target key end

     0   :  { %s791_s6 = smov 0   ;;  %s880_s0 = inlined_call_operand.vmem [shape: bf16[2,8,96], index: 0, kind: input, shape index: {}]   ;;  %s881_s1 = inlined_call_operand.vmem [shape: bf16[2,8,32], index: 1, kind: output, shape index: {}]  }
   0x1 LB: > { %s634_s7 = sadd.s32 4294967295, %s763_s6   ;;  %p638_p0 = scmp.ge.s32.totalorder %s763_s6, 1  ;;  %s763_s6 = sphi %s791_s6, %s11_s6  }
   0x2   : > { %p86_p1 = scmp.lt.s32.totalorder %s763_s6, 3 }
   0x4   : > { %p87_p2 = pnand %p638_p0, %p86_p1 }
   0x5   : > { %p104_p3 = scmp.lt.s32.totalorder (!%p87_p2), %s634_s7, 1  ;;  %v765_v0 = vmov (!%p87_p2), 0.0   ;;  %vm766_vm0 = vmmov (!%p87_p2), 0   ;;  %s767_s12 = smov (!%p87_p2), 96   ;;  %vm119_vm1 = vcmask (!%p87_p2), 64512   ;;  %vm184_vm2 = vcmask (!%p87_p2), 1043456  }
   0x6   : > { %90 = sbr.rel (%p87_p2) target bundleno = 1602 (0x642), region = 24  ;;  %668 = vmatprep.subr.bf16.mxu0 (!%p87_p2), %v765_v0  ;;  %670 = vmatprep.mubr.msk.bf16.mxu0 (!%p87_p2), %vm766_vm0, %v765_v0  ;;  %s768_s13 = smov (!%p87_p2), 64   ;;  %vm574_vm3 = vcmask (!%p87_p2), 130048   ;;  %vm576_vm4 = vcmask (!%p87_p2), 195584   ;;  %vm579_vm5 = vcmask (!%p87_p2), 257024  }
   0x7   : > { %674 = vmatprep.subr.bf16.mxu1 (!%p87_p2), %v765_v0  ;;  %676 = vmatprep.mubr.msk.bf16.mxu1 (!%p87_p2), %vm766_vm0, %v765_v0  ;;  %s769_s14 = smov (!%p87_p2), 88   ;;  %s770_s15 = smov (!%p87_p2), 72  }
   0x8   : > { %s771_s16 = smov (!%p87_p2), 120   ;;  %s772_s17 = smov (!%p87_p2), 80  }
   0x9   : > { %s773_s18 = smov (!%p87_p2), 112   ;;  %s774_s19 = smov (!%p87_p2), 104  }
   0xa   : > { %s775_s20 = smov (!%p87_p2), 56   ;;  %s776_s21 = smov (!%p87_p2), 48  }
   0xb   : > { %s777_s22 = smov (!%p87_p2), 40   ;;  %s778_s23 = smov (!%p87_p2), 8  }
   0xc   : > { %s779_s24 = smov (!%p87_p2), 16   ;;  %s780_s25 = smov (!%p87_p2), 24  }
   0xd   : > { %s883_s7 = smov (!%p104_p3, %s634_s7), 1 }
   0xe   : > { %s639_s8 = sshll.u32 %s883_s7, 2 }
   0xf   : > { %s107_s11 = scalar_lea.vmem %s880_s0, %s639_s8  ;;  %s111_s28 = scalar_lea.vmem %s881_s1, %s639_s8 }
  0x10   : > { %v113_v1 = vld [vmem:[%s107_s11] sm:$0xf] }
  0x11   : > { %v813_v2 = vcombine.low %v113_v1, %v113_v1 }
  0x13   : > { %117 = vrot.lane.b32.xlu0 %v813_v2, %s767_s12  ;;  %179 = vrot.lane.b32.xlu1 %v813_v2, %s768_s13 }
  0x17   : > { %230 = vrot.lane.b32.xlu1 %v813_v2, %s769_s14 }
  0x85   : > { %v118_v3 = vpop.permute.xlu0 %117  ;;  %v180_v11 = vpop.permute.xlu1 %179 }
  0x86   : > { %v124_v4 = vsel %vm119_vm1, %v118_v3, 0  ;;  %v186_v12 = vsel %vm184_vm2, %v180_v11, 0 }
  0x87   : > { %669 = vmatpush3.bf16.xpose.msra.mxu0 %v124_v4  ;;  %675 = vmatpush3.bf16.msra.mxu1 %v186_v12 }
  0x88   : > { %686 = vmatprep.subr.bf16.mxu0 %v765_v0  ;;  %680 = vmatprep.subr.bf16.mxu1 %v765_v0 }
  0x89   : > { %v231_v18 = vpop.permute.xlu1 %230 }
  0x8a   : > { %v236_v24 = vsel %vm119_vm1, %v231_v18, 0 }
  0x8e   : > { %671 = vmatmul.mubr.msk.bf16.vlgmr.msra.gmra.mrb[0].mxu0 %vm119_vm1, %v113_v1 }
  0x8f   : > { %688 = vmatprep.mubr.msk.bf16.mxu0 %vm766_vm0, %v765_v0 }
 0x161   : > { %v160_v5 = vpop.f32.mrb[0].mxu0 }
 0x162   : > { %v166_v6 = vmul.f32 0.35355338, %v160_v5  ;;  %v672_v7 = vpop.f32.mrb[1].mxu0 }
 0x163   : > { %v163_v8 = vpop.f32.mrb[2].mxu0 }
 0x164   : > { %v673_v9 = vpop.f32.mrb[3].mxu0  ;;  %v167_v10 = vsel %vm119_vm1, %v166_v6, -inf }
 0x165   : > { %168 = vmax.xlane.f32.xlu0 %v167_v10 }
 0x17b   : > { %452 = vrot.lane.b32.xlu0 %v813_v2, %s770_s15 }
 0x1f2   : > { %v169_v13 = vpop.xlane.xlu0 %168 }
 0x1f3   : > { %v170_v14 = vsub.f32 %v166_v6, %v169_v13 }
 0x1f5   : > { %v171_v15 = vmul.f32 1.442695, %v170_v14 }
 0x1f6   : > { %v453_v27 = vpop.permute.xlu0 %452 }
 0x1f7   : > { %741 = vpow2.f32 %v171_v15  ;;  %v458_v29 = vsel %vm119_vm1, %v453_v27, 0 }
 0x201   : > { %v742_v16 = vpop.eup %741 }
 0x202   : > { %v173_v17 = vsel %vm119_vm1, %v742_v16, 0.0 }
 0x203   : > { %174 = vadd.xlane.f32.xlu1 %v173_v17 }
 0x214   : > { %228 = vrot.lane.b32.xlu1 %v813_v2, %s771_s16 }
 0x218   : > { %341 = vrot.lane.b32.xlu1 %v813_v2, %s772_s17 }
 0x21c   : > { %339 = vrot.lane.b32.xlu1 %v813_v2, %s773_s18 }
 0x220   : > { %450 = vrot.lane.b32.xlu1 %v813_v2, %s774_s19 }
 0x290   : > { %v175_v19 = vpop.xlane.xlu1 %174 }
 0x291   : > { %743 = vrcp.f32 %v175_v19 }
 0x294   : > { %v229_v22 = vpop.permute.xlu1 %228 }
 0x298   : > { %v342_v25 = vpop.permute.xlu1 %341 }
 0x299   : > { %v347_v26 = vsel %vm119_vm1, %v342_v25, 0 }
 0x29b   : > { %v744_v20 = vpop.eup %743 }
 0x29c   : > { %v177_v21 = vmul.f32 %v744_v20, %v742_v16  ;;  %v340_v28 = vpop.permute.xlu1 %339 }
 0x29e   : > { %v178_v23 = vpack.c.bf16 %v177_v21, %v177_v21 }
 0x2a0   : > { %677 = vmatmul.mubr.msk.bf16.vlgmr.msra.gmra.mrb[0].mxu1 %vm119_vm1, %v178_v23  ;;  %v451_v30 = vpop.permute.xlu1 %450 }
 0x2a1   : > { %681 = vmatpush3.bf16.xpose.msra.mxu1 %v236_v24  ;;  %682 = vmatprep.mubr.msk.bf16.mxu1 %vm766_vm0, %v765_v0 }
 0x2a2   : > { %692 = vmatprep.subr.bf16.mxu1 %v765_v0 }
 0x2a8   : > { %683 = vmatmul.mubr.msk.bf16.vlgmr.msra.gmra.mrb[4].mxu1 %vm119_vm1, %v229_v22 }
 0x2a9   : > { %693 = vmatpush3.bf16.xpose.msra.mxu1 %v347_v26  ;;  %694 = vmatprep.mubr.msk.bf16.mxu1 %vm766_vm0, %v765_v0 }
 0x2aa   : > { %704 = vmatprep.subr.bf16.mxu1 %v765_v0 }
 0x2b0   : > { %695 = vmatmul.mubr.msk.bf16.vlgmr.msra.gmra.mrb[8].mxu1 %vm119_vm1, %v340_v28 }
 0x2b1   : > { %705 = vmatpush3.bf16.xpose.msra.mxu1 %v458_v29  ;;  %706 = vmatprep.mubr.msk.bf16.mxu1 %vm766_vm0, %v765_v0 }
 0x2b8   : > { %707 = vmatmul.mubr.msk.bf16.vlgmr.msra.gmra.mrb[12].mxu1 %vm119_vm1, %v451_v30 }
 0x373   : > { %v847_v31 = vpop.f32.mrb[0].mxu1 }
 0x374   : > { %v678_v32 = vpop.f32.mrb[1].mxu1 }
 0x375   : > { %v225_v33 = vpop.f32.mrb[2].mxu1 }
 0x376   : > { %v679_v34 = vpop.f32.mrb[3].mxu1 }
 0x37b   : > { %v272_v35 = vpop.f32.mrb[4].mxu1 }
 0x37c   : > { %v278_v36 = vmul.f32 0.35355338, %v272_v35  ;;  %v684_v37 = vpop.f32.mrb[5].mxu1 }
 0x37d   : > { %v275_v38 = vpop.f32.mrb[6].mxu1 }
 0x37e   : > { %v685_v39 = vpop.f32.mrb[7].mxu1  ;;  %v279_v40 = vsel %vm119_vm1, %v278_v36, -inf }
 0x37f   : > { %280 = vmax.xlane.f32.xlu1 %v279_v40 }
 0x383   : > { %v383_v41 = vpop.f32.mrb[8].mxu1 }
 0x384   : > { %v389_v42 = vmul.f32 0.35355338, %v383_v41  ;;  %v696_v43 = vpop.f32.mrb[9].mxu1 }
 0x385   : > { %v386_v44 = vpop.f32.mrb[10].mxu1 }
 0x386   : > { %v390_v45 = vsel %vm119_vm1, %v389_v42, -inf  ;;  %v697_v46 = vpop.f32.mrb[11].mxu1 }
 0x387   : > { %391 = vmax.xlane.f32.xlu0 %v390_v45 }
 0x38b   : > { %v494_v47 = vpop.f32.mrb[12].mxu1 }
 0x38c   : > { %v500_v48 = vmul.f32 0.35355338, %v494_v47  ;;  %v708_v49 = vpop.f32.mrb[13].mxu1 }
 0x38d   : > { %v497_v50 = vpop.f32.mrb[14].mxu1 }
 0x38e   : > { %v501_v51 = vsel %vm119_vm1, %v500_v48, -inf  ;;  %v709_v52 = vpop.f32.mrb[15].mxu1 }
 0x38f   : > { %502 = vmax.xlane.f32.xlu1 %v501_v51 }
 0x40c   : > { %v281_v53 = vpop.xlane.xlu1 %280 }
 0x40d   : > { %v282_v54 = vsub.f32 %v278_v36, %v281_v53 }
 0x40f   : > { %v283_v55 = vmul.f32 1.442695, %v282_v54 }
 0x411   : > { %745 = vpow2.f32 %v283_v55 }
 0x414   : > { %v392_v63 = vpop.xlane.xlu0 %391 }
 0x415   : > { %v393_v1 = vsub.f32 %v389_v42, %v392_v63 }
 0x417   : > { %v394_v3 = vmul.f32 1.442695, %v393_v1 }
 0x41b   : > { %v746_v56 = vpop.eup %745 }
 0x41c   : > { %v503_v57 = vpop.xlane.xlu1 %502  ;;  %v285_v58 = vsel %vm119_vm1, %v746_v56, 0.0 }
 0x41d   : > { %v504_v59 = vsub.f32 %v500_v48, %v503_v57  ;;  %286 = vadd.xlane.f32.xlu1 %v285_v58 }
 0x41f   : > { %v505_v60 = vmul.f32 1.442695, %v504_v59 }
 0x421   : > { %747 = vpow2.f32 %v505_v60 }
 0x422   : > { %749 = vpow2.f32 %v394_v3 }
 0x42b   : > { %v748_v61 = vpop.eup %747 }
 0x42c   : > { %v507_v62 = vsel %vm119_vm1, %v748_v61, 0.0  ;;  %v750_v4 = vpop.eup %749 }
 0x42d   : > { %508 = vadd.xlane.f32.xlu0 %v507_v62  ;;  %v396_v5 = vsel %vm119_vm1, %v750_v4, 0.0 }
 0x42e   : > { %291 = vrot.lane.b32.xlu1 %v813_v2, %s775_s20 }
 0x443   : > { %402 = vrot.lane.b32.xlu0 %v813_v2, %s776_s21 }
 0x452   : > { %397 = vadd.xlane.f32.xlu1 %v396_v5 }
 0x463   : > { %513 = vrot.lane.b32.xlu1 %v813_v2, %s777_s22 }
 0x4aa   : > { %v287_v6 = vpop.xlane.xlu1 %286 }
 0x4ab   : > { %751 = vrcp.f32 %v287_v6 }
 0x4ae   : > { %v292_v7 = vpop.permute.xlu1 %291 }
 0x4af   : > { %v297_v8 = vsel %vm184_vm2, %v292_v7, 0 }
 0x4b0   : > { %687 = vmatpush3.bf16.msra.mxu0 %v297_v8 }
 0x4b1   : > { %698 = vmatprep.subr.bf16.mxu0 %v765_v0 }
 0x4b5   : > { %v752_v9 = vpop.eup %751 }
 0x4b6   : > { %v289_v10 = vmul.f32 %v752_v9, %v746_v56 }
 0x4b8   : > { %v290_v11 = vpack.c.bf16 %v289_v10, %v289_v10 }
 0x4ba   : > { %689 = vmatmul.mubr.msk.bf16.vlgmr.msra.gmra.mrb[4].mxu0 %vm119_vm1, %v290_v11  ;;  %v509_v12 = vpop.xlane.xlu0 %508 }
 0x4bb   : > { %700 = vmatprep.mubr.msk.bf16.mxu0 %vm766_vm0, %v765_v0 }
 0x4be   : > { %v403_v13 = vpop.permute.xlu0 %402 }
 0x4bf   : > { %v408_v2 = vsel %vm184_vm2, %v403_v13, 0 }
 0x4c0   : > { %699 = vmatpush3.bf16.msra.mxu0 %v408_v2 }
 0x4c1   : > { %710 = vmatprep.subr.bf16.mxu0 %v765_v0 }
 0x4df   : > { %v398_v14 = vpop.xlane.xlu1 %397 }
 0x4e0   : > { %753 = vrcp.f32 %v398_v14 }
 0x4e1   : > { %755 = vrcp.f32 %v509_v12 }
 0x4e3   : > { %v514_v16 = vpop.permute.xlu1 %513 }
 0x4e4   : > { %v519_v18 = vsel %vm184_vm2, %v514_v16, 0 }
 0x4ea   : > { %v754_v15 = vpop.eup %753 }
 0x4eb   : > { %v400_v17 = vmul.f32 %v754_v15, %v750_v4  ;;  %v756_v20 = vpop.eup %755 }
 0x4ec   : > { %v511_v21 = vmul.f32 %v756_v20, %v748_v61 }
 0x4ed   : > { %v401_v19 = vpack.c.bf16 %v400_v17, %v400_v17 }
 0x4ee   : > { %v512_v22 = vpack.c.bf16 %v511_v21, %v511_v21 }
 0x4ef   : > { %701 = vmatmul.mubr.msk.bf16.vlgmr.msra.gmra.mrb[8].mxu0 %vm119_vm1, %v401_v19 }
 0x4f0   : > { %711 = vmatpush3.bf16.msra.mxu0 %v519_v18  ;;  %712 = vmatprep.mubr.msk.bf16.mxu0 %vm766_vm0, %v765_v0 }
 0x4f7   : > { %713 = vmatmul.mubr.msk.bf16.vlgmr.msra.gmra.mrb[12].mxu0 %vm119_vm1, %v512_v22 }
 0x58d   : > { %v333_v23 = vpop.f32.mrb[4].mxu0 }
 0x58e   : > { %562 = vrot.lane.b32.xlu1 %v333_v23, %s778_s23  ;;  %v690_v24 = vpop.f32.mrb[5].mxu0 }
 0x58f   : > { %v336_v25 = vpop.f32.mrb[6].mxu0 }
 0x590   : > { %v691_v26 = vpop.f32.mrb[7].mxu0 }
 0x5c2   : > { %v444_v27 = vpop.f32.mrb[8].mxu0 }
 0x5c3   : > { %566 = vrot.lane.b32.xlu0 %v444_v27, %s779_s24  ;;  %v702_v28 = vpop.f32.mrb[9].mxu0 }
 0x5c4   : > { %v447_v29 = vpop.f32.mrb[10].mxu0 }
 0x5c5   : > { %v703_v30 = vpop.f32.mrb[11].mxu0 }
 0x5ca   : > { %v555_v32 = vpop.f32.mrb[12].mxu0 }
 0x5cb   : > { %570 = vrot.lane.b32.xlu1 %v555_v32, %s780_s25  ;;  %v714_v0 = vpop.f32.mrb[13].mxu0 }
 0x5cc   : > { %v558_v33 = vpop.f32.mrb[14].mxu0 }
 0x5cd   : > { %v715_v34 = vpop.f32.mrb[15].mxu0 }
 0x600   : > { %v563_v35 = vpop.permute.xlu1 %562 }
 0x601   : > { %v573_v37 = vsel %vm119_vm1, %v847_v31, %v563_v35 }
 0x635   : > { %v567_v36 = vpop.permute.xlu0 %566 }
 0x636   : > { %v575_v38 = vsel %vm574_vm3, %v573_v37, %v567_v36 }
 0x63d   : > { %v571_v39 = vpop.permute.xlu1 %570 }
 0x63e   : > { %v577_v40 = vsel %vm576_vm4, %v575_v38, %v571_v39 }
 0x63f   : > { %v578_v41 = vpack.c.bf16 %v577_v40, %v577_v40 }
 0x641   : > { %580 = vst.msk [vmem:[%s111_s28] sm:$0xf] %vm579_vm5, %v578_v41 }
 0x642 PF: > { %s11_s6 = sadd.s32 1, %s763_s6  }
 0x643   : > { %p8_p4 = scmp.ge.s32.totalorder %s11_s6, 4  }
 0x645   :  { %10 = sbr.rel (!%p8_p4) target bundleno = 1 (0x1), region = 54 }

// kernel: simple_vit_ae_forward.37
= control target key start
LH: loop header
LB: loop body
LE: loop exit
PB: predicated region body
PF: predicated region fallthrough
CT: control target
= control target key end

     0   :  { %vm19_vm0 = vcmask 261120   ;;  %v150_v0 = vmov 0.0   ;;  %vm151_vm1 = vmmov 0   ;;  %vm118_vm2 = vcmask 257024   ;;  %s195_s1 = inlined_call_operand.vmem [shape: bf16[32,32], index: 1, kind: input, shape index: {}]   ;;  %s196_s0 = inlined_call_operand.vmem [shape: bf16[16,32], index: 0, kind: input, shape index: {}]   ;;  %s197_s2 = inlined_call_operand.vmem [shape: f32[1,32], index: 2, kind: input, shape index: {}]   ;;  %s198_s3 = inlined_call_operand.vmem [shape: bf16[16,32], index: 3, kind: output, shape index: {}]  }
   0x1   :  { %137 = vmatprep.subr.bf16.mxu0 %v150_v0  ;;  %v147_v1 = vld [vmem:[%s195_s1] sm:$0xff]   ;;  %141 = vmatprep.mubr.msk.bf16.mxu0 %vm151_vm1, %v150_v0  ;;  %20 = vst.msk [vmem:[#allocation2] sm:$0xff] %vm19_vm0, %v150_v0  ;;  %21 = vst.msk [vmem:[#allocation2 + $0x8] sm:$0xff] %vm19_vm0, %v150_v0  ;;  %v148_v2 = vld [vmem:[%s195_s1 + $0x8] sm:$0xff]  }
   0x2   :  { %138 = vmatpush3.bf16.msra.mxu0 %v147_v1  ;;  %v149_v3 = vld [vmem:[%s196_s0] sm:$0xff]  }
   0x3   :  { %139 = vmatprep.subr.bf16.mxu0 %v150_v0  ;;  %v129_v12 = vld [vmem:[%s197_s2] ss:$0 sm:$0xff] }
   0x6   :  { %140 = vmatpush3.bf16.msra.mxu0 %v148_v2 }
   0x8   :  { %v22_v4 = vld [vmem:[#allocation2] sm:$0xff]  ;;  %v23_v6 = vld [vmem:[#allocation2 + $0x8] sm:$0xff] }
   0x9   :  { %142 = vmatmul.mubr.msk.bf16.vlgmr.msra.gmra.mrb[0].mxu0 %vm19_vm0, %v149_v3 }
  0xdc   :  { %v85_v5 = vpop.f32.mrb[0].mxu0 }
  0xdd   :  { %v92_v7 = vadd.f32 %v85_v5, %v22_v4  ;;  %v143_v8 = vpop.f32.mrb[1].mxu0 }
  0xde   :  { %v88_v9 = vpop.f32.mrb[2].mxu0 }
  0xdf   :  { %94 = vst.msk [vmem:[#allocation2] sm:$0xff] %vm19_vm0, %v92_v7  ;;  %v93_v10 = vadd.f32 %v88_v9, %v23_v6  ;;  %v144_v11 = vpop.f32.mrb[3].mxu0 }
  0xe1   :  { %95 = vst.msk [vmem:[#allocation2 + $0x8] sm:$0xff] %vm19_vm0, %v93_v10 }
  0xe6   :  { %v99_v13 = vld [vmem:[#allocation2] sm:$0xff] }
  0xe7   :  { %v108_v14 = vadd.f32 %v129_v12, %v99_v13 }
  0xe8   :  { %v100_v15 = vld [vmem:[#allocation2 + $0x8] sm:$0xff] }
  0xe9   :  { %v132_v16 = vpack.c.bf16 %v108_v14, %v108_v14  ;;  %v109_v17 = vadd.f32 %v129_v12, %v100_v15 }
  0xeb   :  { %119 = vst.msk [vmem:[%s198_s3] sm:$0xf] %vm118_vm2, %v132_v16  ;;  %v133_v18 = vpack.c.bf16 %v109_v17, %v109_v17 }
  0xed   :  { %120 = vst.msk [vmem:[%s198_s3 + $0x4] sm:$0xf] %vm118_vm2, %v133_v18 }

// kernel: simple_vit_ae_forward.38
= control target key start
LH: loop header
LB: loop body
LE: loop exit
PB: predicated region body
PF: predicated region fallthrough
CT: control target
= control target key end

     0   :  { %vm27_vm0 = vcmask 261120   ;;  %vm81_vm1 = vcmask 257024   ;;  %s153_s0 = inlined_call_operand.vmem [shape: bf16[16,32], index: 0, kind: input, shape index: {}]   ;;  %s154_s1 = inlined_call_operand.vmem [shape: bf16[16,32], index: 1, kind: input, shape index: {}]   ;;  %s155_s2 = inlined_call_operand.vmem [shape: f32[1,32], index: 2, kind: input, shape index: {}]   ;;  %s156_s3 = inlined_call_operand.vmem [shape: f32[1,32], index: 3, kind: input, shape index: {}]   ;;  %s157_s4 = inlined_call_operand.vmem [shape: bf16[16,32], index: 4, kind: output, shape index: {}]  }
   0x1   :  { %v95_v0 = vld [vmem:[%s153_s0] sm:$0xff]  }
   0x2   :  { %v99_v1 = vld [vmem:[%s154_s1] sm:$0xff]   ;;  %v96_v2 = vunpack.c.l.bf16 %v95_v0  ;;  %v97_v4 = vunpack.c.h.bf16 %v95_v0 }
   0x3   :  { %v100_v3 = vunpack.c.l.bf16 %v99_v1  ;;  %v101_v5 = vunpack.c.h.bf16 %v99_v1  ;;  %v88_v27 = vld [vmem:[%s155_s2] ss:$0 sm:$0xff] }
   0x4   :  { %v89_v29 = vld [vmem:[%s156_s3] ss:$0 sm:$0xff] }
   0x5   :  { %v25_v6 = vadd.f32 %v100_v3, %v96_v2  ;;  %v26_v7 = vadd.f32 %v101_v5, %v97_v4 }
   0x7   :  { %v28_v8 = vsel %vm27_vm0, %v25_v6, 0.0  ;;  %v31_v9 = vsel %vm27_vm0, %v26_v7, 0.0 }
   0x8   :  { %29 = vadd.xlane.f32.xlu0 %v28_v8 }
   0xc   :  { %32 = vadd.xlane.f32.xlu0 %v31_v9 }
  0x95   :  { %v30_v10 = vpop.xlane.xlu0 %29 }
  0x96   :  { %v35_v11 = vmul.f32 0.03125, %v30_v10 }
  0x98   :  { %v37_v12 = vsub.f32 %v25_v6, %v35_v11 }
  0x99   :  { %v33_v13 = vpop.xlane.xlu0 %32 }
  0x9a   :  { %v36_v14 = vmul.f32 0.03125, %v33_v13  ;;  %v39_v15 = vmul.f32 %v37_v12, %v37_v12 }
  0x9c   :  { %v38_v16 = vsub.f32 %v26_v7, %v36_v14  ;;  %v41_v17 = vsel %vm27_vm0, %v39_v15, 0.0 }
  0x9d   :  { %42 = vadd.xlane.f32.xlu1 %v41_v17 }
  0x9e   :  { %v40_v18 = vmul.f32 %v38_v16, %v38_v16 }
  0xa0   :  { %v44_v19 = vsel %vm27_vm0, %v40_v18, 0.0 }
  0xa1   :  { %45 = vadd.xlane.f32.xlu1 %v44_v19 }
 0x12a   :  { %v43_v20 = vpop.xlane.xlu1 %42 }
 0x12b   :  { %v47_v21 = vmul.f32 0.03125, %v43_v20 }
 0x12d   :  { %v49_v22 = vadd.f32 1e-05, %v47_v21 }
 0x12e   :  { %v46_v23 = vpop.xlane.xlu1 %45 }
 0x12f   :  { %102 = vrsqrt.f32 %v49_v22  ;;  %v48_v24 = vmul.f32 0.03125, %v46_v23 }
 0x131   :  { %v50_v25 = vadd.f32 1e-05, %v48_v24 }
 0x133   :  { %104 = vrsqrt.f32 %v50_v25 }
 0x139   :  { %v103_v26 = vpop.eup %102 }
 0x13a   :  { %v53_v28 = vmul.f32 %v103_v26, %v37_v12 }
 0x13c   :  { %v62_v30 = vmul.f32 %v88_v27, %v53_v28 }
 0x13d   :  { %v105_v31 = vpop.eup %104 }
 0x13e   :  { %v71_v32 = vadd.f32 %v89_v29, %v62_v30  ;;  %v54_v33 = vmul.f32 %v105_v31, %v38_v16 }
 0x140   :  { %v92_v34 = vpack.c.bf16 %v71_v32, %v71_v32  ;;  %v63_v35 = vmul.f32 %v88_v27, %v54_v33 }
 0x142   :  { %82 = vst.msk [vmem:[%s157_s4] sm:$0xf] %vm81_vm1, %v92_v34  ;;  %v72_v36 = vadd.f32 %v89_v29, %v63_v35 }
 0x144   :  { %v93_v37 = vpack.c.bf16 %v72_v36, %v72_v36 }
 0x146   :  { %83 = vst.msk [vmem:[%s157_s4 + $0x4] sm:$0xf] %vm81_vm1, %v93_v37 }

// kernel: simple_vit_ae_forward.40
= control target key start
LH: loop header
LB: loop body
LE: loop exit
PB: predicated region body
PF: predicated region fallthrough
CT: control target
= control target key end

     0   :  { %vm19_vm0 = vcmask 261120   ;;  %v177_v0 = vmov 0.0   ;;  %vm178_vm1 = vmmov 0   ;;  %vm63_vm2 = vcmask 523264   ;;  %s227_s1 = inlined_call_operand.vmem [shape: bf16[64,32], index: 1, kind: input, shape index: {}]   ;;  %s228_s0 = inlined_call_operand.vmem [shape: bf16[16,64], index: 0, kind: input, shape index: {}]   ;;  %s229_s2 = inlined_call_operand.vmem [shape: f32[1,32], index: 2, kind: input, shape index: {}]   ;;  %s230_s3 = inlined_call_operand.vmem [shape: bf16[16,32], index: 3, kind: output, shape index: {}]  }
   0x1   :  { %158 = vmatprep.subr.bf16.mxu0 %v177_v0  ;;  %v172_v1 = vld [vmem:[%s227_s1] sm:$0xff]   ;;  %166 = vmatprep.mubr.msk.bf16.mxu0 %vm178_vm1, %v177_v0  ;;  %20 = vst.msk [vmem:[#allocation2] sm:$0xff] %vm19_vm0, %v177_v0  ;;  %21 = vst.msk [vmem:[#allocation2 + $0x8] sm:$0xff] %vm19_vm0, %v177_v0  ;;  %v173_v2 = vld [vmem:[%s227_s1 + $0x8] sm:$0xff]   ;;  %vm135_vm3 = vcmask 257024  }
   0x2   :  { %159 = vmatpush3.bf16.msra.mxu0 %v172_v1  ;;  %v174_v3 = vld [vmem:[%s227_s1 + $0x10] sm:$0xff]   ;;  %v175_v4 = vld [vmem:[%s227_s1 + $0x18] sm:$0xff]   ;;  %v176_v5 = vld [vmem:[%s228_s0] sm:$0xff]  }
   0x3   :  { %160 = vmatprep.subr.bf16.mxu0 %v177_v0  ;;  %v148_v14 = vld [vmem:[%s229_s2] ss:$0 sm:$0xff] }
   0x6   :  { %161 = vmatpush3.bf16.msra.mxu0 %v173_v2 }
   0x7   :  { %162 = vmatprep.subr.bf16.mxu0 %v177_v0 }
   0x8   :  { %v22_v6 = vld [vmem:[#allocation2] sm:$0xff]  ;;  %v23_v8 = vld [vmem:[#allocation2 + $0x8] sm:$0xff] }
   0xa   :  { %163 = vmatpush3.bf16.msra.mxu0 %v174_v3 }
   0xb   :  { %164 = vmatprep.subr.bf16.mxu0 %v177_v0 }
   0xe   :  { %165 = vmatpush3.bf16.msra.mxu0 %v175_v4 }
  0x11   :  { %167 = vmatmul.mubr.msk.bf16.vlgmr.msra.gmra.mrb[0].mxu0 %vm63_vm2, %v176_v5 }
  0xe4   :  { %v101_v7 = vpop.f32.mrb[0].mxu0 }
  0xe5   :  { %v108_v9 = vadd.f32 %v101_v7, %v22_v6  ;;  %v168_v10 = vpop.f32.mrb[1].mxu0 }
  0xe6   :  { %v104_v11 = vpop.f32.mrb[2].mxu0 }
  0xe7   :  { %111 = vst.msk [vmem:[#allocation2] sm:$0xff] %vm19_vm0, %v108_v9  ;;  %v109_v12 = vadd.f32 %v104_v11, %v23_v8  ;;  %v169_v13 = vpop.f32.mrb[3].mxu0 }
  0xe9   :  { %112 = vst.msk [vmem:[#allocation2 + $0x8] sm:$0xff] %vm19_vm0, %v109_v12 }
  0xee   :  { %v116_v15 = vld [vmem:[#allocation2] sm:$0xff] }
  0xef   :  { %v125_v16 = vadd.f32 %v148_v14, %v116_v15 }
  0xf0   :  { %v117_v17 = vld [vmem:[#allocation2 + $0x8] sm:$0xff] }
  0xf1   :  { %v151_v18 = vpack.c.bf16 %v125_v16, %v125_v16  ;;  %v126_v19 = vadd.f32 %v148_v14, %v117_v17 }
  0xf3   :  { %136 = vst.msk [vmem:[%s230_s3] sm:$0xf] %vm135_vm3, %v151_v18  ;;  %v152_v20 = vpack.c.bf16 %v126_v19, %v126_v19 }
  0xf5   :  { %137 = vst.msk [vmem:[%s230_s3 + $0x4] sm:$0xf] %vm135_vm3, %v152_v20 }

// kernel: simple_vit_ae_forward.39
= control target key start
LH: loop header
LB: loop body
LE: loop exit
PB: predicated region body
PF: predicated region fallthrough
CT: control target
= control target key end

     0   :  { %vm19_vm0 = vcmask 523264   ;;  %v165_v0 = vmov 0.0   ;;  %vm166_vm1 = vmmov 0   ;;  %vm47_vm2 = vcmask 261120   ;;  %s209_s1 = inlined_call_operand.vmem [shape: bf16[32,64], index: 1, kind: input, shape index: {}]   ;;  %s210_s0 = inlined_call_operand.vmem [shape: bf16[16,32], index: 0, kind: input, shape index: {}]   ;;  %s211_s2 = inlined_call_operand.vmem [shape: f32[1,64], index: 2, kind: input, shape index: {}]   ;;  %s212_s3 = inlined_call_operand.vmem [shape: bf16[16,64], index: 3, kind: output, shape index: {}]  }
   0x1   :  { %148 = vmatprep.subr.bf16.mxu0 %v165_v0  ;;  %v158_v1 = vld [vmem:[%s209_s1] sm:$0xff]   ;;  %152 = vmatprep.mubr.msk.bf16.mxu0 %vm166_vm1, %v165_v0  ;;  %20 = vst.msk [vmem:[#allocation2] sm:$0xff] %vm19_vm0, %v165_v0  ;;  %21 = vst.msk [vmem:[#allocation2 + $0x8] sm:$0xff] %vm19_vm0, %v165_v0  ;;  %v159_v2 = vld [vmem:[%s209_s1 + $0x8] sm:$0xff]   ;;  %vm129_vm3 = vcmask 519168  }
   0x2   :  { %149 = vmatpush3.bf16.msra.mxu0 %v158_v1  ;;  %v160_v3 = vld [vmem:[%s210_s0] sm:$0xff]  }
   0x3   :  { %150 = vmatprep.subr.bf16.mxu0 %v165_v0  ;;  %v140_v12 = vld [vmem:[%s211_s2] ss:$0 sm:$0xff] }
   0x6   :  { %151 = vmatpush3.bf16.msra.mxu0 %v159_v2 }
   0x8   :  { %v22_v4 = vld [vmem:[#allocation2] sm:$0xff]  ;;  %v23_v6 = vld [vmem:[#allocation2 + $0x8] sm:$0xff] }
   0x9   :  { %153 = vmatmul.mubr.msk.bf16.vlgmr.msra.gmra.mrb[0].mxu0 %vm47_vm2, %v160_v3 }
  0xdc   :  { %v85_v5 = vpop.f32.mrb[0].mxu0 }
  0xdd   :  { %v92_v7 = vadd.f32 %v85_v5, %v22_v4  ;;  %v154_v8 = vpop.f32.mrb[1].mxu0 }
  0xde   :  { %v88_v9 = vpop.f32.mrb[2].mxu0 }
  0xdf   :  { %95 = vst.msk [vmem:[#allocation2] sm:$0xff] %vm19_vm0, %v92_v7  ;;  %v93_v10 = vadd.f32 %v88_v9, %v23_v6  ;;  %v155_v11 = vpop.f32.mrb[3].mxu0 }
  0xe1   :  { %96 = vst.msk [vmem:[#allocation2 + $0x8] sm:$0xff] %vm19_vm0, %v93_v10 }
  0xe6   :  { %v100_v13 = vld [vmem:[#allocation2] sm:$0xff] }
  0xe7   :  { %v109_v14 = vadd.f32 %v140_v12, %v100_v13 }
  0xe8   :  { %v101_v15 = vld [vmem:[#allocation2 + $0x8] sm:$0xff] }
  0xe9   :  { %v113_v16 = vmul.f32 0.70710677, %v109_v14  ;;  %v110_v17 = vadd.f32 %v140_v12, %v101_v15  ;;  %v111_v20 = vmul.f32 0.5, %v109_v14 }
  0xeb   :  { %161 = verf.f32 %v113_v16  ;;  %v114_v18 = vmul.f32 0.70710677, %v110_v17  ;;  %v112_v24 = vmul.f32 0.5, %v110_v17 }
  0xed   :  { %163 = verf.f32 %v114_v18 }
  0xf5   :  { %v162_v19 = vpop.eup %161 }
  0xf6   :  { %v117_v21 = vadd.f32 1.0, %v162_v19 }
  0xf7   :  { %v164_v22 = vpop.eup %163 }
  0xf8   :  { %v119_v23 = vmul.f32 %v117_v21, %v111_v20  ;;  %v118_v25 = vadd.f32 1.0, %v164_v22 }
  0xfa   :  { %v143_v26 = vpack.c.bf16 %v119_v23, %v119_v23  ;;  %v120_v27 = vmul.f32 %v118_v25, %v112_v24 }
  0xfc   :  { %130 = vst.msk [vmem:[%s212_s3] sm:$0xf] %vm129_vm3, %v143_v26  ;;  %v144_v28 = vpack.c.bf16 %v120_v27, %v120_v27 }
  0xfe   :  { %131 = vst.msk [vmem:[%s212_s3 + $0x4] sm:$0xf] %vm129_vm3, %v144_v28 }

// kernel: simple_vit_ae_forward.49
= control target key start
LH: loop header
LB: loop body
LE: loop exit
PB: predicated region body
PF: predicated region fallthrough
CT: control target
= control target key end

     0   :  { %vm19_vm0 = vcmask 785408   ;;  %v198_v1 = vmov 0.0   ;;  %vm58_vm1 = vcmask 261120   ;;  %vm157_vm2 = vcmask 781312   ;;  %s254_s1 = inlined_call_operand.vmem [shape: bf16[32,96], index: 1, kind: input, shape index: {}]   ;;  %s255_s0 = inlined_call_operand.vmem [shape: bf16[32,32], index: 0, kind: input, shape index: {}]   ;;  %s256_s2 = inlined_call_operand.vmem [shape: f32[1,96], index: 2, kind: input, shape index: {}]   ;;  %s257_s3 = inlined_call_operand.vmem [shape: bf16[32,96], index: 3, kind: output, shape index: {}]  }
   0x1   :  { %v194_v0 = vld [vmem:[%s254_s1] sm:$0xff]   ;;  %22 = vst.msk [vmem:[#allocation2 + $0x10] sm:$0xff] %vm19_vm0, %v198_v1  ;;  %20 = vst.msk [vmem:[#allocation2] sm:$0xff] %vm19_vm0, %v198_v1  ;;  %v195_v2 = vld [vmem:[%s254_s1 + $0x8] sm:$0xff]  }
   0x2   :  { %21 = vst.msk [vmem:[#allocation2 + $0x8] sm:$0xff] %vm19_vm0, %v198_v1  ;;  %23 = vst.msk [vmem:[#allocation2 + $0x18] sm:$0xff] %vm19_vm0, %v198_v1  ;;  %185 = vmatprep.subr.bf16.mxu0 %v194_v0  ;;  %v196_v3 = vld [vmem:[%s255_s0] sm:$0xff]   ;;  %v197_v4 = vld [vmem:[%s255_s0 + $0x8] sm:$0xff]  }
   0x3   :  { %186 = vmatpush3.bf16.msra.mxu0 %v194_v0  ;;  %189 = vmatprep.mubr.msk.bf16.mxu0 %vm58_vm1, %v196_v3  ;;  %v172_v17 = vld [vmem:[%s256_s2] ss:$0 sm:$0xff] }
   0x4   :  { %187 = vmatprep.subr.bf16.mxu0 %v195_v2 }
   0x7   :  { %188 = vmatpush3.bf16.msra.mxu0 %v195_v2 }
   0x8   :  { %v26_v5 = vld [vmem:[#allocation2 + $0x10] sm:$0xff]  ;;  %v24_v6 = vld [vmem:[#allocation2] sm:$0xff] }
   0x9   :  { %v27_v8 = vld [vmem:[#allocation2 + $0x18] sm:$0xff]  ;;  %v25_v11 = vld [vmem:[#allocation2 + $0x8] sm:$0xff] }
   0xa   :  { %190 = vmatmul.mubr.msk.bf16.vlgmr.msra.gmra.mrb[0].mxu0 %vm58_vm1, %v197_v4 }
  0xdd   :  { %v191_v7 = vpop.f32.mrb[0].mxu0 }
  0xde   :  { %v116_v9 = vadd.f32 %v191_v7, %v26_v5  ;;  %v99_v10 = vpop.f32.mrb[1].mxu0 }
  0xdf   :  { %v114_v12 = vadd.f32 %v99_v10, %v24_v6  ;;  %v192_v13 = vpop.f32.mrb[2].mxu0 }
  0xe0   :  { %121 = vst.msk [vmem:[#allocation2 + $0x10] sm:$0xff] %vm19_vm0, %v116_v9  ;;  %v117_v14 = vadd.f32 %v192_v13, %v27_v8  ;;  %v102_v15 = vpop.f32.mrb[3].mxu0 }
  0xe1   :  { %119 = vst.msk [vmem:[#allocation2] sm:$0xff] %vm19_vm0, %v114_v12  ;;  %v115_v16 = vadd.f32 %v102_v15, %v25_v11 }
  0xe2   :  { %122 = vst.msk [vmem:[#allocation2 + $0x18] sm:$0xff] %vm19_vm0, %v117_v14 }
  0xe3   :  { %120 = vst.msk [vmem:[#allocation2 + $0x8] sm:$0xff] %vm19_vm0, %v115_v16 }
  0xe7   :  { %v128_v18 = vld [vmem:[#allocation2 + $0x10] sm:$0xff] }
  0xe8   :  { %v139_v19 = vadd.f32 %v172_v17, %v128_v18  ;;  %v126_v20 = vld [vmem:[#allocation2] sm:$0xff] }
  0xe9   :  { %v137_v21 = vadd.f32 %v172_v17, %v126_v20  ;;  %v129_v22 = vld [vmem:[#allocation2 + $0x18] sm:$0xff] }
  0xea   :  { %v179_v23 = vpack.c.bf16 %v139_v19, %v139_v19  ;;  %v140_v24 = vadd.f32 %v172_v17, %v129_v22  ;;  %v127_v25 = vld [vmem:[#allocation2 + $0x8] sm:$0xff] }
  0xeb   :  { %v177_v26 = vpack.c.bf16 %v137_v21, %v137_v21  ;;  %v138_v27 = vadd.f32 %v172_v17, %v127_v25 }
  0xec   :  { %160 = vst.msk [vmem:[%s257_s3 + $0x8] sm:$0xf] %vm157_vm2, %v179_v23  ;;  %v180_v28 = vpack.c.bf16 %v140_v24, %v140_v24 }
  0xed   :  { %158 = vst.msk [vmem:[%s257_s3] sm:$0xf] %vm157_vm2, %v177_v26  ;;  %v178_v29 = vpack.c.bf16 %v138_v27, %v138_v27 }
  0xee   :  { %161 = vst.msk [vmem:[%s257_s3 + $0xc] sm:$0xf] %vm157_vm2, %v180_v28 }
  0xef   :  { %159 = vst.msk [vmem:[%s257_s3 + $0x4] sm:$0xf] %vm157_vm2, %v178_v29 }

// kernel: simple_vit_ae_forward.51
= control target key start
LH: loop header
LB: loop body
LE: loop exit
PB: predicated region body
PF: predicated region fallthrough
CT: control target
= control target key end

     0   :  { %vm19_vm0 = vcmask 261120   ;;  %v197_v1 = vmov 0.0   ;;  %vm156_vm1 = vcmask 257024   ;;  %s255_s1 = inlined_call_operand.vmem [shape: bf16[32,32], index: 1, kind: input, shape index: {}]   ;;  %s256_s0 = inlined_call_operand.vmem [shape: bf16[32,32], index: 0, kind: input, shape index: {}]   ;;  %s257_s2 = inlined_call_operand.vmem [shape: f32[1,32], index: 2, kind: input, shape index: {}]   ;;  %s258_s3 = inlined_call_operand.vmem [shape: bf16[32,32], index: 3, kind: output, shape index: {}]  }
   0x1   :  { %v193_v0 = vld [vmem:[%s255_s1] sm:$0xff]   ;;  %22 = vst.msk [vmem:[#allocation2 + $0x10] sm:$0xff] %vm19_vm0, %v197_v1  ;;  %20 = vst.msk [vmem:[#allocation2] sm:$0xff] %vm19_vm0, %v197_v1  ;;  %v194_v2 = vld [vmem:[%s255_s1 + $0x8] sm:$0xff]  }
   0x2   :  { %21 = vst.msk [vmem:[#allocation2 + $0x8] sm:$0xff] %vm19_vm0, %v197_v1  ;;  %23 = vst.msk [vmem:[#allocation2 + $0x18] sm:$0xff] %vm19_vm0, %v197_v1  ;;  %184 = vmatprep.subr.bf16.mxu0 %v193_v0  ;;  %v195_v3 = vld [vmem:[%s256_s0] sm:$0xff]   ;;  %v196_v4 = vld [vmem:[%s256_s0 + $0x8] sm:$0xff]  }
   0x3   :  { %185 = vmatpush3.bf16.msra.mxu0 %v193_v0  ;;  %188 = vmatprep.mubr.msk.bf16.mxu0 %vm19_vm0, %v195_v3  ;;  %v171_v17 = vld [vmem:[%s257_s2] ss:$0 sm:$0xff] }
   0x4   :  { %186 = vmatprep.subr.bf16.mxu0 %v194_v2 }
   0x7   :  { %187 = vmatpush3.bf16.msra.mxu0 %v194_v2 }
   0x8   :  { %v26_v5 = vld [vmem:[#allocation2 + $0x10] sm:$0xff]  ;;  %v24_v6 = vld [vmem:[#allocation2] sm:$0xff] }
   0x9   :  { %v27_v8 = vld [vmem:[#allocation2 + $0x18] sm:$0xff]  ;;  %v25_v11 = vld [vmem:[#allocation2 + $0x8] sm:$0xff] }
   0xa   :  { %189 = vmatmul.mubr.msk.bf16.vlgmr.msra.gmra.mrb[0].mxu0 %vm19_vm0, %v196_v4 }
  0xdd   :  { %v190_v7 = vpop.f32.mrb[0].mxu0 }
  0xde   :  { %v116_v9 = vadd.f32 %v190_v7, %v26_v5  ;;  %v99_v10 = vpop.f32.mrb[1].mxu0 }
  0xdf   :  { %v114_v12 = vadd.f32 %v99_v10, %v24_v6  ;;  %v191_v13 = vpop.f32.mrb[2].mxu0 }
  0xe0   :  { %120 = vst.msk [vmem:[#allocation2 + $0x10] sm:$0xff] %vm19_vm0, %v116_v9  ;;  %v117_v14 = vadd.f32 %v191_v13, %v27_v8  ;;  %v102_v15 = vpop.f32.mrb[3].mxu0 }
  0xe1   :  { %118 = vst.msk [vmem:[#allocation2] sm:$0xff] %vm19_vm0, %v114_v12  ;;  %v115_v16 = vadd.f32 %v102_v15, %v25_v11 }
  0xe2   :  { %121 = vst.msk [vmem:[#allocation2 + $0x18] sm:$0xff] %vm19_vm0, %v117_v14 }
  0xe3   :  { %119 = vst.msk [vmem:[#allocation2 + $0x8] sm:$0xff] %vm19_vm0, %v115_v16 }
  0xe7   :  { %v127_v18 = vld [vmem:[#allocation2 + $0x10] sm:$0xff] }
  0xe8   :  { %v138_v19 = vadd.f32 %v171_v17, %v127_v18  ;;  %v125_v20 = vld [vmem:[#allocation2] sm:$0xff] }
  0xe9   :  { %v136_v21 = vadd.f32 %v171_v17, %v125_v20  ;;  %v128_v22 = vld [vmem:[#allocation2 + $0x18] sm:$0xff] }
  0xea   :  { %v178_v23 = vpack.c.bf16 %v138_v19, %v138_v19  ;;  %v139_v24 = vadd.f32 %v171_v17, %v128_v22  ;;  %v126_v25 = vld [vmem:[#allocation2 + $0x8] sm:$0xff] }
  0xeb   :  { %v176_v26 = vpack.c.bf16 %v136_v21, %v136_v21  ;;  %v137_v27 = vadd.f32 %v171_v17, %v126_v25 }
  0xec   :  { %159 = vst.msk [vmem:[%s258_s3 + $0x8] sm:$0xf] %vm156_vm1, %v178_v23  ;;  %v179_v28 = vpack.c.bf16 %v139_v24, %v139_v24 }
  0xed   :  { %157 = vst.msk [vmem:[%s258_s3] sm:$0xf] %vm156_vm1, %v176_v26  ;;  %v177_v29 = vpack.c.bf16 %v137_v27, %v137_v27 }
  0xee   :  { %160 = vst.msk [vmem:[%s258_s3 + $0xc] sm:$0xf] %vm156_vm1, %v179_v28 }
  0xef   :  { %158 = vst.msk [vmem:[%s258_s3 + $0x4] sm:$0xf] %vm156_vm1, %v177_v29 }

// kernel: simple_vit_ae_forward.50
= control target key start
LH: loop header
LB: loop body
LE: loop exit
PB: predicated region body
PF: predicated region fallthrough
CT: control target
= control target key end

     0   :  { %s910_s6 = smov 0   ;;  %s1010_s0 = inlined_call_operand.vmem [shape: bf16[2,16,96], index: 0, kind: input, shape index: {}]   ;;  %s1011_s1 = inlined_call_operand.vmem [shape: bf16[2,16,32], index: 1, kind: output, shape index: {}]  }
   0x1 LB: > { %s714_s7 = sadd.s32 4294967295, %s882_s6   ;;  %p718_p0 = scmp.ge.s32.totalorder %s882_s6, 1  ;;  %s882_s6 = sphi %s910_s6, %s11_s6  }
   0x2   : > { %p87_p1 = scmp.lt.s32.totalorder %s882_s6, 3 }
   0x4   : > { %p88_p2 = pnand %p718_p0, %p87_p1 }
   0x5   : > { %p107_p3 = scmp.lt.s32.totalorder (!%p88_p2), %s714_s7, 1  ;;  %v884_v0 = vmov (!%p88_p2), 0.0   ;;  %vm885_vm0 = vmmov (!%p88_p2), 0   ;;  %s886_s12 = smov (!%p88_p2), 96   ;;  %vm127_vm1 = vcmask (!%p88_p2), 64512   ;;  %vm177_vm2 = vcmask (!%p88_p2), 130048  }
   0x6   : > { %91 = sbr.rel (%p88_p2) target bundleno = 1567 (0x61f), region = 24  ;;  %756 = vmatprep.subr.bf16.mxu0 (!%p88_p2), %v884_v0  ;;  %758 = vmatprep.mubr.msk.bf16.mxu0 (!%p88_p2), %vm885_vm0, %v884_v0  ;;  %s887_s13 = smov (!%p88_p2), 64   ;;  %vm645_vm3 = vcmask (!%p88_p2), 195584   ;;  %vm656_vm4 = vcmask (!%p88_p2), 257024  }
   0x7   : > { %762 = vmatprep.subr.bf16.mxu1 (!%p88_p2), %v884_v0  ;;  %764 = vmatprep.mubr.msk.bf16.mxu1 (!%p88_p2), %vm885_vm0, %v884_v0  ;;  %s888_s14 = smov (!%p88_p2), 80   ;;  %s889_s15 = smov (!%p88_p2), 88  }
   0x8   : > { %s890_s16 = smov (!%p88_p2), 120   ;;  %s891_s17 = smov (!%p88_p2), 112  }
   0x9   : > { %s892_s18 = smov (!%p88_p2), 72   ;;  %s893_s19 = smov (!%p88_p2), 104  }
   0xa   : > { %s894_s20 = smov (!%p88_p2), 56   ;;  %s895_s21 = smov (!%p88_p2), 40  }
   0xb   : > { %s896_s22 = smov (!%p88_p2), 48   ;;  %s897_s23 = smov (!%p88_p2), 8  }
   0xc   : > { %s898_s24 = smov (!%p88_p2), 16   ;;  %s899_s25 = smov (!%p88_p2), 24  }
   0xd   : > { %s1013_s7 = smov (!%p107_p3, %s714_s7), 1 }
   0xe   : > { %s736_s8 = sshll.u32 %s1013_s7, 3 }
   0xf   : > { %s111_s11 = scalar_lea.vmem %s1010_s0, %s736_s8  ;;  %s116_s28 = scalar_lea.vmem %s1011_s1, %s736_s8 }
  0x10   : > { %v932_v1 = vld [vmem:[%s111_s11] sm:$0xff]  }
  0x11   : > { %125 = vrot.lane.b32.xlu0 %v932_v1, %s886_s12 }
  0x83   : > { %v126_v2 = vpop.permute.xlu0 %125 }
  0x84   : > { %v132_v3 = vsel %vm127_vm1, %v126_v2, 0 }
  0x85   : > { %757 = vmatpush3.bf16.xpose.msra.mxu0 %v132_v3 }
  0x86   : > { %774 = vmatprep.subr.bf16.mxu0 %v884_v0 }
  0x8c   : > { %759 = vmatmul.mubr.msk.bf16.vlgmr.msra.gmra.mrb[0].mxu0 %vm127_vm1, %v932_v1 }
  0x8d   : > { %776 = vmatprep.mubr.msk.bf16.mxu0 %vm885_vm0, %v884_v0 }
 0x15f   : > { %v168_v4 = vpop.f32.mrb[0].mxu0 }
 0x160   : > { %v175_v5 = vmul.f32 0.35355338, %v168_v4  ;;  %v760_v6 = vpop.f32.mrb[1].mxu0 }
 0x161   : > { %v171_v7 = vpop.f32.mrb[2].mxu0 }
 0x162   : > { %v176_v8 = vmul.f32 0.35355338, %v171_v7  ;;  %v761_v9 = vpop.f32.mrb[3].mxu0  ;;  %v178_v10 = vsel %vm177_vm2, %v175_v5, -inf }
 0x163   : > { %179 = vmax.xlane.f32.xlu0 %v178_v10 }
 0x164   : > { %v181_v11 = vsel %vm177_vm2, %v176_v8, -inf }
 0x165   : > { %182 = vmax.xlane.f32.xlu1 %v181_v11 }
 0x176   : > { %201 = vrot.lane.b32.xlu1 %v932_v1, %s887_s13 }
 0x179   : > { %373 = vrot.lane.b32.xlu0 %v932_v1, %s888_s14 }
 0x1f0   : > { %v180_v12 = vpop.xlane.xlu0 %179 }
 0x1f1   : > { %v184_v13 = vsub.f32 %v175_v5, %v180_v12 }
 0x1f2   : > { %v183_v14 = vpop.xlane.xlu1 %182 }
 0x1f3   : > { %v186_v15 = vmul.f32 1.442695, %v184_v13  ;;  %v185_v16 = vsub.f32 %v176_v8, %v183_v14 }
 0x1f4   : > { %v374_v33 = vpop.permute.xlu0 %373 }
 0x1f5   : > { %844 = vpow2.f32 %v186_v15  ;;  %v188_v17 = vmul.f32 1.442695, %v185_v16  ;;  %v379_v35 = vsel %vm127_vm1, %v374_v33, 0 }
 0x1f6   : > { %v202_v18 = vpop.permute.xlu1 %201 }
 0x1f7   : > { %846 = vpow2.f32 %v188_v17  ;;  %763 = vmatpush3.bf16.msra.mxu1 %v202_v18 }
 0x1f8   : > { %768 = vmatprep.subr.bf16.mxu1 %v884_v0 }
 0x1ff   : > { %v845_v19 = vpop.eup %844 }
 0x200   : > { %v190_v20 = vsel %vm177_vm2, %v845_v19, 0.0 }
 0x201   : > { %v847_v21 = vpop.eup %846  ;;  %191 = vadd.xlane.f32.xlu1 %v190_v20 }
 0x202   : > { %v193_v22 = vsel %vm177_vm2, %v847_v21, 0.0 }
 0x205   : > { %194 = vadd.xlane.f32.xlu1 %v193_v22 }
 0x216   : > { %250 = vrot.lane.b32.xlu1 %v932_v1, %s889_s15 }
 0x21a   : > { %248 = vrot.lane.b32.xlu1 %v932_v1, %s890_s16 }
 0x21e   : > { %371 = vrot.lane.b32.xlu1 %v932_v1, %s891_s17 }
 0x222   : > { %496 = vrot.lane.b32.xlu1 %v932_v1, %s892_s18 }
 0x226   : > { %494 = vrot.lane.b32.xlu1 %v932_v1, %s893_s19 }
 0x28e   : > { %v192_v23 = vpop.xlane.xlu1 %191 }
 0x28f   : > { %848 = vrcp.f32 %v192_v23 }
 0x292   : > { %v195_v24 = vpop.xlane.xlu1 %194 }
 0x293   : > { %850 = vrcp.f32 %v195_v24 }
 0x296   : > { %v251_v27 = vpop.permute.xlu1 %250 }
 0x297   : > { %v256_v30 = vsel %vm127_vm1, %v251_v27, 0 }
 0x299   : > { %v849_v25 = vpop.eup %848 }
 0x29a   : > { %v198_v28 = vmul.f32 %v849_v25, %v845_v19  ;;  %v249_v32 = vpop.permute.xlu1 %248 }
 0x29d   : > { %v851_v26 = vpop.eup %850 }
 0x29e   : > { %v199_v29 = vmul.f32 %v851_v26, %v847_v21  ;;  %v372_v34 = vpop.permute.xlu1 %371 }
 0x2a0   : > { %v200_v31 = vpack.c.bf16 %v199_v29, %v198_v28 }
 0x2a2   : > { %765 = vmatmul.mubr.msk.bf16.vlgmr.msra.gmra.mrb[0].mxu1 %vm177_vm2, %v200_v31  ;;  %v497_v36 = vpop.permute.xlu1 %496 }
 0x2a3   : > { %769 = vmatpush3.bf16.xpose.msra.mxu1 %v256_v30  ;;  %770 = vmatprep.mubr.msk.bf16.mxu1 %vm885_vm0, %v884_v0  ;;  %v502_v37 = vsel %vm127_vm1, %v497_v36, 0 }
 0x2a4   : > { %780 = vmatprep.subr.bf16.mxu1 %v884_v0 }
 0x2a6   : > { %v495_v38 = vpop.permute.xlu1 %494 }
 0x2aa   : > { %771 = vmatmul.mubr.msk.bf16.vlgmr.msra.gmra.mrb[4].mxu1 %vm127_vm1, %v249_v32 }
 0x2ab   : > { %781 = vmatpush3.bf16.xpose.msra.mxu1 %v379_v35  ;;  %782 = vmatprep.mubr.msk.bf16.mxu1 %vm885_vm0, %v884_v0 }
 0x2ac   : > { %792 = vmatprep.subr.bf16.mxu1 %v884_v0 }
 0x2b2   : > { %783 = vmatmul.mubr.msk.bf16.vlgmr.msra.gmra.mrb[8].mxu1 %vm127_vm1, %v372_v34 }
 0x2b3   : > { %793 = vmatpush3.bf16.xpose.msra.mxu1 %v502_v37  ;;  %794 = vmatprep.mubr.msk.bf16.mxu1 %vm885_vm0, %v884_v0 }
 0x2ba   : > { %795 = vmatmul.mubr.msk.bf16.vlgmr.msra.gmra.mrb[12].mxu1 %vm127_vm1, %v495_v38 }
 0x375   : > { %v968_v39 = vpop.f32.mrb[0].mxu1 }
 0x376   : > { %v766_v40 = vpop.f32.mrb[1].mxu1 }
 0x377   : > { %v970_v41 = vpop.f32.mrb[2].mxu1 }
 0x378   : > { %v767_v42 = vpop.f32.mrb[3].mxu1 }
 0x37d   : > { %v292_v43 = vpop.f32.mrb[4].mxu1 }
 0x37e   : > { %v299_v44 = vmul.f32 0.35355338, %v292_v43  ;;  %v772_v45 = vpop.f32.mrb[5].mxu1 }
 0x37f   : > { %v295_v46 = vpop.f32.mrb[6].mxu1 }
 0x380   : > { %v300_v47 = vmul.f32 0.35355338, %v295_v46  ;;  %v773_v48 = vpop.f32.mrb[7].mxu1  ;;  %v301_v49 = vsel %vm177_vm2, %v299_v44, -inf }
 0x381   : > { %302 = vmax.xlane.f32.xlu1 %v301_v49 }
 0x382   : > { %v304_v50 = vsel %vm177_vm2, %v300_v47, -inf }
 0x383   : > { %305 = vmax.xlane.f32.xlu0 %v304_v50 }
 0x385   : > { %v415_v51 = vpop.f32.mrb[8].mxu1 }
 0x386   : > { %v422_v52 = vmul.f32 0.35355338, %v415_v51  ;;  %v784_v53 = vpop.f32.mrb[9].mxu1 }
 0x387   : > { %v418_v54 = vpop.f32.mrb[10].mxu1 }
 0x388   : > { %v423_v55 = vmul.f32 0.35355338, %v418_v54  ;;  %v785_v56 = vpop.f32.mrb[11].mxu1  ;;  %v424_v57 = vsel %vm177_vm2, %v422_v52, -inf }
 0x389   : > { %425 = vmax.xlane.f32.xlu1 %v424_v57 }
 0x38a   : > { %v427_v58 = vsel %vm177_vm2, %v423_v55, -inf }
 0x38b   : > { %428 = vmax.xlane.f32.xlu0 %v427_v58 }
 0x38d   : > { %v538_v59 = vpop.f32.mrb[12].mxu1 }
 0x38e   : > { %v545_v60 = vmul.f32 0.35355338, %v538_v59  ;;  %v796_v61 = vpop.f32.mrb[13].mxu1 }
 0x38f   : > { %v541_v62 = vpop.f32.mrb[14].mxu1 }
 0x390   : > { %v546_v63 = vmul.f32 0.35355338, %v541_v62  ;;  %v797_v2 = vpop.f32.mrb[15].mxu1  ;;  %v547_v3 = vsel %vm177_vm2, %v545_v60, -inf }
 0x391   : > { %548 = vmax.xlane.f32.xlu1 %v547_v3 }
 0x392   : > { %v550_v4 = vsel %vm177_vm2, %v546_v63, -inf }
 0x393   : > { %551 = vmax.xlane.f32.xlu0 %v550_v4 }
 0x3a2   : > { %324 = vrot.lane.b32.xlu1 %v932_v1, %s894_s20 }
 0x40e   : > { %v303_v5 = vpop.xlane.xlu1 %302 }
 0x40f   : > { %v307_v6 = vsub.f32 %v299_v44, %v303_v5 }
 0x410   : > { %v306_v7 = vpop.xlane.xlu0 %305 }
 0x411   : > { %v309_v8 = vmul.f32 1.442695, %v307_v6  ;;  %v308_v9 = vsub.f32 %v300_v47, %v306_v7 }
 0x413   : > { %852 = vpow2.f32 %v309_v8  ;;  %v311_v10 = vmul.f32 1.442695, %v308_v9 }
 0x415   : > { %854 = vpow2.f32 %v311_v10 }
 0x416   : > { %v426_v11 = vpop.xlane.xlu1 %425 }
 0x417   : > { %v430_v12 = vsub.f32 %v422_v52, %v426_v11 }
 0x418   : > { %v429_v13 = vpop.xlane.xlu0 %428 }
 0x419   : > { %v432_v14 = vmul.f32 1.442695, %v430_v12  ;;  %v431_v15 = vsub.f32 %v423_v55, %v429_v13 }
 0x41b   : > { %856 = vpow2.f32 %v432_v14  ;;  %v434_v16 = vmul.f32 1.442695, %v431_v15 }
 0x41d   : > { %v853_v17 = vpop.eup %852  ;;  %858 = vpow2.f32 %v434_v16 }
 0x41e   : > { %v549_v18 = vpop.xlane.xlu1 %548  ;;  %v313_v19 = vsel %vm177_vm2, %v853_v17, 0.0 }
 0x41f   : > { %v855_v20 = vpop.eup %854  ;;  %v553_v21 = vsub.f32 %v545_v60, %v549_v18  ;;  %314 = vadd.xlane.f32.xlu1 %v313_v19 }
 0x420   : > { %v552_v22 = vpop.xlane.xlu0 %551  ;;  %v316_v23 = vsel %vm177_vm2, %v855_v20, 0.0 }
 0x421   : > { %v555_v24 = vmul.f32 1.442695, %v553_v21  ;;  %v554_v25 = vsub.f32 %v546_v63, %v552_v22  ;;  %317 = vadd.xlane.f32.xlu0 %v316_v23 }
 0x422   : > { %v325_v26 = vpop.permute.xlu1 %324 }
 0x423   : > { %860 = vpow2.f32 %v555_v24  ;;  %v557_v27 = vmul.f32 1.442695, %v554_v25  ;;  %775 = vmatpush3.bf16.msra.mxu0 %v325_v26 }
 0x424   : > { %786 = vmatprep.subr.bf16.mxu0 %v884_v0 }
 0x425   : > { %v857_v28 = vpop.eup %856  ;;  %862 = vpow2.f32 %v557_v27 }
 0x426   : > { %v436_v29 = vsel %vm177_vm2, %v857_v28, 0.0 }
 0x427   : > { %v859_v30 = vpop.eup %858  ;;  %437 = vadd.xlane.f32.xlu1 %v436_v29 }
 0x428   : > { %v439_v31 = vsel %vm177_vm2, %v859_v30, 0.0 }
 0x429   : > { %440 = vadd.xlane.f32.xlu0 %v439_v31 }
 0x42d   : > { %v861_v32 = vpop.eup %860 }
 0x42e   : > { %v559_v33 = vsel %vm177_vm2, %v861_v32, 0.0 }
 0x42f   : > { %v863_v34 = vpop.eup %862  ;;  %560 = vadd.xlane.f32.xlu1 %v559_v33 }
 0x430   : > { %v562_v35 = vsel %vm177_vm2, %v863_v34, 0.0 }
 0x431   : > { %563 = vadd.xlane.f32.xlu0 %v562_v35 }
 0x440   : > { %570 = vrot.lane.b32.xlu1 %v932_v1, %s895_s21 }
 0x447   : > { %447 = vrot.lane.b32.xlu0 %v932_v1, %s896_s22 }
 0x4ac   : > { %v315_v36 = vpop.xlane.xlu1 %314 }
 0x4ad   : > { %864 = vrcp.f32 %v315_v36 }
 0x4ae   : > { %v318_v37 = vpop.xlane.xlu0 %317 }
 0x4af   : > { %866 = vrcp.f32 %v318_v37 }
 0x4b4   : > { %v438_v38 = vpop.xlane.xlu1 %437 }
 0x4b5   : > { %868 = vrcp.f32 %v438_v38 }
 0x4b6   : > { %v441_v40 = vpop.xlane.xlu0 %440 }
 0x4b7   : > { %v865_v42 = vpop.eup %864  ;;  %870 = vrcp.f32 %v441_v40 }
 0x4b8   : > { %v321_v44 = vmul.f32 %v865_v42, %v853_v17 }
 0x4b9   : > { %v867_v43 = vpop.eup %866 }
 0x4ba   : > { %v322_v45 = vmul.f32 %v867_v43, %v855_v20 }
 0x4bc   : > { %v561_v46 = vpop.xlane.xlu1 %560  ;;  %v323_v47 = vpack.c.bf16 %v322_v45, %v321_v44 }
 0x4bd   : > { %872 = vrcp.f32 %v561_v46 }
 0x4be   : > { %v564_v48 = vpop.xlane.xlu0 %563  ;;  %777 = vmatmul.mubr.msk.bf16.vlgmr.msra.gmra.mrb[4].mxu0 %vm177_vm2, %v323_v47 }
 0x4bf   : > { %v869_v49 = vpop.eup %868  ;;  %874 = vrcp.f32 %v564_v48  ;;  %788 = vmatprep.mubr.msk.bf16.mxu0 %vm885_vm0, %v884_v0 }
 0x4c0   : > { %v444_v50 = vmul.f32 %v869_v49, %v857_v28  ;;  %v571_v54 = vpop.permute.xlu1 %570 }
 0x4c1   : > { %v871_v1 = vpop.eup %870 }
 0x4c2   : > { %v445_v51 = vmul.f32 %v871_v1, %v859_v30  ;;  %v448_v52 = vpop.permute.xlu0 %447 }
 0x4c3   : > { %787 = vmatpush3.bf16.msra.mxu0 %v448_v52 }
 0x4c4   : > { %v446_v53 = vpack.c.bf16 %v445_v51, %v444_v50  ;;  %798 = vmatprep.subr.bf16.mxu0 %v884_v0 }
 0x4c6   : > { %789 = vmatmul.mubr.msk.bf16.vlgmr.msra.gmra.mrb[8].mxu0 %vm177_vm2, %v446_v53 }
 0x4c7   : > { %v873_v55 = vpop.eup %872  ;;  %799 = vmatpush3.bf16.msra.mxu0 %v571_v54  ;;  %800 = vmatprep.mubr.msk.bf16.mxu0 %vm885_vm0, %v884_v0 }
 0x4c8   : > { %v567_v57 = vmul.f32 %v873_v55, %v861_v32 }
 0x4c9   : > { %v875_v56 = vpop.eup %874 }
 0x4ca   : > { %v568_v58 = vmul.f32 %v875_v56, %v863_v34 }
 0x4cc   : > { %v569_v59 = vpack.c.bf16 %v568_v58, %v567_v57 }
 0x4ce   : > { %801 = vmatmul.mubr.msk.bf16.vlgmr.msra.gmra.mrb[12].mxu0 %vm177_vm2, %v569_v59 }
 0x591   : > { %v364_v60 = vpop.f32.mrb[4].mxu0 }
 0x592   : > { %v778_v61 = vpop.f32.mrb[5].mxu0 }
 0x593   : > { %v367_v62 = vpop.f32.mrb[6].mxu0 }
 0x594   : > { %v828_v63 = vpack.i.bf16 %v367_v62, %v364_v60  ;;  %v779_v2 = vpop.f32.mrb[7].mxu0 }
 0x596   : > { %829 = vrot.lane.b32.xlu1 %v828_v63, %s897_s23 }
 0x599   : > { %v487_v3 = vpop.f32.mrb[8].mxu0 }
 0x59a   : > { %v790_v4 = vpop.f32.mrb[9].mxu0 }
 0x59b   : > { %v490_v5 = vpop.f32.mrb[10].mxu0 }
 0x59c   : > { %v833_v6 = vpack.i.bf16 %v490_v5, %v487_v3  ;;  %v791_v7 = vpop.f32.mrb[11].mxu0 }
 0x59e   : > { %834 = vrot.lane.b32.xlu0 %v833_v6, %s898_s24 }
 0x5a1   : > { %v610_v0 = vpop.f32.mrb[12].mxu0 }
 0x5a2   : > { %v802_v8 = vpop.f32.mrb[13].mxu0 }
 0x5a3   : > { %v613_v9 = vpop.f32.mrb[14].mxu0 }
 0x5a4   : > { %v838_v10 = vpack.i.bf16 %v613_v9, %v610_v0  ;;  %v803_v11 = vpop.f32.mrb[15].mxu0 }
 0x5a6   : > { %839 = vrot.lane.b32.xlu1 %v838_v10, %s899_s25 }
 0x608   : > { %v830_v12 = vpop.permute.xlu1 %829 }
 0x609   : > { %v832_v14 = vunpack.i.h.bf16 %v830_v12  ;;  %v831_v15 = vunpack.i.l.bf16 %v830_v12 }
 0x60b   : > { %v642_v19 = vsel %vm127_vm1, %v970_v41, %v832_v14  ;;  %v641_v20 = vsel %vm127_vm1, %v968_v39, %v831_v15 }
 0x610   : > { %v835_v13 = vpop.permute.xlu0 %834 }
 0x611   : > { %v837_v16 = vunpack.i.h.bf16 %v835_v13  ;;  %v836_v17 = vunpack.i.l.bf16 %v835_v13 }
 0x613   : > { %v644_v23 = vsel %vm177_vm2, %v642_v19, %v837_v16  ;;  %v643_v24 = vsel %vm177_vm2, %v641_v20, %v836_v17 }
 0x618   : > { %v840_v18 = vpop.permute.xlu1 %839 }
 0x619   : > { %v842_v21 = vunpack.i.h.bf16 %v840_v18  ;;  %v841_v22 = vunpack.i.l.bf16 %v840_v18 }
 0x61b   : > { %v647_v25 = vsel %vm645_vm3, %v644_v23, %v842_v21  ;;  %v646_v26 = vsel %vm645_vm3, %v643_v24, %v841_v22 }
 0x61c   : > { %v739_v27 = vpack.c.bf16 %v647_v25, %v647_v25  ;;  %v738_v28 = vpack.c.bf16 %v646_v26, %v646_v26 }
 0x61e   : > { %658 = vst.msk [vmem:[%s116_s28 + $0x4] sm:$0xf] %vm656_vm4, %v739_v27  ;;  %657 = vst.msk [vmem:[%s116_s28] sm:$0xf] %vm656_vm4, %v738_v28 }
 0x61f PF: > { %s11_s6 = sadd.s32 1, %s882_s6  }
 0x620   : > { %p8_p4 = scmp.ge.s32.totalorder %s11_s6, 4  }
 0x622   :  { %10 = sbr.rel (!%p8_p4) target bundleno = 1 (0x1), region = 54 }

// kernel: simple_vit_ae_forward.52
= control target key start
LH: loop header
LB: loop body
LE: loop exit
PB: predicated region body
PF: predicated region fallthrough
CT: control target
= control target key end

     0   :  { %vm37_vm0 = vcmask 261120   ;;  %vm129_vm1 = vcmask 257024   ;;  %s241_s0 = inlined_call_operand.vmem [shape: bf16[32,32], index: 0, kind: input, shape index: {}]   ;;  %s242_s1 = inlined_call_operand.vmem [shape: bf16[32,32], index: 1, kind: input, shape index: {}]   ;;  %s243_s2 = inlined_call_operand.vmem [shape: f32[1,32], index: 2, kind: input, shape index: {}]   ;;  %s244_s3 = inlined_call_operand.vmem [shape: f32[1,32], index: 3, kind: input, shape index: {}]   ;;  %s245_s4 = inlined_call_operand.vmem [shape: bf16[32,32], index: 4, kind: output, shape index: {}]  }
   0x1   :  { %v149_v0 = vld [vmem:[%s241_s0] sm:$0xff]   ;;  %v164_v2 = vld [vmem:[%s241_s0 + $0x8] sm:$0xff]  }
   0x2   :  { %v157_v1 = vld [vmem:[%s242_s1] sm:$0xff]   ;;  %v150_v3 = vunpack.c.l.bf16 %v149_v0  ;;  %v154_v5 = vunpack.c.l.bf16 %v164_v2  ;;  %v165_v6 = vld [vmem:[%s242_s1 + $0x8] sm:$0xff]   ;;  %v151_v7 = vunpack.c.h.bf16 %v149_v0  ;;  %v155_v10 = vunpack.c.h.bf16 %v164_v2 }
   0x3   :  { %v158_v4 = vunpack.c.l.bf16 %v157_v1  ;;  %v162_v8 = vunpack.c.l.bf16 %v165_v6  ;;  %v159_v9 = vunpack.c.h.bf16 %v157_v1  ;;  %v163_v11 = vunpack.c.h.bf16 %v165_v6  ;;  %v138_v53 = vld [vmem:[%s243_s2] ss:$0 sm:$0xff] }
   0x4   :  { %v139_v55 = vld [vmem:[%s244_s3] ss:$0 sm:$0xff] }
   0x5   :  { %v33_v12 = vadd.f32 %v158_v4, %v150_v3  ;;  %v35_v13 = vadd.f32 %v162_v8, %v154_v5  ;;  %v34_v14 = vadd.f32 %v159_v9, %v151_v7  ;;  %v36_v15 = vadd.f32 %v163_v11, %v155_v10 }
   0x7   :  { %v38_v16 = vsel %vm37_vm0, %v33_v12, 0.0  ;;  %v44_v17 = vsel %vm37_vm0, %v35_v13, 0.0  ;;  %v41_v18 = vsel %vm37_vm0, %v34_v14, 0.0  ;;  %v47_v19 = vsel %vm37_vm0, %v36_v15, 0.0 }
   0x8   :  { %39 = vadd.xlane.f32.xlu0 %v38_v16  ;;  %45 = vadd.xlane.f32.xlu1 %v44_v17 }
   0xc   :  { %42 = vadd.xlane.f32.xlu0 %v41_v18  ;;  %48 = vadd.xlane.f32.xlu1 %v47_v19 }
  0x95   :  { %v40_v20 = vpop.xlane.xlu0 %39  ;;  %v46_v22 = vpop.xlane.xlu1 %45 }
  0x96   :  { %v51_v21 = vmul.f32 0.03125, %v40_v20  ;;  %v53_v23 = vmul.f32 0.03125, %v46_v22 }
  0x98   :  { %v55_v24 = vsub.f32 %v33_v12, %v51_v21  ;;  %v57_v25 = vsub.f32 %v35_v13, %v53_v23 }
  0x99   :  { %v43_v26 = vpop.xlane.xlu0 %42  ;;  %v49_v28 = vpop.xlane.xlu1 %48 }
  0x9a   :  { %v52_v27 = vmul.f32 0.03125, %v43_v26  ;;  %v59_v29 = vmul.f32 %v55_v24, %v55_v24  ;;  %v54_v30 = vmul.f32 0.03125, %v49_v28  ;;  %v61_v31 = vmul.f32 %v57_v25, %v57_v25 }
  0x9c   :  { %v56_v32 = vsub.f32 %v34_v14, %v52_v27  ;;  %v63_v33 = vsel %vm37_vm0, %v59_v29, 0.0  ;;  %v58_v34 = vsub.f32 %v36_v15, %v54_v30  ;;  %v69_v35 = vsel %vm37_vm0, %v61_v31, 0.0 }
  0x9d   :  { %64 = vadd.xlane.f32.xlu0 %v63_v33 }
  0x9e   :  { %v60_v36 = vmul.f32 %v56_v32, %v56_v32  ;;  %v62_v37 = vmul.f32 %v58_v34, %v58_v34 }
  0xa0   :  { %v66_v38 = vsel %vm37_vm0, %v60_v36, 0.0  ;;  %v72_v39 = vsel %vm37_vm0, %v62_v37, 0.0 }
  0xa1   :  { %70 = vadd.xlane.f32.xlu0 %v69_v35  ;;  %67 = vadd.xlane.f32.xlu1 %v66_v38 }
  0xa5   :  { %73 = vadd.xlane.f32.xlu1 %v72_v39 }
 0x12a   :  { %v65_v40 = vpop.xlane.xlu0 %64 }
 0x12b   :  { %v75_v41 = vmul.f32 0.03125, %v65_v40 }
 0x12d   :  { %v79_v42 = vadd.f32 1e-05, %v75_v41 }
 0x12e   :  { %v68_v43 = vpop.xlane.xlu1 %67  ;;  %v71_v44 = vpop.xlane.xlu0 %70 }
 0x12f   :  { %166 = vrsqrt.f32 %v79_v42  ;;  %v76_v45 = vmul.f32 0.03125, %v68_v43  ;;  %v77_v46 = vmul.f32 0.03125, %v71_v44 }
 0x131   :  { %v80_v47 = vadd.f32 1e-05, %v76_v45  ;;  %v81_v48 = vadd.f32 1e-05, %v77_v46 }
 0x132   :  { %v74_v49 = vpop.xlane.xlu1 %73 }
 0x133   :  { %168 = vrsqrt.f32 %v80_v47  ;;  %v78_v50 = vmul.f32 0.03125, %v74_v49 }
 0x134   :  { %170 = vrsqrt.f32 %v81_v48 }
 0x135   :  { %v82_v51 = vadd.f32 1e-05, %v78_v50 }
 0x137   :  { %172 = vrsqrt.f32 %v82_v51 }
 0x139   :  { %v167_v52 = vpop.eup %166 }
 0x13a   :  { %v87_v54 = vmul.f32 %v167_v52, %v55_v24 }
 0x13c   :  { %v98_v56 = vmul.f32 %v138_v53, %v87_v54 }
 0x13d   :  { %v169_v57 = vpop.eup %168 }
 0x13e   :  { %v171_v58 = vpop.eup %170  ;;  %v109_v59 = vadd.f32 %v139_v55, %v98_v56  ;;  %v88_v60 = vmul.f32 %v169_v57, %v56_v32 }
 0x13f   :  { %v89_v61 = vmul.f32 %v171_v58, %v57_v25 }
 0x140   :  { %v144_v62 = vpack.c.bf16 %v109_v59, %v109_v59  ;;  %v99_v63 = vmul.f32 %v138_v53, %v88_v60 }
 0x141   :  { %v173_v0 = vpop.eup %172  ;;  %v100_v1 = vmul.f32 %v138_v53, %v89_v61 }
 0x142   :  { %130 = vst.msk [vmem:[%s245_s4] sm:$0xf] %vm129_vm1, %v144_v62  ;;  %v110_v2 = vadd.f32 %v139_v55, %v99_v63  ;;  %v90_v3 = vmul.f32 %v173_v0, %v58_v34 }
 0x143   :  { %v111_v4 = vadd.f32 %v139_v55, %v100_v1 }
 0x144   :  { %v145_v5 = vpack.c.bf16 %v110_v2, %v110_v2  ;;  %v101_v6 = vmul.f32 %v138_v53, %v90_v3 }
 0x145   :  { %v146_v7 = vpack.c.bf16 %v111_v4, %v111_v4 }
 0x146   :  { %131 = vst.msk [vmem:[%s245_s4 + $0x4] sm:$0xf] %vm129_vm1, %v145_v5  ;;  %v112_v8 = vadd.f32 %v139_v55, %v101_v6 }
 0x147   :  { %132 = vst.msk [vmem:[%s245_s4 + $0x8] sm:$0xf] %vm129_vm1, %v146_v7 }
 0x148   :  { %v147_v9 = vpack.c.bf16 %v112_v8, %v112_v8 }
 0x14a   :  { %133 = vst.msk [vmem:[%s245_s4 + $0xc] sm:$0xf] %vm129_vm1, %v147_v9 }

// kernel: simple_vit_ae_forward.53
= control target key start
LH: loop header
LB: loop body
LE: loop exit
PB: predicated region body
PF: predicated region fallthrough
CT: control target
= control target key end

     0   :  { %vm19_vm0 = vcmask 523264   ;;  %v226_v1 = vmov 0.0   ;;  %vm58_vm1 = vcmask 261120   ;;  %vm177_vm2 = vcmask 519168   ;;  %s282_s1 = inlined_call_operand.vmem [shape: bf16[32,64], index: 1, kind: input, shape index: {}]   ;;  %s283_s0 = inlined_call_operand.vmem [shape: bf16[32,32], index: 0, kind: input, shape index: {}]   ;;  %s284_s2 = inlined_call_operand.vmem [shape: f32[1,64], index: 2, kind: input, shape index: {}]   ;;  %s285_s3 = inlined_call_operand.vmem [shape: bf16[32,64], index: 3, kind: output, shape index: {}]  }
   0x1   :  { %v214_v0 = vld [vmem:[%s282_s1] sm:$0xff]   ;;  %22 = vst.msk [vmem:[#allocation2 + $0x10] sm:$0xff] %vm19_vm0, %v226_v1  ;;  %20 = vst.msk [vmem:[#allocation2] sm:$0xff] %vm19_vm0, %v226_v1  ;;  %v215_v2 = vld [vmem:[%s282_s1 + $0x8] sm:$0xff]  }
   0x2   :  { %21 = vst.msk [vmem:[#allocation2 + $0x8] sm:$0xff] %vm19_vm0, %v226_v1  ;;  %23 = vst.msk [vmem:[#allocation2 + $0x18] sm:$0xff] %vm19_vm0, %v226_v1  ;;  %205 = vmatprep.subr.bf16.mxu0 %v214_v0  ;;  %v216_v3 = vld [vmem:[%s283_s0] sm:$0xff]   ;;  %v217_v4 = vld [vmem:[%s283_s0 + $0x8] sm:$0xff]  }
   0x3   :  { %206 = vmatpush3.bf16.msra.mxu0 %v214_v0  ;;  %209 = vmatprep.mubr.msk.bf16.mxu0 %vm58_vm1, %v216_v3  ;;  %v192_v17 = vld [vmem:[%s284_s2] ss:$0 sm:$0xff] }
   0x4   :  { %207 = vmatprep.subr.bf16.mxu0 %v215_v2 }
   0x7   :  { %208 = vmatpush3.bf16.msra.mxu0 %v215_v2 }
   0x8   :  { %v26_v5 = vld [vmem:[#allocation2 + $0x10] sm:$0xff]  ;;  %v24_v6 = vld [vmem:[#allocation2] sm:$0xff] }
   0x9   :  { %v27_v8 = vld [vmem:[#allocation2 + $0x18] sm:$0xff]  ;;  %v25_v11 = vld [vmem:[#allocation2 + $0x8] sm:$0xff] }
   0xa   :  { %210 = vmatmul.mubr.msk.bf16.vlgmr.msra.gmra.mrb[0].mxu0 %vm58_vm1, %v217_v4 }
  0xdd   :  { %v211_v7 = vpop.f32.mrb[0].mxu0 }
  0xde   :  { %v116_v9 = vadd.f32 %v211_v7, %v26_v5  ;;  %v99_v10 = vpop.f32.mrb[1].mxu0 }
  0xdf   :  { %v114_v12 = vadd.f32 %v99_v10, %v24_v6  ;;  %v212_v13 = vpop.f32.mrb[2].mxu0 }
  0xe0   :  { %121 = vst.msk [vmem:[#allocation2 + $0x10] sm:$0xff] %vm19_vm0, %v116_v9  ;;  %v117_v14 = vadd.f32 %v212_v13, %v27_v8  ;;  %v102_v15 = vpop.f32.mrb[3].mxu0 }
  0xe1   :  { %119 = vst.msk [vmem:[#allocation2] sm:$0xff] %vm19_vm0, %v114_v12  ;;  %v115_v16 = vadd.f32 %v102_v15, %v25_v11 }
  0xe2   :  { %122 = vst.msk [vmem:[#allocation2 + $0x18] sm:$0xff] %vm19_vm0, %v117_v14 }
  0xe3   :  { %120 = vst.msk [vmem:[#allocation2 + $0x8] sm:$0xff] %vm19_vm0, %v115_v16 }
  0xe7   :  { %v128_v18 = vld [vmem:[#allocation2 + $0x10] sm:$0xff] }
  0xe8   :  { %v139_v19 = vadd.f32 %v192_v17, %v128_v18  ;;  %v126_v20 = vld [vmem:[#allocation2] sm:$0xff] }
  0xe9   :  { %v137_v21 = vadd.f32 %v192_v17, %v126_v20  ;;  %v129_v22 = vld [vmem:[#allocation2 + $0x18] sm:$0xff] }
  0xea   :  { %v147_v23 = vmul.f32 0.70710677, %v139_v19  ;;  %v140_v24 = vadd.f32 %v192_v17, %v129_v22  ;;  %v127_v25 = vld [vmem:[#allocation2 + $0x8] sm:$0xff]  ;;  %v143_v32 = vmul.f32 0.5, %v139_v19 }
  0xeb   :  { %v145_v26 = vmul.f32 0.70710677, %v137_v21  ;;  %v138_v27 = vadd.f32 %v192_v17, %v127_v25  ;;  %v141_v35 = vmul.f32 0.5, %v137_v21 }
  0xec   :  { %218 = verf.f32 %v147_v23  ;;  %v148_v28 = vmul.f32 0.70710677, %v140_v24  ;;  %v144_v39 = vmul.f32 0.5, %v140_v24 }
  0xed   :  { %220 = verf.f32 %v145_v26  ;;  %v146_v29 = vmul.f32 0.70710677, %v138_v27  ;;  %v142_v42 = vmul.f32 0.5, %v138_v27 }
  0xee   :  { %222 = verf.f32 %v148_v28 }
  0xef   :  { %224 = verf.f32 %v146_v29 }
  0xf6   :  { %v219_v30 = vpop.eup %218 }
  0xf7   :  { %v221_v31 = vpop.eup %220  ;;  %v155_v33 = vadd.f32 1.0, %v219_v30 }
  0xf8   :  { %v223_v34 = vpop.eup %222  ;;  %v153_v36 = vadd.f32 1.0, %v221_v31 }
  0xf9   :  { %v225_v37 = vpop.eup %224  ;;  %v159_v38 = vmul.f32 %v155_v33, %v143_v32  ;;  %v156_v40 = vadd.f32 1.0, %v223_v34 }
  0xfa   :  { %v157_v41 = vmul.f32 %v153_v36, %v141_v35  ;;  %v154_v43 = vadd.f32 1.0, %v225_v37 }
  0xfb   :  { %v199_v44 = vpack.c.bf16 %v159_v38, %v159_v38  ;;  %v160_v45 = vmul.f32 %v156_v40, %v144_v39 }
  0xfc   :  { %v197_v46 = vpack.c.bf16 %v157_v41, %v157_v41  ;;  %v158_v47 = vmul.f32 %v154_v43, %v142_v42 }
  0xfd   :  { %180 = vst.msk [vmem:[%s285_s3 + $0x8] sm:$0xf] %vm177_vm2, %v199_v44  ;;  %v200_v48 = vpack.c.bf16 %v160_v45, %v160_v45 }
  0xfe   :  { %178 = vst.msk [vmem:[%s285_s3] sm:$0xf] %vm177_vm2, %v197_v46  ;;  %v198_v49 = vpack.c.bf16 %v158_v47, %v158_v47 }
  0xff   :  { %181 = vst.msk [vmem:[%s285_s3 + $0xc] sm:$0xf] %vm177_vm2, %v200_v48 }
 0x100   :  { %179 = vst.msk [vmem:[%s285_s3 + $0x4] sm:$0xf] %vm177_vm2, %v198_v49 }

// kernel: simple_vit_ae_forward.63
= control target key start
LH: loop header
LB: loop body
LE: loop exit
PB: predicated region body
PF: predicated region fallthrough
CT: control target
= control target key end

     0   :  { %vm19_vm0 = vcmask 523264   ;;  %v173_v1 = vmov 0.0   ;;  %vm58_vm1 = vcmask 261120   ;;  %s233_s1 = inlined_call_operand.vmem [shape: bf16[32,64], index: 1, kind: input, shape index: {}]   ;;  %s234_s0 = inlined_call_operand.vmem [shape: bf16[32,32], index: 0, kind: input, shape index: {}]   ;;  %s235_s2 = inlined_call_operand.vmem [shape: f32[1,64], index: 2, kind: input, shape index: {}]   ;;  %s236_s3 = inlined_call_operand.vmem [shape: f32[32,64], index: 3, kind: output, shape index: {}]  }
   0x1   :  { %v169_v0 = vld [vmem:[%s233_s1] sm:$0xff]   ;;  %22 = vst.msk [vmem:[#allocation2 + $0x10] sm:$0xff] %vm19_vm0, %v173_v1  ;;  %20 = vst.msk [vmem:[#allocation2] sm:$0xff] %vm19_vm0, %v173_v1  ;;  %v170_v2 = vld [vmem:[%s233_s1 + $0x8] sm:$0xff]  }
   0x2   :  { %21 = vst.msk [vmem:[#allocation2 + $0x8] sm:$0xff] %vm19_vm0, %v173_v1  ;;  %23 = vst.msk [vmem:[#allocation2 + $0x18] sm:$0xff] %vm19_vm0, %v173_v1  ;;  %160 = vmatprep.subr.bf16.mxu0 %v169_v0  ;;  %v171_v3 = vld [vmem:[%s234_s0] sm:$0xff]   ;;  %v172_v4 = vld [vmem:[%s234_s0 + $0x8] sm:$0xff]  }
   0x3   :  { %161 = vmatpush3.bf16.msra.mxu0 %v169_v0  ;;  %164 = vmatprep.mubr.msk.bf16.mxu0 %vm58_vm1, %v171_v3  ;;  %v155_v17 = vld [vmem:[%s235_s2] ss:$0 sm:$0xff] }
   0x4   :  { %162 = vmatprep.subr.bf16.mxu0 %v170_v2 }
   0x7   :  { %163 = vmatpush3.bf16.msra.mxu0 %v170_v2 }
   0x8   :  { %v26_v5 = vld [vmem:[#allocation2 + $0x10] sm:$0xff]  ;;  %v24_v6 = vld [vmem:[#allocation2] sm:$0xff] }
   0x9   :  { %v27_v8 = vld [vmem:[#allocation2 + $0x18] sm:$0xff]  ;;  %v25_v11 = vld [vmem:[#allocation2 + $0x8] sm:$0xff] }
   0xa   :  { %165 = vmatmul.mubr.msk.bf16.vlgmr.msra.gmra.mrb[0].mxu0 %vm58_vm1, %v172_v4 }
  0xdd   :  { %v166_v7 = vpop.f32.mrb[0].mxu0 }
  0xde   :  { %v116_v9 = vadd.f32 %v166_v7, %v26_v5  ;;  %v99_v10 = vpop.f32.mrb[1].mxu0 }
  0xdf   :  { %v114_v12 = vadd.f32 %v99_v10, %v24_v6  ;;  %v167_v13 = vpop.f32.mrb[2].mxu0 }
  0xe0   :  { %121 = vst.msk [vmem:[#allocation2 + $0x10] sm:$0xff] %vm19_vm0, %v116_v9  ;;  %v117_v14 = vadd.f32 %v167_v13, %v27_v8  ;;  %v102_v15 = vpop.f32.mrb[3].mxu0 }
  0xe1   :  { %119 = vst.msk [vmem:[#allocation2] sm:$0xff] %vm19_vm0, %v114_v12  ;;  %v115_v16 = vadd.f32 %v102_v15, %v25_v11 }
  0xe2   :  { %122 = vst.msk [vmem:[#allocation2 + $0x18] sm:$0xff] %vm19_vm0, %v117_v14 }
  0xe3   :  { %120 = vst.msk [vmem:[#allocation2 + $0x8] sm:$0xff] %vm19_vm0, %v115_v16 }
  0xe7   :  { %v128_v18 = vld [vmem:[#allocation2 + $0x10] sm:$0xff] }
  0xe8   :  { %v139_v19 = vadd.f32 %v155_v17, %v128_v18  ;;  %v126_v20 = vld [vmem:[#allocation2] sm:$0xff] }
  0xe9   :  { %v137_v21 = vadd.f32 %v155_v17, %v126_v20  ;;  %v129_v22 = vld [vmem:[#allocation2 + $0x18] sm:$0xff] }
  0xea   :  { %143 = vst.msk [vmem:[%s236_s3 + $0x10] sm:$0xff] %vm19_vm0, %v139_v19  ;;  %v140_v23 = vadd.f32 %v155_v17, %v129_v22  ;;  %v127_v24 = vld [vmem:[#allocation2 + $0x8] sm:$0xff] }
  0xeb   :  { %141 = vst.msk [vmem:[%s236_s3] sm:$0xff] %vm19_vm0, %v137_v21  ;;  %v138_v25 = vadd.f32 %v155_v17, %v127_v24 }
  0xec   :  { %144 = vst.msk [vmem:[%s236_s3 + $0x18] sm:$0xff] %vm19_vm0, %v140_v23 }
  0xed   :  { %142 = vst.msk [vmem:[%s236_s3 + $0x8] sm:$0xff] %vm19_vm0, %v138_v25 }

</bundles_post_ra>
